<compile_context>
chip_gen: v6e
topology: v6e:2x2x1
jax: 0.10.0
libtpu: 0.0.40
codegen_flags: <defaults>
</compile_context>

<pallas_src>
import functools

import numpy as np
import jax
import jax.numpy as jnp
from jax.experimental import pallas as pl
from jax.experimental.pallas import tpu as pltpu

BN_EPS = 1e-5
BN_SCALE = (1.0 + BN_EPS) ** -0.5      # gamma/sqrt(var+eps) with deterministic init

VM = pl.BlockSpec(memory_space=pltpu.MemorySpace.VMEM)


# ----------------------------- fused block kernel ---------------------------

def _fused_block_kernel(*args, hw, stride, has_pre, has_down):
    """One full RobustResNetDW block for a single batch element (grid over N)."""
    h, w = hw
    ho, wo = h // stride, w // stride

    it = iter(args)
    x_ref = next(it)
    if has_pre:
        pre_w_ref, pre_b_ref = next(it), next(it)
    w1_ref, b1_ref = next(it), next(it)
    taps_ref = next(it)                      # (9, ho*wo, h*w) shift/pad/stride matrices
    wd_ref, bd_ref = next(it), next(it)      # (9, dim), (1, dim)
    w3_ref, b3_ref = next(it), next(it)
    if has_down:
        dn_w_ref, dn_b_ref = next(it), next(it)
    o_ref = next(it)

    out_ch = w3_ref.shape[1]

    # ---- input (one image); optional stem patch-embed matmul fused in ----
    x2d = x_ref[...].reshape(h * w, x_ref.shape[-1])            # (h*w, cin) f32
    if has_pre:
        x2d = jnp.dot(x2d.astype(jnp.bfloat16), pre_w_ref[...],
                      preferred_element_type=jnp.float32) + pre_b_ref[...]

    # ---- 1x1 reduce (BN folded into weights) + ReLU ----
    y = jnp.dot(x2d.astype(jnp.bfloat16), w1_ref[...],
                preferred_element_type=jnp.float32) + b1_ref[...]
    y = jnp.maximum(y, 0.0)                                     # (h*w, dim) f32

    # ---- depthwise 3x3 (stride s, pad 1) + folded BN + ReLU ----
    # tap matrix T[t] gathers the zero-padded, strided input rows for tap t,
    # so only the strided output positions are ever computed.
    acc = jnp.zeros((ho * wo, y.shape[1]), jnp.float32)
    for t in range(9):
        shifted = jnp.dot(taps_ref[t], y, preferred_element_type=jnp.float32)
        acc = acc + shifted * wd_ref[t]
    dw = jnp.maximum(acc + bd_ref[...], 0.0)                    # (ho*wo, dim) f32

    # ---- 1x1 expand (BN * layer_scale folded into weights/bias) ----
    z = jnp.dot(dw.astype(jnp.bfloat16), w3_ref[...],
                preferred_element_type=jnp.float32) + b3_ref[...]

    # ---- shortcut: identity or 1x1 (stride s) downsample conv + folded BN ----
    if has_down:
        if stride > 1:
            # centre tap (index 4) is exactly the stride-s spatial subsample.
            sc_in = jnp.dot(taps_ref[4], x2d, preferred_element_type=jnp.float32)
        else:
            sc_in = x2d
        sc = jnp.dot(sc_in.astype(jnp.bfloat16), dn_w_ref[...],
                     preferred_element_type=jnp.float32) + dn_b_ref[...]
    else:
        sc = x2d                                                # cin == out_ch, stride 1

    o_ref[...] = jnp.maximum(sc + z, 0.0).reshape(1, ho, wo, out_ch)


def _rep_spec(a):
    """Full-array block, replicated across the batch grid."""
    zeros = (0,) * a.ndim
    return pl.BlockSpec(a.shape, lambda b, _z=zeros: _z)


def _dw_tap_matrices(h, w, stride):
    """(9, ho*wo, h*w) 0/1 matrices: tap t row-gathers the padded+strided input."""
    ho, wo = h // stride, w // stride
    taps = np.zeros((9, ho * wo, h * w), np.float32)
    for di in range(3):
        for dj in range(3):
            t = di * 3 + dj
            for i in range(ho):
                for j in range(wo):
                    r = i * stride + di - 1
                    c = j * stride + dj - 1
                    if 0 <= r < h and 0 <= c < w:
                        taps[t, i * wo + j, r * w + c] = 1.0
    return jnp.asarray(taps)


def run_block(x, p):
    """x: (N, H, W, Cx) f32 (Cx = in-channels, or patch dim for the stem block)."""
    n, h, w, cx = x.shape
    stride = p['stride']
    out_ch = p['out_ch']
    ho, wo = h // stride, w // stride
    has_pre = p['pre_w'] is not None
    has_down = p['has_down']

    taps = _dw_tap_matrices(h, w, stride)

    inputs = [x]
    in_specs = [pl.BlockSpec((1, h, w, cx), lambda b: (b, 0, 0, 0))]
    if has_pre:
        inputs += [p['pre_w'], p['pre_b']]
        in_specs += [_rep_spec(p['pre_w']), _rep_spec(p['pre_b'])]
    for a in (p['w1'], p['b1'], taps, p['wd'], p['bd'], p['w3'], p['b3']):
        inputs.append(a)
        in_specs.append(_rep_spec(a))
    if has_down:
        inputs += [p['dn_w'], p['dn_b']]
        in_specs += [_rep_spec(p['dn_w']), _rep_spec(p['dn_b'])]

    kern = functools.partial(_fused_block_kernel, hw=(h, w), stride=stride,
                             has_pre=has_pre, has_down=has_down)
    return pl.pallas_call(
        kern,
        out_shape=jax.ShapeDtypeStruct((n, ho, wo, out_ch), jnp.float32),
        grid=(n,),
        in_specs=in_specs,
        out_specs=pl.BlockSpec((1, ho, wo, out_ch), lambda b: (b, 0, 0, 0)),
        compiler_params=pltpu.CompilerParams(
            dimension_semantics=("parallel",)),
    )(*inputs)


# --------------------------- fused head (GAP + FC) --------------------------

def _head_kernel(x_ref, w_ref, b_ref, o_ref):
    pooled = jnp.mean(x_ref[...], axis=1)                       # (N, C)
    o_ref[...] = jnp.dot(pooled.astype(jnp.bfloat16), w_ref[...],
                         preferred_element_type=jnp.float32) + b_ref[...]


def head_forward(y_nhwc, fc_w, fc_b):
    n, h, w, c = y_nhwc.shape
    nc = fc_w.shape[1]
    return pl.pallas_call(
        _head_kernel,
        out_shape=jax.ShapeDtypeStruct((n, nc), jnp.float32),
        in_specs=[VM, VM, VM],
        out_specs=VM,
    )(y_nhwc.reshape(n, h * w, c), fc_w, fc_b)


# ----------------------------- parameter creation ---------------------------

def _conv_w(key, fan_in, fan_out):
    # kaiming-normal-ish (fan_out, relu), deterministic from key
    std = (2.0 / fan_out) ** 0.5
    return jax.random.normal(key, (fan_in, fan_out), jnp.float32) * std


def make_block_params(key, indim, dim, mlp_ratio, stride, layer_scale_init):
    out_ch = int(dim * mlp_ratio)
    k1, k2, k3, k4 = jax.random.split(key, 4)
    s = BN_SCALE
    # conv biases are zero-init and the folded BN shift is zero under the
    # deterministic init, so all folded biases start at zero (kept as params
    # for generality with real checkpoints).
    p = {
        'stride': stride, 'dim': dim, 'out_ch': out_ch, 'has_down': False,
        'pre_w': None, 'pre_b': None,
        'w1': (_conv_w(k1, indim, dim) * s).astype(jnp.bfloat16),
        'b1': jnp.zeros((1, dim), jnp.float32),
        'wd': jax.random.normal(k2, (9, dim), jnp.float32) * ((2.0 / 9.0) ** 0.5 * s),
        'bd': jnp.zeros((1, dim), jnp.float32),
        'w3': (_conv_w(k3, dim, out_ch) * (s * layer_scale_init)).astype(jnp.bfloat16),
        'b3': jnp.zeros((1, out_ch), jnp.float32),
    }
    if indim != out_ch or stride > 1:
        # downsample_conv with down_kernel_size=1 -> 1x1 conv (stride s) + BN, folded
        p['has_down'] = True
        p['dn_w'] = (_conv_w(k4, indim, out_ch) * s).astype(jnp.bfloat16)
        p['dn_b'] = jnp.zeros((1, out_ch), jnp.float32)
    return p


def make_model_params(key, in_chans=3, num_classes=10, patch_size=16,
                      depths=(2, 1, 1, 1), dims=(8, 16, 32, 64),
                      stride_stage=(3,), mlp_ratio=4.0,
                      layer_scale_init_value=1e-6):
    keys = jax.random.split(key, sum(depths) + 2)
    kidx = 0
    blocks = []
    prev = dims[0]
    for i in range(4):
        stage_stride = 2 if i in stride_stage else 1
        for bi in range(depths[i]):
            stride = stage_stride if bi == 0 else 1
            blocks.append(make_block_params(keys[kidx], prev, dims[i], mlp_ratio,
                                            stride, layer_scale_init_value))
            kidx += 1
            prev = int(dims[i] * mlp_ratio)
    # 16x16 stride-16 stem conv == patch-embed matmul; fused into block 0.
    stem_fan_in = patch_size * patch_size * in_chans
    stem_w = jax.random.normal(keys[kidx], (stem_fan_in, dims[0]), jnp.float32)
    stem_w = stem_w * (2.0 / dims[0]) ** 0.5
    blocks[0]['pre_w'] = stem_w.astype(jnp.bfloat16)
    blocks[0]['pre_b'] = jnp.zeros((1, dims[0]), jnp.float32)
    kidx += 1
    num_features = prev
    fc_w = jax.random.normal(keys[kidx], (num_features, num_classes),
                             jnp.float32) * (1.0 / num_features) ** 0.5
    return {
        'patch_size': patch_size,
        'blocks': blocks,
        'num_features': num_features,
        'fc_w': fc_w.astype(jnp.bfloat16),
        'fc_b': jnp.zeros((1, num_classes), jnp.float32),
    }


# ---------------------------------- forward ---------------------------------

def robust_resnet_forward(x_nchw, params):
    # boundary: NCHW (PyTorch) -> NHWC (kernel layout)
    x = jnp.transpose(x_nchw, (0, 2, 3, 1)).astype(jnp.float32)
    n, h, w, c = x.shape
    ps = params['patch_size']
    ho, wo = h // ps, w // ps
    # patch extraction is pure data movement; the stem matmul itself runs
    # inside the first fused block kernel.
    patches = x.reshape(n, ho, ps, wo, ps, c).transpose(0, 1, 3, 2, 4, 5)
    y = patches.reshape(n, ho, wo, ps * ps * c)

    for blk in params['blocks']:
        y = run_block(y, blk)

    # head: global-avg-pool + fc fused into one kernel (dropout p=0).
    return head_forward(y, params['fc_w'], params['fc_b'])


# ----------------------------------- main ------------------------------------

if __name__ == "__main__":
    key = jax.random.PRNGKey(0)
    pkey, xkey = jax.random.split(key)

    params = make_model_params(
        pkey,
        in_chans=3,
        num_classes=10,
        patch_size=16,
        depths=(2, 1, 1, 1),
        dims=(8, 16, 32, 64),
        stride_stage=(3,),
        mlp_ratio=4.0,
        layer_scale_init_value=1e-6,
    )

    # small but consistent input: NCHW, spatial a multiple of 32 (patch 16 + one stride-2 stage)
    x = jax.random.normal(xkey, (2, 3, 64, 64), jnp.float32)

    forward = jax.jit(functools.partial(robust_resnet_forward, params=params))
    logits = jax.block_until_ready(forward(x))

    assert logits.shape == (2, 10), logits.shape
    assert bool(jnp.all(jnp.isfinite(logits)))
    print("KERNEL_OK")
</pallas_src>

<mosaic_0001>
module attributes {stable_mosaic.version = 11 : i64} {
  func.func @_fused_block_kernel(%arg0: i32, %arg1: memref<1x4x4x768xf32, #tpu.memory_space<vmem>>, %arg2: memref<768x8xbf16, #tpu.memory_space<vmem>>, %arg3: memref<1x8xf32, #tpu.memory_space<vmem>>, %arg4: memref<8x8xbf16, #tpu.memory_space<vmem>>, %arg5: memref<1x8xf32, #tpu.memory_space<vmem>>, %arg6: memref<9x16x16xf32, #tpu.memory_space<vmem>>, %arg7: memref<9x8xf32, #tpu.memory_space<vmem>>, %arg8: memref<1x8xf32, #tpu.memory_space<vmem>>, %arg9: memref<8x32xbf16, #tpu.memory_space<vmem>>, %arg10: memref<1x32xf32, #tpu.memory_space<vmem>>, %arg11: memref<8x32xbf16, #tpu.memory_space<vmem>>, %arg12: memref<1x32xf32, #tpu.memory_space<vmem>>, %arg13: memref<1x4x4x32xf32, #tpu.memory_space<vmem>>) attributes {dimension_semantics = [#tpu.dimension_semantics<parallel>], iteration_bounds = array<i64: 2>, scalar_prefetch = 0 : i64, scratch_operands = 0 : i64, tpu.core_type = #tpu.core_type<tc>, window_params = [{transform_indices = @transform_0, window_bounds = array<i64: 1, 4, 4, 768>}, {pipeline_mode = #tpu.pipeline_mode<synchronous>, transform_indices = @transform_1, window_bounds = array<i64: 768, 8>}, {pipeline_mode = #tpu.pipeline_mode<synchronous>, transform_indices = @transform_2, window_bounds = array<i64: 1, 8>}, {pipeline_mode = #tpu.pipeline_mode<synchronous>, transform_indices = @transform_3, window_bounds = array<i64: 8, 8>}, {pipeline_mode = #tpu.pipeline_mode<synchronous>, transform_indices = @transform_4, window_bounds = array<i64: 1, 8>}, {pipeline_mode = #tpu.pipeline_mode<synchronous>, transform_indices = @transform_5, window_bounds = array<i64: 9, 16, 16>}, {pipeline_mode = #tpu.pipeline_mode<synchronous>, transform_indices = @transform_6, window_bounds = array<i64: 9, 8>}, {pipeline_mode = #tpu.pipeline_mode<synchronous>, transform_indices = @transform_7, window_bounds = array<i64: 1, 8>}, {pipeline_mode = #tpu.pipeline_mode<synchronous>, transform_indices = @transform_8, window_bounds = array<i64: 8, 32>}, {pipeline_mode = #tpu.pipeline_mode<synchronous>, transform_indices = @transform_9, window_bounds = array<i64: 1, 32>}, {pipeline_mode = #tpu.pipeline_mode<synchronous>, transform_indices = @transform_10, window_bounds = array<i64: 8, 32>}, {pipeline_mode = #tpu.pipeline_mode<synchronous>, transform_indices = @transform_11, window_bounds = array<i64: 1, 32>}, {transform_indices = @transform_12, window_bounds = array<i64: 1, 4, 4, 32>}]} {
    %c0 = arith.constant 0 : index
    %c0_0 = arith.constant 0 : index
    %c0_1 = arith.constant 0 : index
    %c0_2 = arith.constant 0 : index
    %0 = vector.load %arg1[%c0, %c0_0, %c0_1, %c0_2] : memref<1x4x4x768xf32, #tpu.memory_space<vmem>>, vector<1x4x4x768xf32>
    %1 = vector.shape_cast %0 : vector<1x4x4x768xf32> to vector<16x768xf32>
    %2 = arith.truncf %1 : vector<16x768xf32> to vector<16x768xbf16>
    %c0_3 = arith.constant 0 : index
    %c0_4 = arith.constant 0 : index
    %3 = vector.load %arg2[%c0_3, %c0_4] : memref<768x8xbf16, #tpu.memory_space<vmem>>, vector<768x8xbf16>
    %cst = arith.constant dense<0.000000e+00> : vector<16x8xf32>
    %4 = tpu.matmul %2, %3, %cst {dimension_numbers = #tpu.dot_dimension_numbers<[1], [0], [0], [1], [0, 0, 1, 1], [], []>} : vector<16x768xbf16>, vector<768x8xbf16>, vector<16x8xf32> -> vector<16x8xf32>
    %c0_5 = arith.constant 0 : index
    %c0_6 = arith.constant 0 : index
    %5 = vector.load %arg3[%c0_5, %c0_6] : memref<1x8xf32, #tpu.memory_space<vmem>>, vector<1x8xf32>
    %6 = vector.broadcast %5 : vector<1x8xf32> to vector<16x8xf32>
    %7 = arith.addf %4, %6 : vector<16x8xf32>
    %8 = arith.truncf %7 : vector<16x8xf32> to vector<16x8xbf16>
    %c0_7 = arith.constant 0 : index
    %c0_8 = arith.constant 0 : index
    %9 = vector.load %arg4[%c0_7, %c0_8] : memref<8x8xbf16, #tpu.memory_space<vmem>>, vector<8x8xbf16>
    %cst_9 = arith.constant dense<0.000000e+00> : vector<16x8xf32>
    %10 = tpu.matmul %8, %9, %cst_9 {dimension_numbers = #tpu.dot_dimension_numbers<[1], [0], [0], [1], [0, 0, 1, 1], [], []>} : vector<16x8xbf16>, vector<8x8xbf16>, vector<16x8xf32> -> vector<16x8xf32>
    %c0_10 = arith.constant 0 : index
    %c0_11 = arith.constant 0 : index
    %11 = vector.load %arg5[%c0_10, %c0_11] : memref<1x8xf32, #tpu.memory_space<vmem>>, vector<1x8xf32>
    %12 = vector.broadcast %11 : vector<1x8xf32> to vector<16x8xf32>
    %13 = arith.addf %10, %12 : vector<16x8xf32>
    %cst_12 = arith.constant 0.000000e+00 : f32
    %14 = vector.broadcast %cst_12 : f32 to vector<16x8xf32>
    %15 = arith.maximumf %13, %14 : vector<16x8xf32>
    %cst_13 = arith.constant 0.000000e+00 : f32
    %16 = vector.broadcast %cst_13 : f32 to vector<16x8xf32>
    %c0_14 = arith.constant 0 : index
    %c0_15 = arith.constant 0 : index
    %c0_16 = arith.constant 0 : index
    %17 = vector.load %arg6[%c0_14, %c0_15, %c0_16] : memref<9x16x16xf32, #tpu.memory_space<vmem>>, vector<1x16x16xf32>
    %18 = vector.shape_cast %17 : vector<1x16x16xf32> to vector<16x16xf32>
    %cst_17 = arith.constant dense<0.000000e+00> : vector<16x8xf32>
    %19 = tpu.matmul %18, %15, %cst_17 {dimension_numbers = #tpu.dot_dimension_numbers<[1], [0], [0], [1], [0, 0, 1, 1], [], []>} : vector<16x16xf32>, vector<16x8xf32>, vector<16x8xf32> -> vector<16x8xf32>
    %c0_18 = arith.constant 0 : index
    %c0_19 = arith.constant 0 : index
    %20 = vector.load %arg7[%c0_18, %c0_19] : memref<9x8xf32, #tpu.memory_space<vmem>>, vector<1x8xf32>
    %21 = vector.shape_cast %20 : vector<1x8xf32> to vector<8xf32>
    %22 = vector.shape_cast %21 : vector<8xf32> to vector<1x8xf32>
    %23 = vector.broadcast %22 : vector<1x8xf32> to vector<16x8xf32>
    %24 = arith.mulf %19, %23 : vector<16x8xf32>
    %25 = arith.addf %16, %24 : vector<16x8xf32>
    %c1 = arith.constant 1 : index
    %c0_20 = arith.constant 0 : index
    %c0_21 = arith.constant 0 : index
    %26 = vector.load %arg6[%c1, %c0_20, %c0_21] : memref<9x16x16xf32, #tpu.memory_space<vmem>>, vector<1x16x16xf32>
    %27 = vector.shape_cast %26 : vector<1x16x16xf32> to vector<16x16xf32>
    %cst_22 = arith.constant dense<0.000000e+00> : vector<16x8xf32>
    %28 = tpu.matmul %27, %15, %cst_22 {dimension_numbers = #tpu.dot_dimension_numbers<[1], [0], [0], [1], [0, 0, 1, 1], [], []>} : vector<16x16xf32>, vector<16x8xf32>, vector<16x8xf32> -> vector<16x8xf32>
    %c1_23 = arith.constant 1 : index
    %c0_24 = arith.constant 0 : index
    %29 = vector.load %arg7[%c1_23, %c0_24] : memref<9x8xf32, #tpu.memory_space<vmem>>, vector<1x8xf32>
    %30 = vector.shape_cast %29 : vector<1x8xf32> to vector<8xf32>
    %31 = vector.shape_cast %30 : vector<8xf32> to vector<1x8xf32>
    %32 = vector.broadcast %31 : vector<1x8xf32> to vector<16x8xf32>
    %33 = arith.mulf %28, %32 : vector<16x8xf32>
    %34 = arith.addf %25, %33 : vector<16x8xf32>
    %c2 = arith.constant 2 : index
    %c0_25 = arith.constant 0 : index
    %c0_26 = arith.constant 0 : index
    %35 = vector.load %arg6[%c2, %c0_25, %c0_26] : memref<9x16x16xf32, #tpu.memory_space<vmem>>, vector<1x16x16xf32>
    %36 = vector.shape_cast %35 : vector<1x16x16xf32> to vector<16x16xf32>
    %cst_27 = arith.constant dense<0.000000e+00> : vector<16x8xf32>
    %37 = tpu.matmul %36, %15, %cst_27 {dimension_numbers = #tpu.dot_dimension_numbers<[1], [0], [0], [1], [0, 0, 1, 1], [], []>} : vector<16x16xf32>, vector<16x8xf32>, vector<16x8xf32> -> vector<16x8xf32>
    %c2_28 = arith.constant 2 : index
    %c0_29 = arith.constant 0 : index
    %38 = vector.load %arg7[%c2_28, %c0_29] : memref<9x8xf32, #tpu.memory_space<vmem>>, vector<1x8xf32>
    %39 = vector.shape_cast %38 : vector<1x8xf32> to vector<8xf32>
    %40 = vector.shape_cast %39 : vector<8xf32> to vector<1x8xf32>
    %41 = vector.broadcast %40 : vector<1x8xf32> to vector<16x8xf32>
    %42 = arith.mulf %37, %41 : vector<16x8xf32>
    %43 = arith.addf %34, %42 : vector<16x8xf32>
    %c3 = arith.constant 3 : index
    %c0_30 = arith.constant 0 : index
    %c0_31 = arith.constant 0 : index
    %44 = vector.load %arg6[%c3, %c0_30, %c0_31] : memref<9x16x16xf32, #tpu.memory_space<vmem>>, vector<1x16x16xf32>
    %45 = vector.shape_cast %44 : vector<1x16x16xf32> to vector<16x16xf32>
    %cst_32 = arith.constant dense<0.000000e+00> : vector<16x8xf32>
    %46 = tpu.matmul %45, %15, %cst_32 {dimension_numbers = #tpu.dot_dimension_numbers<[1], [0], [0], [1], [0, 0, 1, 1], [], []>} : vector<16x16xf32>, vector<16x8xf32>, vector<16x8xf32> -> vector<16x8xf32>
    %c3_33 = arith.constant 3 : index
    %c0_34 = arith.constant 0 : index
    %47 = vector.load %arg7[%c3_33, %c0_34] : memref<9x8xf32, #tpu.memory_space<vmem>>, vector<1x8xf32>
    %48 = vector.shape_cast %47 : vector<1x8xf32> to vector<8xf32>
    %49 = vector.shape_cast %48 : vector<8xf32> to vector<1x8xf32>
    %50 = vector.broadcast %49 : vector<1x8xf32> to vector<16x8xf32>
    %51 = arith.mulf %46, %50 : vector<16x8xf32>
    %52 = arith.addf %43, %51 : vector<16x8xf32>
    %c4 = arith.constant 4 : index
    %c0_35 = arith.constant 0 : index
    %c0_36 = arith.constant 0 : index
    %53 = vector.load %arg6[%c4, %c0_35, %c0_36] : memref<9x16x16xf32, #tpu.memory_space<vmem>>, vector<1x16x16xf32>
    %54 = vector.shape_cast %53 : vector<1x16x16xf32> to vector<16x16xf32>
    %cst_37 = arith.constant dense<0.000000e+00> : vector<16x8xf32>
    %55 = tpu.matmul %54, %15, %cst_37 {dimension_numbers = #tpu.dot_dimension_numbers<[1], [0], [0], [1], [0, 0, 1, 1], [], []>} : vector<16x16xf32>, vector<16x8xf32>, vector<16x8xf32> -> vector<16x8xf32>
    %c4_38 = arith.constant 4 : index
    %c0_39 = arith.constant 0 : index
    %56 = vector.load %arg7[%c4_38, %c0_39] : memref<9x8xf32, #tpu.memory_space<vmem>>, vector<1x8xf32>
    %57 = vector.shape_cast %56 : vector<1x8xf32> to vector<8xf32>
    %58 = vector.shape_cast %57 : vector<8xf32> to vector<1x8xf32>
    %59 = vector.broadcast %58 : vector<1x8xf32> to vector<16x8xf32>
    %60 = arith.mulf %55, %59 : vector<16x8xf32>
    %61 = arith.addf %52, %60 : vector<16x8xf32>
    %c5 = arith.constant 5 : index
    %c0_40 = arith.constant 0 : index
    %c0_41 = arith.constant 0 : index
    %62 = vector.load %arg6[%c5, %c0_40, %c0_41] : memref<9x16x16xf32, #tpu.memory_space<vmem>>, vector<1x16x16xf32>
    %63 = vector.shape_cast %62 : vector<1x16x16xf32> to vector<16x16xf32>
    %cst_42 = arith.constant dense<0.000000e+00> : vector<16x8xf32>
    %64 = tpu.matmul %63, %15, %cst_42 {dimension_numbers = #tpu.dot_dimension_numbers<[1], [0], [0], [1], [0, 0, 1, 1], [], []>} : vector<16x16xf32>, vector<16x8xf32>, vector<16x8xf32> -> vector<16x8xf32>
    %c5_43 = arith.constant 5 : index
    %c0_44 = arith.constant 0 : index
    %65 = vector.load %arg7[%c5_43, %c0_44] : memref<9x8xf32, #tpu.memory_space<vmem>>, vector<1x8xf32>
    %66 = vector.shape_cast %65 : vector<1x8xf32> to vector<8xf32>
    %67 = vector.shape_cast %66 : vector<8xf32> to vector<1x8xf32>
    %68 = vector.broadcast %67 : vector<1x8xf32> to vector<16x8xf32>
    %69 = arith.mulf %64, %68 : vector<16x8xf32>
    %70 = arith.addf %61, %69 : vector<16x8xf32>
    %c6 = arith.constant 6 : index
    %c0_45 = arith.constant 0 : index
    %c0_46 = arith.constant 0 : index
    %71 = vector.load %arg6[%c6, %c0_45, %c0_46] : memref<9x16x16xf32, #tpu.memory_space<vmem>>, vector<1x16x16xf32>
    %72 = vector.shape_cast %71 : vector<1x16x16xf32> to vector<16x16xf32>
    %cst_47 = arith.constant dense<0.000000e+00> : vector<16x8xf32>
    %73 = tpu.matmul %72, %15, %cst_47 {dimension_numbers = #tpu.dot_dimension_numbers<[1], [0], [0], [1], [0, 0, 1, 1], [], []>} : vector<16x16xf32>, vector<16x8xf32>, vector<16x8xf32> -> vector<16x8xf32>
    %c6_48 = arith.constant 6 : index
    %c0_49 = arith.constant 0 : index
    %74 = vector.load %arg7[%c6_48, %c0_49] : memref<9x8xf32, #tpu.memory_space<vmem>>, vector<1x8xf32>
    %75 = vector.shape_cast %74 : vector<1x8xf32> to vector<8xf32>
    %76 = vector.shape_cast %75 : vector<8xf32> to vector<1x8xf32>
    %77 = vector.broadcast %76 : vector<1x8xf32> to vector<16x8xf32>
    %78 = arith.mulf %73, %77 : vector<16x8xf32>
    %79 = arith.addf %70, %78 : vector<16x8xf32>
    %c7 = arith.constant 7 : index
    %c0_50 = arith.constant 0 : index
    %c0_51 = arith.constant 0 : index
    %80 = vector.load %arg6[%c7, %c0_50, %c0_51] : memref<9x16x16xf32, #tpu.memory_space<vmem>>, vector<1x16x16xf32>
    %81 = vector.shape_cast %80 : vector<1x16x16xf32> to vector<16x16xf32>
    %cst_52 = arith.constant dense<0.000000e+00> : vector<16x8xf32>
    %82 = tpu.matmul %81, %15, %cst_52 {dimension_numbers = #tpu.dot_dimension_numbers<[1], [0], [0], [1], [0, 0, 1, 1], [], []>} : vector<16x16xf32>, vector<16x8xf32>, vector<16x8xf32> -> vector<16x8xf32>
    %c7_53 = arith.constant 7 : index
    %c0_54 = arith.constant 0 : index
    %83 = vector.load %arg7[%c7_53, %c0_54] : memref<9x8xf32, #tpu.memory_space<vmem>>, vector<1x8xf32>
    %84 = vector.shape_cast %83 : vector<1x8xf32> to vector<8xf32>
    %85 = vector.shape_cast %84 : vector<8xf32> to vector<1x8xf32>
    %86 = vector.broadcast %85 : vector<1x8xf32> to vector<16x8xf32>
    %87 = arith.mulf %82, %86 : vector<16x8xf32>
    %88 = arith.addf %79, %87 : vector<16x8xf32>
    %c8 = arith.constant 8 : index
    %c0_55 = arith.constant 0 : index
    %c0_56 = arith.constant 0 : index
    %89 = vector.load %arg6[%c8, %c0_55, %c0_56] : memref<9x16x16xf32, #tpu.memory_space<vmem>>, vector<1x16x16xf32>
    %90 = vector.shape_cast %89 : vector<1x16x16xf32> to vector<16x16xf32>
    %cst_57 = arith.constant dense<0.000000e+00> : vector<16x8xf32>
    %91 = tpu.matmul %90, %15, %cst_57 {dimension_numbers = #tpu.dot_dimension_numbers<[1], [0], [0], [1], [0, 0, 1, 1], [], []>} : vector<16x16xf32>, vector<16x8xf32>, vector<16x8xf32> -> vector<16x8xf32>
    %c8_58 = arith.constant 8 : index
    %c0_59 = arith.constant 0 : index
    %92 = vector.load %arg7[%c8_58, %c0_59] : memref<9x8xf32, #tpu.memory_space<vmem>>, vector<1x8xf32>
    %93 = vector.shape_cast %92 : vector<1x8xf32> to vector<8xf32>
    %94 = vector.shape_cast %93 : vector<8xf32> to vector<1x8xf32>
    %95 = vector.broadcast %94 : vector<1x8xf32> to vector<16x8xf32>
    %96 = arith.mulf %91, %95 : vector<16x8xf32>
    %97 = arith.addf %88, %96 : vector<16x8xf32>
    %c0_60 = arith.constant 0 : index
    %c0_61 = arith.constant 0 : index
    %98 = vector.load %arg8[%c0_60, %c0_61] : memref<1x8xf32, #tpu.memory_space<vmem>>, vector<1x8xf32>
    %99 = vector.broadcast %98 : vector<1x8xf32> to vector<16x8xf32>
    %100 = arith.addf %97, %99 : vector<16x8xf32>
    %cst_62 = arith.constant 0.000000e+00 : f32
    %101 = vector.broadcast %cst_62 : f32 to vector<16x8xf32>
    %102 = arith.maximumf %100, %101 : vector<16x8xf32>
    %103 = arith.truncf %102 : vector<16x8xf32> to vector<16x8xbf16>
    %c0_63 = arith.constant 0 : index
    %c0_64 = arith.constant 0 : index
    %104 = vector.load %arg9[%c0_63, %c0_64] : memref<8x32xbf16, #tpu.memory_space<vmem>>, vector<8x32xbf16>
    %cst_65 = arith.constant dense<0.000000e+00> : vector<16x32xf32>
    %105 = tpu.matmul %103, %104, %cst_65 {dimension_numbers = #tpu.dot_dimension_numbers<[1], [0], [0], [1], [0, 0, 1, 1], [], []>} : vector<16x8xbf16>, vector<8x32xbf16>, vector<16x32xf32> -> vector<16x32xf32>
    %c0_66 = arith.constant 0 : index
    %c0_67 = arith.constant 0 : index
    %106 = vector.load %arg10[%c0_66, %c0_67] : memref<1x32xf32, #tpu.memory_space<vmem>>, vector<1x32xf32>
    %107 = vector.broadcast %106 : vector<1x32xf32> to vector<16x32xf32>
    %108 = arith.addf %105, %107 : vector<16x32xf32>
    %109 = arith.truncf %7 : vector<16x8xf32> to vector<16x8xbf16>
    %c0_68 = arith.constant 0 : index
    %c0_69 = arith.constant 0 : index
    %110 = vector.load %arg11[%c0_68, %c0_69] : memref<8x32xbf16, #tpu.memory_space<vmem>>, vector<8x32xbf16>
    %cst_70 = arith.constant dense<0.000000e+00> : vector<16x32xf32>
    %111 = tpu.matmul %109, %110, %cst_70 {dimension_numbers = #tpu.dot_dimension_numbers<[1], [0], [0], [1], [0, 0, 1, 1], [], []>} : vector<16x8xbf16>, vector<8x32xbf16>, vector<16x32xf32> -> vector<16x32xf32>
    %c0_71 = arith.constant 0 : index
    %c0_72 = arith.constant 0 : index
    %112 = vector.load %arg12[%c0_71, %c0_72] : memref<1x32xf32, #tpu.memory_space<vmem>>, vector<1x32xf32>
    %113 = vector.broadcast %112 : vector<1x32xf32> to vector<16x32xf32>
    %114 = arith.addf %111, %113 : vector<16x32xf32>
    %115 = arith.addf %114, %108 : vector<16x32xf32>
    %cst_73 = arith.constant 0.000000e+00 : f32
    %116 = vector.broadcast %cst_73 : f32 to vector<16x32xf32>
    %117 = arith.maximumf %115, %116 : vector<16x32xf32>
    %118 = vector.shape_cast %117 : vector<16x32xf32> to vector<1x4x4x32xf32>
    %c0_74 = arith.constant 0 : index
    %c0_75 = arith.constant 0 : index
    %c0_76 = arith.constant 0 : index
    %c0_77 = arith.constant 0 : index
    %119 = vector.load %arg13[%c0_74, %c0_75, %c0_76, %c0_77] : memref<1x4x4x32xf32, #tpu.memory_space<vmem>>, vector<1x4x4x32xf32>
    tpu.vector_store %arg13[%c0_74, %c0_75, %c0_76, %c0_77], %118 {strides = array<i32>} : memref<1x4x4x32xf32, #tpu.memory_space<vmem>>, vector<1x4x4x32xf32>,
    return
  }
  func.func @transform_0(%arg0: i32) -> (i32, i32, i32, i32) {
    %c0_i32 = arith.constant 0 : i32
    %c0_i32_0 = arith.constant 0 : i32
    %c0_i32_1 = arith.constant 0 : i32
    %c0_i32_2 = arith.constant 0 : i32
    return %arg0, %c0_i32, %c0_i32_0, %c0_i32_1 : i32, i32, i32, i32
  }
  func.func @transform_1(%arg0: i32) -> (i32, i32) {
    %c0_i32 = arith.constant 0 : i32
    %c0_i32_0 = arith.constant 0 : i32
    %c0_i32_1 = arith.constant 0 : i32
    return %c0_i32, %c0_i32_0 : i32, i32
  }
  func.func @transform_2(%arg0: i32) -> (i32, i32) {
    %c0_i32 = arith.constant 0 : i32
    %c0_i32_0 = arith.constant 0 : i32
    %c0_i32_1 = arith.constant 0 : i32
    return %c0_i32, %c0_i32_0 : i32, i32
  }
  func.func @transform_3(%arg0: i32) -> (i32, i32) {
    %c0_i32 = arith.constant 0 : i32
    %c0_i32_0 = arith.constant 0 : i32
    %c0_i32_1 = arith.constant 0 : i32
    return %c0_i32, %c0_i32_0 : i32, i32
  }
  func.func @transform_4(%arg0: i32) -> (i32, i32) {
    %c0_i32 = arith.constant 0 : i32
    %c0_i32_0 = arith.constant 0 : i32
    %c0_i32_1 = arith.constant 0 : i32
    return %c0_i32, %c0_i32_0 : i32, i32
  }
  func.func @transform_5(%arg0: i32) -> (i32, i32, i32) {
    %c0_i32 = arith.constant 0 : i32
    %c0_i32_0 = arith.constant 0 : i32
    %c0_i32_1 = arith.constant 0 : i32
    %c0_i32_2 = arith.constant 0 : i32
    return %c0_i32, %c0_i32_0, %c0_i32_1 : i32, i32, i32
  }
  func.func @transform_6(%arg0: i32) -> (i32, i32) {
    %c0_i32 = arith.constant 0 : i32
    %c0_i32_0 = arith.constant 0 : i32
    %c0_i32_1 = arith.constant 0 : i32
    return %c0_i32, %c0_i32_0 : i32, i32
  }
  func.func @transform_7(%arg0: i32) -> (i32, i32) {
    %c0_i32 = arith.constant 0 : i32
    %c0_i32_0 = arith.constant 0 : i32
    %c0_i32_1 = arith.constant 0 : i32
    return %c0_i32, %c0_i32_0 : i32, i32
  }
  func.func @transform_8(%arg0: i32) -> (i32, i32) {
    %c0_i32 = arith.constant 0 : i32
    %c0_i32_0 = arith.constant 0 : i32
    %c0_i32_1 = arith.constant 0 : i32
    return %c0_i32, %c0_i32_0 : i32, i32
  }
  func.func @transform_9(%arg0: i32) -> (i32, i32) {
    %c0_i32 = arith.constant 0 : i32
    %c0_i32_0 = arith.constant 0 : i32
    %c0_i32_1 = arith.constant 0 : i32
    return %c0_i32, %c0_i32_0 : i32, i32
  }
  func.func @transform_10(%arg0: i32) -> (i32, i32) {
    %c0_i32 = arith.constant 0 : i32
    %c0_i32_0 = arith.constant 0 : i32
    %c0_i32_1 = arith.constant 0 : i32
    return %c0_i32, %c0_i32_0 : i32, i32
  }
  func.func @transform_11(%arg0: i32) -> (i32, i32) {
    %c0_i32 = arith.constant 0 : i32
    %c0_i32_0 = arith.constant 0 : i32
    %c0_i32_1 = arith.constant 0 : i32
    return %c0_i32, %c0_i32_0 : i32, i32
  }
  func.func @transform_12(%arg0: i32) -> (i32, i32, i32, i32) {
    %c0_i32 = arith.constant 0 : i32
    %c0_i32_0 = arith.constant 0 : i32
    %c0_i32_1 = arith.constant 0 : i32
    %c0_i32_2 = arith.constant 0 : i32
    return %arg0, %c0_i32, %c0_i32_0, %c0_i32_1 : i32, i32, i32, i32
  }
}

module attributes {stable_mosaic.version = 11 : i64} {
  func.func @_fused_block_kernel(%arg0: i32, %arg1: memref<1x4x4x32xf32, #tpu.memory_space<vmem>>, %arg2: memref<32x8xbf16, #tpu.memory_space<vmem>>, %arg3: memref<1x8xf32, #tpu.memory_space<vmem>>, %arg4: memref<9x16x16xf32, #tpu.memory_space<vmem>>, %arg5: memref<9x8xf32, #tpu.memory_space<vmem>>, %arg6: memref<1x8xf32, #tpu.memory_space<vmem>>, %arg7: memref<8x32xbf16, #tpu.memory_space<vmem>>, %arg8: memref<1x32xf32, #tpu.memory_space<vmem>>, %arg9: memref<1x4x4x32xf32, #tpu.memory_space<vmem>>) attributes {dimension_semantics = [#tpu.dimension_semantics<parallel>], iteration_bounds = array<i64: 2>, scalar_prefetch = 0 : i64, scratch_operands = 0 : i64, tpu.core_type = #tpu.core_type<tc>, window_params = [{transform_indices = @transform_0, window_bounds = array<i64: 1, 4, 4, 32>}, {pipeline_mode = #tpu.pipeline_mode<synchronous>, transform_indices = @transform_1, window_bounds = array<i64: 32, 8>}, {pipeline_mode = #tpu.pipeline_mode<synchronous>, transform_indices = @transform_2, window_bounds = array<i64: 1, 8>}, {pipeline_mode = #tpu.pipeline_mode<synchronous>, transform_indices = @transform_3, window_bounds = array<i64: 9, 16, 16>}, {pipeline_mode = #tpu.pipeline_mode<synchronous>, transform_indices = @transform_4, window_bounds = array<i64: 9, 8>}, {pipeline_mode = #tpu.pipeline_mode<synchronous>, transform_indices = @transform_5, window_bounds = array<i64: 1, 8>}, {pipeline_mode = #tpu.pipeline_mode<synchronous>, transform_indices = @transform_6, window_bounds = array<i64: 8, 32>}, {pipeline_mode = #tpu.pipeline_mode<synchronous>, transform_indices = @transform_7, window_bounds = array<i64: 1, 32>}, {transform_indices = @transform_8, window_bounds = array<i64: 1, 4, 4, 32>}]} {
    %c0 = arith.constant 0 : index
    %c0_0 = arith.constant 0 : index
    %c0_1 = arith.constant 0 : index
    %c0_2 = arith.constant 0 : index
    %0 = vector.load %arg1[%c0, %c0_0, %c0_1, %c0_2] : memref<1x4x4x32xf32, #tpu.memory_space<vmem>>, vector<1x4x4x32xf32>
    %1 = vector.shape_cast %0 : vector<1x4x4x32xf32> to vector<16x32xf32>
    %2 = arith.truncf %1 : vector<16x32xf32> to vector<16x32xbf16>
    %c0_3 = arith.constant 0 : index
    %c0_4 = arith.constant 0 : index
    %3 = vector.load %arg2[%c0_3, %c0_4] : memref<32x8xbf16, #tpu.memory_space<vmem>>, vector<32x8xbf16>
    %cst = arith.constant dense<0.000000e+00> : vector<16x8xf32>
    %4 = tpu.matmul %2, %3, %cst {dimension_numbers = #tpu.dot_dimension_numbers<[1], [0], [0], [1], [0, 0, 1, 1], [], []>} : vector<16x32xbf16>, vector<32x8xbf16>, vector<16x8xf32> -> vector<16x8xf32>
    %c0_5 = arith.constant 0 : index
    %c0_6 = arith.constant 0 : index
    %5 = vector.load %arg3[%c0_5, %c0_6] : memref<1x8xf32, #tpu.memory_space<vmem>>, vector<1x8xf32>
    %6 = vector.broadcast %5 : vector<1x8xf32> to vector<16x8xf32>
    %7 = arith.addf %4, %6 : vector<16x8xf32>
    %cst_7 = arith.constant 0.000000e+00 : f32
    %8 = vector.broadcast %cst_7 : f32 to vector<16x8xf32>
    %9 = arith.maximumf %7, %8 : vector<16x8xf32>
    %cst_8 = arith.constant 0.000000e+00 : f32
    %10 = vector.broadcast %cst_8 : f32 to vector<16x8xf32>
    %c0_9 = arith.constant 0 : index
    %c0_10 = arith.constant 0 : index
    %c0_11 = arith.constant 0 : index
    %11 = vector.load %arg4[%c0_9, %c0_10, %c0_11] : memref<9x16x16xf32, #tpu.memory_space<vmem>>, vector<1x16x16xf32>
    %12 = vector.shape_cast %11 : vector<1x16x16xf32> to vector<16x16xf32>
    %cst_12 = arith.constant dense<0.000000e+00> : vector<16x8xf32>
    %13 = tpu.matmul %12, %9, %cst_12 {dimension_numbers = #tpu.dot_dimension_numbers<[1], [0], [0], [1], [0, 0, 1, 1], [], []>} : vector<16x16xf32>, vector<16x8xf32>, vector<16x8xf32> -> vector<16x8xf32>
    %c0_13 = arith.constant 0 : index
    %c0_14 = arith.constant 0 : index
    %14 = vector.load %arg5[%c0_13, %c0_14] : memref<9x8xf32, #tpu.memory_space<vmem>>, vector<1x8xf32>
    %15 = vector.shape_cast %14 : vector<1x8xf32> to vector<8xf32>
    %16 = vector.shape_cast %15 : vector<8xf32> to vector<1x8xf32>
    %17 = vector.broadcast %16 : vector<1x8xf32> to vector<16x8xf32>
    %18 = arith.mulf %13, %17 : vector<16x8xf32>
    %19 = arith.addf %10, %18 : vector<16x8xf32>
    %c1 = arith.constant 1 : index
    %c0_15 = arith.constant 0 : index
    %c0_16 = arith.constant 0 : index
    %20 = vector.load %arg4[%c1, %c0_15, %c0_16] : memref<9x16x16xf32, #tpu.memory_space<vmem>>, vector<1x16x16xf32>
    %21 = vector.shape_cast %20 : vector<1x16x16xf32> to vector<16x16xf32>
    %cst_17 = arith.constant dense<0.000000e+00> : vector<16x8xf32>
    %22 = tpu.matmul %21, %9, %cst_17 {dimension_numbers = #tpu.dot_dimension_numbers<[1], [0], [0], [1], [0, 0, 1, 1], [], []>} : vector<16x16xf32>, vector<16x8xf32>, vector<16x8xf32> -> vector<16x8xf32>
    %c1_18 = arith.constant 1 : index
    %c0_19 = arith.constant 0 : index
    %23 = vector.load %arg5[%c1_18, %c0_19] : memref<9x8xf32, #tpu.memory_space<vmem>>, vector<1x8xf32>
    %24 = vector.shape_cast %23 : vector<1x8xf32> to vector<8xf32>
    %25 = vector.shape_cast %24 : vector<8xf32> to vector<1x8xf32>
    %26 = vector.broadcast %25 : vector<1x8xf32> to vector<16x8xf32>
    %27 = arith.mulf %22, %26 : vector<16x8xf32>
    %28 = arith.addf %19, %27 : vector<16x8xf32>
    %c2 = arith.constant 2 : index
    %c0_20 = arith.constant 0 : index
    %c0_21 = arith.constant 0 : index
    %29 = vector.load %arg4[%c2, %c0_20, %c0_21] : memref<9x16x16xf32, #tpu.memory_space<vmem>>, vector<1x16x16xf32>
    %30 = vector.shape_cast %29 : vector<1x16x16xf32> to vector<16x16xf32>
    %cst_22 = arith.constant dense<0.000000e+00> : vector<16x8xf32>
    %31 = tpu.matmul %30, %9, %cst_22 {dimension_numbers = #tpu.dot_dimension_numbers<[1], [0], [0], [1], [0, 0, 1, 1], [], []>} : vector<16x16xf32>, vector<16x8xf32>, vector<16x8xf32> -> vector<16x8xf32>
    %c2_23 = arith.constant 2 : index
    %c0_24 = arith.constant 0 : index
    %32 = vector.load %arg5[%c2_23, %c0_24] : memref<9x8xf32, #tpu.memory_space<vmem>>, vector<1x8xf32>
    %33 = vector.shape_cast %32 : vector<1x8xf32> to vector<8xf32>
    %34 = vector.shape_cast %33 : vector<8xf32> to vector<1x8xf32>
    %35 = vector.broadcast %34 : vector<1x8xf32> to vector<16x8xf32>
    %36 = arith.mulf %31, %35 : vector<16x8xf32>
    %37 = arith.addf %28, %36 : vector<16x8xf32>
    %c3 = arith.constant 3 : index
    %c0_25 = arith.constant 0 : index
    %c0_26 = arith.constant 0 : index
    %38 = vector.load %arg4[%c3, %c0_25, %c0_26] : memref<9x16x16xf32, #tpu.memory_space<vmem>>, vector<1x16x16xf32>
    %39 = vector.shape_cast %38 : vector<1x16x16xf32> to vector<16x16xf32>
    %cst_27 = arith.constant dense<0.000000e+00> : vector<16x8xf32>
    %40 = tpu.matmul %39, %9, %cst_27 {dimension_numbers = #tpu.dot_dimension_numbers<[1], [0], [0], [1], [0, 0, 1, 1], [], []>} : vector<16x16xf32>, vector<16x8xf32>, vector<16x8xf32> -> vector<16x8xf32>
    %c3_28 = arith.constant 3 : index
    %c0_29 = arith.constant 0 : index
    %41 = vector.load %arg5[%c3_28, %c0_29] : memref<9x8xf32, #tpu.memory_space<vmem>>, vector<1x8xf32>
    %42 = vector.shape_cast %41 : vector<1x8xf32> to vector<8xf32>
    %43 = vector.shape_cast %42 : vector<8xf32> to vector<1x8xf32>
    %44 = vector.broadcast %43 : vector<1x8xf32> to vector<16x8xf32>
    %45 = arith.mulf %40, %44 : vector<16x8xf32>
    %46 = arith.addf %37, %45 : vector<16x8xf32>
    %c4 = arith.constant 4 : index
    %c0_30 = arith.constant 0 : index
    %c0_31 = arith.constant 0 : index
    %47 = vector.load %arg4[%c4, %c0_30, %c0_31] : memref<9x16x16xf32, #tpu.memory_space<vmem>>, vector<1x16x16xf32>
    %48 = vector.shape_cast %47 : vector<1x16x16xf32> to vector<16x16xf32>
    %cst_32 = arith.constant dense<0.000000e+00> : vector<16x8xf32>
    %49 = tpu.matmul %48, %9, %cst_32 {dimension_numbers = #tpu.dot_dimension_numbers<[1], [0], [0], [1], [0, 0, 1, 1], [], []>} : vector<16x16xf32>, vector<16x8xf32>, vector<16x8xf32> -> vector<16x8xf32>
    %c4_33 = arith.constant 4 : index
    %c0_34 = arith.constant 0 : index
    %50 = vector.load %arg5[%c4_33, %c0_34] : memref<9x8xf32, #tpu.memory_space<vmem>>, vector<1x8xf32>
    %51 = vector.shape_cast %50 : vector<1x8xf32> to vector<8xf32>
    %52 = vector.shape_cast %51 : vector<8xf32> to vector<1x8xf32>
    %53 = vector.broadcast %52 : vector<1x8xf32> to vector<16x8xf32>
    %54 = arith.mulf %49, %53 : vector<16x8xf32>
    %55 = arith.addf %46, %54 : vector<16x8xf32>
    %c5 = arith.constant 5 : index
    %c0_35 = arith.constant 0 : index
    %c0_36 = arith.constant 0 : index
    %56 = vector.load %arg4[%c5, %c0_35, %c0_36] : memref<9x16x16xf32, #tpu.memory_space<vmem>>, vector<1x16x16xf32>
    %57 = vector.shape_cast %56 : vector<1x16x16xf32> to vector<16x16xf32>
    %cst_37 = arith.constant dense<0.000000e+00> : vector<16x8xf32>
    %58 = tpu.matmul %57, %9, %cst_37 {dimension_numbers = #tpu.dot_dimension_numbers<[1], [0], [0], [1], [0, 0, 1, 1], [], []>} : vector<16x16xf32>, vector<16x8xf32>, vector<16x8xf32> -> vector<16x8xf32>
    %c5_38 = arith.constant 5 : index
    %c0_39 = arith.constant 0 : index
    %59 = vector.load %arg5[%c5_38, %c0_39] : memref<9x8xf32, #tpu.memory_space<vmem>>, vector<1x8xf32>
    %60 = vector.shape_cast %59 : vector<1x8xf32> to vector<8xf32>
    %61 = vector.shape_cast %60 : vector<8xf32> to vector<1x8xf32>
    %62 = vector.broadcast %61 : vector<1x8xf32> to vector<16x8xf32>
    %63 = arith.mulf %58, %62 : vector<16x8xf32>
    %64 = arith.addf %55, %63 : vector<16x8xf32>
    %c6 = arith.constant 6 : index
    %c0_40 = arith.constant 0 : index
    %c0_41 = arith.constant 0 : index
    %65 = vector.load %arg4[%c6, %c0_40, %c0_41] : memref<9x16x16xf32, #tpu.memory_space<vmem>>, vector<1x16x16xf32>
    %66 = vector.shape_cast %65 : vector<1x16x16xf32> to vector<16x16xf32>
    %cst_42 = arith.constant dense<0.000000e+00> : vector<16x8xf32>
    %67 = tpu.matmul %66, %9, %cst_42 {dimension_numbers = #tpu.dot_dimension_numbers<[1], [0], [0], [1], [0, 0, 1, 1], [], []>} : vector<16x16xf32>, vector<16x8xf32>, vector<16x8xf32> -> vector<16x8xf32>
    %c6_43 = arith.constant 6 : index
    %c0_44 = arith.constant 0 : index
    %68 = vector.load %arg5[%c6_43, %c0_44] : memref<9x8xf32, #tpu.memory_space<vmem>>, vector<1x8xf32>
    %69 = vector.shape_cast %68 : vector<1x8xf32> to vector<8xf32>
    %70 = vector.shape_cast %69 : vector<8xf32> to vector<1x8xf32>
    %71 = vector.broadcast %70 : vector<1x8xf32> to vector<16x8xf32>
    %72 = arith.mulf %67, %71 : vector<16x8xf32>
    %73 = arith.addf %64, %72 : vector<16x8xf32>
    %c7 = arith.constant 7 : index
    %c0_45 = arith.constant 0 : index
    %c0_46 = arith.constant 0 : index
    %74 = vector.load %arg4[%c7, %c0_45, %c0_46] : memref<9x16x16xf32, #tpu.memory_space<vmem>>, vector<1x16x16xf32>
    %75 = vector.shape_cast %74 : vector<1x16x16xf32> to vector<16x16xf32>
    %cst_47 = arith.constant dense<0.000000e+00> : vector<16x8xf32>
    %76 = tpu.matmul %75, %9, %cst_47 {dimension_numbers = #tpu.dot_dimension_numbers<[1], [0], [0], [1], [0, 0, 1, 1], [], []>} : vector<16x16xf32>, vector<16x8xf32>, vector<16x8xf32> -> vector<16x8xf32>
    %c7_48 = arith.constant 7 : index
    %c0_49 = arith.constant 0 : index
    %77 = vector.load %arg5[%c7_48, %c0_49] : memref<9x8xf32, #tpu.memory_space<vmem>>, vector<1x8xf32>
    %78 = vector.shape_cast %77 : vector<1x8xf32> to vector<8xf32>
    %79 = vector.shape_cast %78 : vector<8xf32> to vector<1x8xf32>
    %80 = vector.broadcast %79 : vector<1x8xf32> to vector<16x8xf32>
    %81 = arith.mulf %76, %80 : vector<16x8xf32>
    %82 = arith.addf %73, %81 : vector<16x8xf32>
    %c8 = arith.constant 8 : index
    %c0_50 = arith.constant 0 : index
    %c0_51 = arith.constant 0 : index
    %83 = vector.load %arg4[%c8, %c0_50, %c0_51] : memref<9x16x16xf32, #tpu.memory_space<vmem>>, vector<1x16x16xf32>
    %84 = vector.shape_cast %83 : vector<1x16x16xf32> to vector<16x16xf32>
    %cst_52 = arith.constant dense<0.000000e+00> : vector<16x8xf32>
    %85 = tpu.matmul %84, %9, %cst_52 {dimension_numbers = #tpu.dot_dimension_numbers<[1], [0], [0], [1], [0, 0, 1, 1], [], []>} : vector<16x16xf32>, vector<16x8xf32>, vector<16x8xf32> -> vector<16x8xf32>
    %c8_53 = arith.constant 8 : index
    %c0_54 = arith.constant 0 : index
    %86 = vector.load %arg5[%c8_53, %c0_54] : memref<9x8xf32, #tpu.memory_space<vmem>>, vector<1x8xf32>
    %87 = vector.shape_cast %86 : vector<1x8xf32> to vector<8xf32>
    %88 = vector.shape_cast %87 : vector<8xf32> to vector<1x8xf32>
    %89 = vector.broadcast %88 : vector<1x8xf32> to vector<16x8xf32>
    %90 = arith.mulf %85, %89 : vector<16x8xf32>
    %91 = arith.addf %82, %90 : vector<16x8xf32>
    %c0_55 = arith.constant 0 : index
    %c0_56 = arith.constant 0 : index
    %92 = vector.load %arg6[%c0_55, %c0_56] : memref<1x8xf32, #tpu.memory_space<vmem>>, vector<1x8xf32>
    %93 = vector.broadcast %92 : vector<1x8xf32> to vector<16x8xf32>
    %94 = arith.addf %91, %93 : vector<16x8xf32>
    %cst_57 = arith.constant 0.000000e+00 : f32
    %95 = vector.broadcast %cst_57 : f32 to vector<16x8xf32>
    %96 = arith.maximumf %94, %95 : vector<16x8xf32>
    %97 = arith.truncf %96 : vector<16x8xf32> to vector<16x8xbf16>
    %c0_58 = arith.constant 0 : index
    %c0_59 = arith.constant 0 : index
    %98 = vector.load %arg7[%c0_58, %c0_59] : memref<8x32xbf16, #tpu.memory_space<vmem>>, vector<8x32xbf16>
    %cst_60 = arith.constant dense<0.000000e+00> : vector<16x32xf32>
    %99 = tpu.matmul %97, %98, %cst_60 {dimension_numbers = #tpu.dot_dimension_numbers<[1], [0], [0], [1], [0, 0, 1, 1], [], []>} : vector<16x8xbf16>, vector<8x32xbf16>, vector<16x32xf32> -> vector<16x32xf32>
    %c0_61 = arith.constant 0 : index
    %c0_62 = arith.constant 0 : index
    %100 = vector.load %arg8[%c0_61, %c0_62] : memref<1x32xf32, #tpu.memory_space<vmem>>, vector<1x32xf32>
    %101 = vector.broadcast %100 : vector<1x32xf32> to vector<16x32xf32>
    %102 = arith.addf %99, %101 : vector<16x32xf32>
    %103 = arith.addf %1, %102 : vector<16x32xf32>
    %cst_63 = arith.constant 0.000000e+00 : f32
    %104 = vector.broadcast %cst_63 : f32 to vector<16x32xf32>
    %105 = arith.maximumf %103, %104 : vector<16x32xf32>
    %106 = vector.shape_cast %105 : vector<16x32xf32> to vector<1x4x4x32xf32>
    %c0_64 = arith.constant 0 : index
    %c0_65 = arith.constant 0 : index
    %c0_66 = arith.constant 0 : index
    %c0_67 = arith.constant 0 : index
    %107 = vector.load %arg9[%c0_64, %c0_65, %c0_66, %c0_67] : memref<1x4x4x32xf32, #tpu.memory_space<vmem>>, vector<1x4x4x32xf32>
    tpu.vector_store %arg9[%c0_64, %c0_65, %c0_66, %c0_67], %106 {strides = array<i32>} : memref<1x4x4x32xf32, #tpu.memory_space<vmem>>, vector<1x4x4x32xf32>,
    return
  }
  func.func @transform_0(%arg0: i32) -> (i32, i32, i32, i32) {
    %c0_i32 = arith.constant 0 : i32
    %c0_i32_0 = arith.constant 0 : i32
    %c0_i32_1 = arith.constant 0 : i32
    %c0_i32_2 = arith.constant 0 : i32
    return %arg0, %c0_i32, %c0_i32_0, %c0_i32_1 : i32, i32, i32, i32
  }
  func.func @transform_1(%arg0: i32) -> (i32, i32) {
    %c0_i32 = arith.constant 0 : i32
    %c0_i32_0 = arith.constant 0 : i32
    %c0_i32_1 = arith.constant 0 : i32
    return %c0_i32, %c0_i32_0 : i32, i32
  }
  func.func @transform_2(%arg0: i32) -> (i32, i32) {
    %c0_i32 = arith.constant 0 : i32
    %c0_i32_0 = arith.constant 0 : i32
    %c0_i32_1 = arith.constant 0 : i32
    return %c0_i32, %c0_i32_0 : i32, i32
  }
  func.func @transform_3(%arg0: i32) -> (i32, i32, i32) {
    %c0_i32 = arith.constant 0 : i32
    %c0_i32_0 = arith.constant 0 : i32
    %c0_i32_1 = arith.constant 0 : i32
    %c0_i32_2 = arith.constant 0 : i32
    return %c0_i32, %c0_i32_0, %c0_i32_1 : i32, i32, i32
  }
  func.func @transform_4(%arg0: i32) -> (i32, i32) {
    %c0_i32 = arith.constant 0 : i32
    %c0_i32_0 = arith.constant 0 : i32
    %c0_i32_1 = arith.constant 0 : i32
    return %c0_i32, %c0_i32_0 : i32, i32
  }
  func.func @transform_5(%arg0: i32) -> (i32, i32) {
    %c0_i32 = arith.constant 0 : i32
    %c0_i32_0 = arith.constant 0 : i32
    %c0_i32_1 = arith.constant 0 : i32
    return %c0_i32, %c0_i32_0 : i32, i32
  }
  func.func @transform_6(%arg0: i32) -> (i32, i32) {
    %c0_i32 = arith.constant 0 : i32
    %c0_i32_0 = arith.constant 0 : i32
    %c0_i32_1 = arith.constant 0 : i32
    return %c0_i32, %c0_i32_0 : i32, i32
  }
  func.func @transform_7(%arg0: i32) -> (i32, i32) {
    %c0_i32 = arith.constant 0 : i32
    %c0_i32_0 = arith.constant 0 : i32
    %c0_i32_1 = arith.constant 0 : i32
    return %c0_i32, %c0_i32_0 : i32, i32
  }
  func.func @transform_8(%arg0: i32) -> (i32, i32, i32, i32) {
    %c0_i32 = arith.constant 0 : i32
    %c0_i32_0 = arith.constant 0 : i32
    %c0_i32_1 = arith.constant 0 : i32
    %c0_i32_2 = arith.constant 0 : i32
    return %arg0, %c0_i32, %c0_i32_0, %c0_i32_1 : i32, i32, i32, i32
  }
}

module attributes {stable_mosaic.version = 11 : i64} {
  func.func @_fused_block_kernel(%arg0: i32, %arg1: memref<1x4x4x32xf32, #tpu.memory_space<vmem>>, %arg2: memref<32x16xbf16, #tpu.memory_space<vmem>>, %arg3: memref<1x16xf32, #tpu.memory_space<vmem>>, %arg4: memref<9x16x16xf32, #tpu.memory_space<vmem>>, %arg5: memref<9x16xf32, #tpu.memory_space<vmem>>, %arg6: memref<1x16xf32, #tpu.memory_space<vmem>>, %arg7: memref<16x64xbf16, #tpu.memory_space<vmem>>, %arg8: memref<1x64xf32, #tpu.memory_space<vmem>>, %arg9: memref<32x64xbf16, #tpu.memory_space<vmem>>, %arg10: memref<1x64xf32, #tpu.memory_space<vmem>>, %arg11: memref<1x4x4x64xf32, #tpu.memory_space<vmem>>) attributes {dimension_semantics = [#tpu.dimension_semantics<parallel>], iteration_bounds = array<i64: 2>, scalar_prefetch = 0 : i64, scratch_operands = 0 : i64, tpu.core_type = #tpu.core_type<tc>, window_params = [{transform_indices = @transform_0, window_bounds = array<i64: 1, 4, 4, 32>}, {pipeline_mode = #tpu.pipeline_mode<synchronous>, transform_indices = @transform_1, window_bounds = array<i64: 32, 16>}, {pipeline_mode = #tpu.pipeline_mode<synchronous>, transform_indices = @transform_2, window_bounds = array<i64: 1, 16>}, {pipeline_mode = #tpu.pipeline_mode<synchronous>, transform_indices = @transform_3, window_bounds = array<i64: 9, 16, 16>}, {pipeline_mode = #tpu.pipeline_mode<synchronous>, transform_indices = @transform_4, window_bounds = array<i64: 9, 16>}, {pipeline_mode = #tpu.pipeline_mode<synchronous>, transform_indices = @transform_5, window_bounds = array<i64: 1, 16>}, {pipeline_mode = #tpu.pipeline_mode<synchronous>, transform_indices = @transform_6, window_bounds = array<i64: 16, 64>}, {pipeline_mode = #tpu.pipeline_mode<synchronous>, transform_indices = @transform_7, window_bounds = array<i64: 1, 64>}, {pipeline_mode = #tpu.pipeline_mode<synchronous>, transform_indices = @transform_8, window_bounds = array<i64: 32, 64>}, {pipeline_mode = #tpu.pipeline_mode<synchronous>, transform_indices = @transform_9, window_bounds = array<i64: 1, 64>}, {transform_indices = @transform_10, window_bounds = array<i64: 1, 4, 4, 64>}]} {
    %c0 = arith.constant 0 : index
    %c0_0 = arith.constant 0 : index
    %c0_1 = arith.constant 0 : index
    %c0_2 = arith.constant 0 : index
    %0 = vector.load %arg1[%c0, %c0_0, %c0_1, %c0_2] : memref<1x4x4x32xf32, #tpu.memory_space<vmem>>, vector<1x4x4x32xf32>
    %1 = vector.shape_cast %0 : vector<1x4x4x32xf32> to vector<16x32xf32>
    %2 = arith.truncf %1 : vector<16x32xf32> to vector<16x32xbf16>
    %c0_3 = arith.constant 0 : index
    %c0_4 = arith.constant 0 : index
    %3 = vector.load %arg2[%c0_3, %c0_4] : memref<32x16xbf16, #tpu.memory_space<vmem>>, vector<32x16xbf16>
    %cst = arith.constant dense<0.000000e+00> : vector<16x16xf32>
    %4 = tpu.matmul %2, %3, %cst {dimension_numbers = #tpu.dot_dimension_numbers<[1], [0], [0], [1], [0, 0, 1, 1], [], []>} : vector<16x32xbf16>, vector<32x16xbf16>, vector<16x16xf32> -> vector<16x16xf32>
    %c0_5 = arith.constant 0 : index
    %c0_6 = arith.constant 0 : index
    %5 = vector.load %arg3[%c0_5, %c0_6] : memref<1x16xf32, #tpu.memory_space<vmem>>, vector<1x16xf32>
    %6 = vector.broadcast %5 : vector<1x16xf32> to vector<16x16xf32>
    %7 = arith.addf %4, %6 : vector<16x16xf32>
    %cst_7 = arith.constant 0.000000e+00 : f32
    %8 = vector.broadcast %cst_7 : f32 to vector<16x16xf32>
    %9 = arith.maximumf %7, %8 : vector<16x16xf32>
    %cst_8 = arith.constant 0.000000e+00 : f32
    %10 = vector.broadcast %cst_8 : f32 to vector<16x16xf32>
    %c0_9 = arith.constant 0 : index
    %c0_10 = arith.constant 0 : index
    %c0_11 = arith.constant 0 : index
    %11 = vector.load %arg4[%c0_9, %c0_10, %c0_11] : memref<9x16x16xf32, #tpu.memory_space<vmem>>, vector<1x16x16xf32>
    %12 = vector.shape_cast %11 : vector<1x16x16xf32> to vector<16x16xf32>
    %cst_12 = arith.constant dense<0.000000e+00> : vector<16x16xf32>
    %13 = tpu.matmul %12, %9, %cst_12 {dimension_numbers = #tpu.dot_dimension_numbers<[1], [0], [0], [1], [0, 0, 1, 1], [], []>} : vector<16x16xf32>, vector<16x16xf32>, vector<16x16xf32> -> vector<16x16xf32>
    %c0_13 = arith.constant 0 : index
    %c0_14 = arith.constant 0 : index
    %14 = vector.load %arg5[%c0_13, %c0_14] : memref<9x16xf32, #tpu.memory_space<vmem>>, vector<1x16xf32>
    %15 = vector.shape_cast %14 : vector<1x16xf32> to vector<16xf32>
    %16 = vector.shape_cast %15 : vector<16xf32> to vector<1x16xf32>
    %17 = vector.broadcast %16 : vector<1x16xf32> to vector<16x16xf32>
    %18 = arith.mulf %13, %17 : vector<16x16xf32>
    %19 = arith.addf %10, %18 : vector<16x16xf32>
    %c1 = arith.constant 1 : index
    %c0_15 = arith.constant 0 : index
    %c0_16 = arith.constant 0 : index
    %20 = vector.load %arg4[%c1, %c0_15, %c0_16] : memref<9x16x16xf32, #tpu.memory_space<vmem>>, vector<1x16x16xf32>
    %21 = vector.shape_cast %20 : vector<1x16x16xf32> to vector<16x16xf32>
    %cst_17 = arith.constant dense<0.000000e+00> : vector<16x16xf32>
    %22 = tpu.matmul %21, %9, %cst_17 {dimension_numbers = #tpu.dot_dimension_numbers<[1], [0], [0], [1], [0, 0, 1, 1], [], []>} : vector<16x16xf32>, vector<16x16xf32>, vector<16x16xf32> -> vector<16x16xf32>
    %c1_18 = arith.constant 1 : index
    %c0_19 = arith.constant 0 : index
    %23 = vector.load %arg5[%c1_18, %c0_19] : memref<9x16xf32, #tpu.memory_space<vmem>>, vector<1x16xf32>
    %24 = vector.shape_cast %23 : vector<1x16xf32> to vector<16xf32>
    %25 = vector.shape_cast %24 : vector<16xf32> to vector<1x16xf32>
    %26 = vector.broadcast %25 : vector<1x16xf32> to vector<16x16xf32>
    %27 = arith.mulf %22, %26 : vector<16x16xf32>
    %28 = arith.addf %19, %27 : vector<16x16xf32>
    %c2 = arith.constant 2 : index
    %c0_20 = arith.constant 0 : index
    %c0_21 = arith.constant 0 : index
    %29 = vector.load %arg4[%c2, %c0_20, %c0_21] : memref<9x16x16xf32, #tpu.memory_space<vmem>>, vector<1x16x16xf32>
    %30 = vector.shape_cast %29 : vector<1x16x16xf32> to vector<16x16xf32>
    %cst_22 = arith.constant dense<0.000000e+00> : vector<16x16xf32>
    %31 = tpu.matmul %30, %9, %cst_22 {dimension_numbers = #tpu.dot_dimension_numbers<[1], [0], [0], [1], [0, 0, 1, 1], [], []>} : vector<16x16xf32>, vector<16x16xf32>, vector<16x16xf32> -> vector<16x16xf32>
    %c2_23 = arith.constant 2 : index
    %c0_24 = arith.constant 0 : index
    %32 = vector.load %arg5[%c2_23, %c0_24] : memref<9x16xf32, #tpu.memory_space<vmem>>, vector<1x16xf32>
    %33 = vector.shape_cast %32 : vector<1x16xf32> to vector<16xf32>
    %34 = vector.shape_cast %33 : vector<16xf32> to vector<1x16xf32>
    %35 = vector.broadcast %34 : vector<1x16xf32> to vector<16x16xf32>
    %36 = arith.mulf %31, %35 : vector<16x16xf32>
    %37 = arith.addf %28, %36 : vector<16x16xf32>
    %c3 = arith.constant 3 : index
    %c0_25 = arith.constant 0 : index
    %c0_26 = arith.constant 0 : index
    %38 = vector.load %arg4[%c3, %c0_25, %c0_26] : memref<9x16x16xf32, #tpu.memory_space<vmem>>, vector<1x16x16xf32>
    %39 = vector.shape_cast %38 : vector<1x16x16xf32> to vector<16x16xf32>
    %cst_27 = arith.constant dense<0.000000e+00> : vector<16x16xf32>
    %40 = tpu.matmul %39, %9, %cst_27 {dimension_numbers = #tpu.dot_dimension_numbers<[1], [0], [0], [1], [0, 0, 1, 1], [], []>} : vector<16x16xf32>, vector<16x16xf32>, vector<16x16xf32> -> vector<16x16xf32>
    %c3_28 = arith.constant 3 : index
    %c0_29 = arith.constant 0 : index
    %41 = vector.load %arg5[%c3_28, %c0_29] : memref<9x16xf32, #tpu.memory_space<vmem>>, vector<1x16xf32>
    %42 = vector.shape_cast %41 : vector<1x16xf32> to vector<16xf32>
    %43 = vector.shape_cast %42 : vector<16xf32> to vector<1x16xf32>
    %44 = vector.broadcast %43 : vector<1x16xf32> to vector<16x16xf32>
    %45 = arith.mulf %40, %44 : vector<16x16xf32>
    %46 = arith.addf %37, %45 : vector<16x16xf32>
    %c4 = arith.constant 4 : index
    %c0_30 = arith.constant 0 : index
    %c0_31 = arith.constant 0 : index
    %47 = vector.load %arg4[%c4, %c0_30, %c0_31] : memref<9x16x16xf32, #tpu.memory_space<vmem>>, vector<1x16x16xf32>
    %48 = vector.shape_cast %47 : vector<1x16x16xf32> to vector<16x16xf32>
    %cst_32 = arith.constant dense<0.000000e+00> : vector<16x16xf32>
    %49 = tpu.matmul %48, %9, %cst_32 {dimension_numbers = #tpu.dot_dimension_numbers<[1], [0], [0], [1], [0, 0, 1, 1], [], []>} : vector<16x16xf32>, vector<16x16xf32>, vector<16x16xf32> -> vector<16x16xf32>
    %c4_33 = arith.constant 4 : index
    %c0_34 = arith.constant 0 : index
    %50 = vector.load %arg5[%c4_33, %c0_34] : memref<9x16xf32, #tpu.memory_space<vmem>>, vector<1x16xf32>
    %51 = vector.shape_cast %50 : vector<1x16xf32> to vector<16xf32>
    %52 = vector.shape_cast %51 : vector<16xf32> to vector<1x16xf32>
    %53 = vector.broadcast %52 : vector<1x16xf32> to vector<16x16xf32>
    %54 = arith.mulf %49, %53 : vector<16x16xf32>
    %55 = arith.addf %46, %54 : vector<16x16xf32>
    %c5 = arith.constant 5 : index
    %c0_35 = arith.constant 0 : index
    %c0_36 = arith.constant 0 : index
    %56 = vector.load %arg4[%c5, %c0_35, %c0_36] : memref<9x16x16xf32, #tpu.memory_space<vmem>>, vector<1x16x16xf32>
    %57 = vector.shape_cast %56 : vector<1x16x16xf32> to vector<16x16xf32>
    %cst_37 = arith.constant dense<0.000000e+00> : vector<16x16xf32>
    %58 = tpu.matmul %57, %9, %cst_37 {dimension_numbers = #tpu.dot_dimension_numbers<[1], [0], [0], [1], [0, 0, 1, 1], [], []>} : vector<16x16xf32>, vector<16x16xf32>, vector<16x16xf32> -> vector<16x16xf32>
    %c5_38 = arith.constant 5 : index
    %c0_39 = arith.constant 0 : index
    %59 = vector.load %arg5[%c5_38, %c0_39] : memref<9x16xf32, #tpu.memory_space<vmem>>, vector<1x16xf32>
    %60 = vector.shape_cast %59 : vector<1x16xf32> to vector<16xf32>
    %61 = vector.shape_cast %60 : vector<16xf32> to vector<1x16xf32>
    %62 = vector.broadcast %61 : vector<1x16xf32> to vector<16x16xf32>
    %63 = arith.mulf %58, %62 : vector<16x16xf32>
    %64 = arith.addf %55, %63 : vector<16x16xf32>
    %c6 = arith.constant 6 : index
    %c0_40 = arith.constant 0 : index
    %c0_41 = arith.constant 0 : index
    %65 = vector.load %arg4[%c6, %c0_40, %c0_41] : memref<9x16x16xf32, #tpu.memory_space<vmem>>, vector<1x16x16xf32>
    %66 = vector.shape_cast %65 : vector<1x16x16xf32> to vector<16x16xf32>
    %cst_42 = arith.constant dense<0.000000e+00> : vector<16x16xf32>
    %67 = tpu.matmul %66, %9, %cst_42 {dimension_numbers = #tpu.dot_dimension_numbers<[1], [0], [0], [1], [0, 0, 1, 1], [], []>} : vector<16x16xf32>, vector<16x16xf32>, vector<16x16xf32> -> vector<16x16xf32>
    %c6_43 = arith.constant 6 : index
    %c0_44 = arith.constant 0 : index
    %68 = vector.load %arg5[%c6_43, %c0_44] : memref<9x16xf32, #tpu.memory_space<vmem>>, vector<1x16xf32>
    %69 = vector.shape_cast %68 : vector<1x16xf32> to vector<16xf32>
    %70 = vector.shape_cast %69 : vector<16xf32> to vector<1x16xf32>
    %71 = vector.broadcast %70 : vector<1x16xf32> to vector<16x16xf32>
    %72 = arith.mulf %67, %71 : vector<16x16xf32>
    %73 = arith.addf %64, %72 : vector<16x16xf32>
    %c7 = arith.constant 7 : index
    %c0_45 = arith.constant 0 : index
    %c0_46 = arith.constant 0 : index
    %74 = vector.load %arg4[%c7, %c0_45, %c0_46] : memref<9x16x16xf32, #tpu.memory_space<vmem>>, vector<1x16x16xf32>
    %75 = vector.shape_cast %74 : vector<1x16x16xf32> to vector<16x16xf32>
    %cst_47 = arith.constant dense<0.000000e+00> : vector<16x16xf32>
    %76 = tpu.matmul %75, %9, %cst_47 {dimension_numbers = #tpu.dot_dimension_numbers<[1], [0], [0], [1], [0, 0, 1, 1], [], []>} : vector<16x16xf32>, vector<16x16xf32>, vector<16x16xf32> -> vector<16x16xf32>
    %c7_48 = arith.constant 7 : index
    %c0_49 = arith.constant 0 : index
    %77 = vector.load %arg5[%c7_48, %c0_49] : memref<9x16xf32, #tpu.memory_space<vmem>>, vector<1x16xf32>
    %78 = vector.shape_cast %77 : vector<1x16xf32> to vector<16xf32>
    %79 = vector.shape_cast %78 : vector<16xf32> to vector<1x16xf32>
    %80 = vector.broadcast %79 : vector<1x16xf32> to vector<16x16xf32>
    %81 = arith.mulf %76, %80 : vector<16x16xf32>
    %82 = arith.addf %73, %81 : vector<16x16xf32>
    %c8 = arith.constant 8 : index
    %c0_50 = arith.constant 0 : index
    %c0_51 = arith.constant 0 : index
    %83 = vector.load %arg4[%c8, %c0_50, %c0_51] : memref<9x16x16xf32, #tpu.memory_space<vmem>>, vector<1x16x16xf32>
    %84 = vector.shape_cast %83 : vector<1x16x16xf32> to vector<16x16xf32>
    %cst_52 = arith.constant dense<0.000000e+00> : vector<16x16xf32>
    %85 = tpu.matmul %84, %9, %cst_52 {dimension_numbers = #tpu.dot_dimension_numbers<[1], [0], [0], [1], [0, 0, 1, 1], [], []>} : vector<16x16xf32>, vector<16x16xf32>, vector<16x16xf32> -> vector<16x16xf32>
    %c8_53 = arith.constant 8 : index
    %c0_54 = arith.constant 0 : index
    %86 = vector.load %arg5[%c8_53, %c0_54] : memref<9x16xf32, #tpu.memory_space<vmem>>, vector<1x16xf32>
    %87 = vector.shape_cast %86 : vector<1x16xf32> to vector<16xf32>
    %88 = vector.shape_cast %87 : vector<16xf32> to vector<1x16xf32>
    %89 = vector.broadcast %88 : vector<1x16xf32> to vector<16x16xf32>
    %90 = arith.mulf %85, %89 : vector<16x16xf32>
    %91 = arith.addf %82, %90 : vector<16x16xf32>
    %c0_55 = arith.constant 0 : index
    %c0_56 = arith.constant 0 : index
    %92 = vector.load %arg6[%c0_55, %c0_56] : memref<1x16xf32, #tpu.memory_space<vmem>>, vector<1x16xf32>
    %93 = vector.broadcast %92 : vector<1x16xf32> to vector<16x16xf32>
    %94 = arith.addf %91, %93 : vector<16x16xf32>
    %cst_57 = arith.constant 0.000000e+00 : f32
    %95 = vector.broadcast %cst_57 : f32 to vector<16x16xf32>
    %96 = arith.maximumf %94, %95 : vector<16x16xf32>
    %97 = arith.truncf %96 : vector<16x16xf32> to vector<16x16xbf16>
    %c0_58 = arith.constant 0 : index
    %c0_59 = arith.constant 0 : index
    %98 = vector.load %arg7[%c0_58, %c0_59] : memref<16x64xbf16, #tpu.memory_space<vmem>>, vector<16x64xbf16>
    %cst_60 = arith.constant dense<0.000000e+00> : vector<16x64xf32>
    %99 = tpu.matmul %97, %98, %cst_60 {dimension_numbers = #tpu.dot_dimension_numbers<[1], [0], [0], [1], [0, 0, 1, 1], [], []>} : vector<16x16xbf16>, vector<16x64xbf16>, vector<16x64xf32> -> vector<16x64xf32>
    %c0_61 = arith.constant 0 : index
    %c0_62 = arith.constant 0 : index
    %100 = vector.load %arg8[%c0_61, %c0_62] : memref<1x64xf32, #tpu.memory_space<vmem>>, vector<1x64xf32>
    %101 = vector.broadcast %100 : vector<1x64xf32> to vector<16x64xf32>
    %102 = arith.addf %99, %101 : vector<16x64xf32>
    %103 = arith.truncf %1 : vector<16x32xf32> to vector<16x32xbf16>
    %c0_63 = arith.constant 0 : index
    %c0_64 = arith.constant 0 : index
    %104 = vector.load %arg9[%c0_63, %c0_64] : memref<32x64xbf16, #tpu.memory_space<vmem>>, vector<32x64xbf16>
    %cst_65 = arith.constant dense<0.000000e+00> : vector<16x64xf32>
    %105 = tpu.matmul %103, %104, %cst_65 {dimension_numbers = #tpu.dot_dimension_numbers<[1], [0], [0], [1], [0, 0, 1, 1], [], []>} : vector<16x32xbf16>, vector<32x64xbf16>, vector<16x64xf32> -> vector<16x64xf32>
    %c0_66 = arith.constant 0 : index
    %c0_67 = arith.constant 0 : index
    %106 = vector.load %arg10[%c0_66, %c0_67] : memref<1x64xf32, #tpu.memory_space<vmem>>, vector<1x64xf32>
    %107 = vector.broadcast %106 : vector<1x64xf32> to vector<16x64xf32>
    %108 = arith.addf %105, %107 : vector<16x64xf32>
    %109 = arith.addf %108, %102 : vector<16x64xf32>
    %cst_68 = arith.constant 0.000000e+00 : f32
    %110 = vector.broadcast %cst_68 : f32 to vector<16x64xf32>
    %111 = arith.maximumf %109, %110 : vector<16x64xf32>
    %112 = vector.shape_cast %111 : vector<16x64xf32> to vector<1x4x4x64xf32>
    %c0_69 = arith.constant 0 : index
    %c0_70 = arith.constant 0 : index
    %c0_71 = arith.constant 0 : index
    %c0_72 = arith.constant 0 : index
    %113 = vector.load %arg11[%c0_69, %c0_70, %c0_71, %c0_72] : memref<1x4x4x64xf32, #tpu.memory_space<vmem>>, vector<1x4x4x64xf32>
    tpu.vector_store %arg11[%c0_69, %c0_70, %c0_71, %c0_72], %112 {strides = array<i32>} : memref<1x4x4x64xf32, #tpu.memory_space<vmem>>, vector<1x4x4x64xf32>,
    return
  }
  func.func @transform_0(%arg0: i32) -> (i32, i32, i32, i32) {
    %c0_i32 = arith.constant 0 : i32
    %c0_i32_0 = arith.constant 0 : i32
    %c0_i32_1 = arith.constant 0 : i32
    %c0_i32_2 = arith.constant 0 : i32
    return %arg0, %c0_i32, %c0_i32_0, %c0_i32_1 : i32, i32, i32, i32
  }
  func.func @transform_1(%arg0: i32) -> (i32, i32) {
    %c0_i32 = arith.constant 0 : i32
    %c0_i32_0 = arith.constant 0 : i32
    %c0_i32_1 = arith.constant 0 : i32
    return %c0_i32, %c0_i32_0 : i32, i32
  }
  func.func @transform_2(%arg0: i32) -> (i32, i32) {
    %c0_i32 = arith.constant 0 : i32
    %c0_i32_0 = arith.constant 0 : i32
    %c0_i32_1 = arith.constant 0 : i32
    return %c0_i32, %c0_i32_0 : i32, i32
  }
  func.func @transform_3(%arg0: i32) -> (i32, i32, i32) {
    %c0_i32 = arith.constant 0 : i32
    %c0_i32_0 = arith.constant 0 : i32
    %c0_i32_1 = arith.constant 0 : i32
    %c0_i32_2 = arith.constant 0 : i32
    return %c0_i32, %c0_i32_0, %c0_i32_1 : i32, i32, i32
  }
  func.func @transform_4(%arg0: i32) -> (i32, i32) {
    %c0_i32 = arith.constant 0 : i32
    %c0_i32_0 = arith.constant 0 : i32
    %c0_i32_1 = arith.constant 0 : i32
    return %c0_i32, %c0_i32_0 : i32, i32
  }
  func.func @transform_5(%arg0: i32) -> (i32, i32) {
    %c0_i32 = arith.constant 0 : i32
    %c0_i32_0 = arith.constant 0 : i32
    %c0_i32_1 = arith.constant 0 : i32
    return %c0_i32, %c0_i32_0 : i32, i32
  }
  func.func @transform_6(%arg0: i32) -> (i32, i32) {
    %c0_i32 = arith.constant 0 : i32
    %c0_i32_0 = arith.constant 0 : i32
    %c0_i32_1 = arith.constant 0 : i32
    return %c0_i32, %c0_i32_0 : i32, i32
  }
  func.func @transform_7(%arg0: i32) -> (i32, i32) {
    %c0_i32 = arith.constant 0 : i32
    %c0_i32_0 = arith.constant 0 : i32
    %c0_i32_1 = arith.constant 0 : i32
    return %c0_i32, %c0_i32_0 : i32, i32
  }
  func.func @transform_8(%arg0: i32) -> (i32, i32) {
    %c0_i32 = arith.constant 0 : i32
    %c0_i32_0 = arith.constant 0 : i32
    %c0_i32_1 = arith.constant 0 : i32
    return %c0_i32, %c0_i32_0 : i32, i32
  }
  func.func @transform_9(%arg0: i32) -> (i32, i32) {
    %c0_i32 = arith.constant 0 : i32
    %c0_i32_0 = arith.constant 0 : i32
    %c0_i32_1 = arith.constant 0 : i32
    return %c0_i32, %c0_i32_0 : i32, i32
  }
  func.func @transform_10(%arg0: i32) -> (i32, i32, i32, i32) {
    %c0_i32 = arith.constant 0 : i32
    %c0_i32_0 = arith.constant 0 : i32
    %c0_i32_1 = arith.constant 0 : i32
    %c0_i32_2 = arith.constant 0 : i32
    return %arg0, %c0_i32, %c0_i32_0, %c0_i32_1 : i32, i32, i32, i32
  }
}

module attributes {stable_mosaic.version = 11 : i64} {
  func.func @_fused_block_kernel(%arg0: i32, %arg1: memref<1x4x4x64xf32, #tpu.memory_space<vmem>>, %arg2: memref<64x32xbf16, #tpu.memory_space<vmem>>, %arg3: memref<1x32xf32, #tpu.memory_space<vmem>>, %arg4: memref<9x16x16xf32, #tpu.memory_space<vmem>>, %arg5: memref<9x32xf32, #tpu.memory_space<vmem>>, %arg6: memref<1x32xf32, #tpu.memory_space<vmem>>, %arg7: memref<32x128xbf16, #tpu.memory_space<vmem>>, %arg8: memref<1x128xf32, #tpu.memory_space<vmem>>, %arg9: memref<64x128xbf16, #tpu.memory_space<vmem>>, %arg10: memref<1x128xf32, #tpu.memory_space<vmem>>, %arg11: memref<1x4x4x128xf32, #tpu.memory_space<vmem>>) attributes {dimension_semantics = [#tpu.dimension_semantics<parallel>], iteration_bounds = array<i64: 2>, scalar_prefetch = 0 : i64, scratch_operands = 0 : i64, tpu.core_type = #tpu.core_type<tc>, window_params = [{transform_indices = @transform_0, window_bounds = array<i64: 1, 4, 4, 64>}, {pipeline_mode = #tpu.pipeline_mode<synchronous>, transform_indices = @transform_1, window_bounds = array<i64: 64, 32>}, {pipeline_mode = #tpu.pipeline_mode<synchronous>, transform_indices = @transform_2, window_bounds = array<i64: 1, 32>}, {pipeline_mode = #tpu.pipeline_mode<synchronous>, transform_indices = @transform_3, window_bounds = array<i64: 9, 16, 16>}, {pipeline_mode = #tpu.pipeline_mode<synchronous>, transform_indices = @transform_4, window_bounds = array<i64: 9, 32>}, {pipeline_mode = #tpu.pipeline_mode<synchronous>, transform_indices = @transform_5, window_bounds = array<i64: 1, 32>}, {pipeline_mode = #tpu.pipeline_mode<synchronous>, transform_indices = @transform_6, window_bounds = array<i64: 32, 128>}, {pipeline_mode = #tpu.pipeline_mode<synchronous>, transform_indices = @transform_7, window_bounds = array<i64: 1, 128>}, {pipeline_mode = #tpu.pipeline_mode<synchronous>, transform_indices = @transform_8, window_bounds = array<i64: 64, 128>}, {pipeline_mode = #tpu.pipeline_mode<synchronous>, transform_indices = @transform_9, window_bounds = array<i64: 1, 128>}, {transform_indices = @transform_10, window_bounds = array<i64: 1, 4, 4, 128>}]} {
    %c0 = arith.constant 0 : index
    %c0_0 = arith.constant 0 : index
    %c0_1 = arith.constant 0 : index
    %c0_2 = arith.constant 0 : index
    %0 = vector.load %arg1[%c0, %c0_0, %c0_1, %c0_2] : memref<1x4x4x64xf32, #tpu.memory_space<vmem>>, vector<1x4x4x64xf32>
    %1 = vector.shape_cast %0 : vector<1x4x4x64xf32> to vector<16x64xf32>
    %2 = arith.truncf %1 : vector<16x64xf32> to vector<16x64xbf16>
    %c0_3 = arith.constant 0 : index
    %c0_4 = arith.constant 0 : index
    %3 = vector.load %arg2[%c0_3, %c0_4] : memref<64x32xbf16, #tpu.memory_space<vmem>>, vector<64x32xbf16>
    %cst = arith.constant dense<0.000000e+00> : vector<16x32xf32>
    %4 = tpu.matmul %2, %3, %cst {dimension_numbers = #tpu.dot_dimension_numbers<[1], [0], [0], [1], [0, 0, 1, 1], [], []>} : vector<16x64xbf16>, vector<64x32xbf16>, vector<16x32xf32> -> vector<16x32xf32>
    %c0_5 = arith.constant 0 : index
    %c0_6 = arith.constant 0 : index
    %5 = vector.load %arg3[%c0_5, %c0_6] : memref<1x32xf32, #tpu.memory_space<vmem>>, vector<1x32xf32>
    %6 = vector.broadcast %5 : vector<1x32xf32> to vector<16x32xf32>
    %7 = arith.addf %4, %6 : vector<16x32xf32>
    %cst_7 = arith.constant 0.000000e+00 : f32
    %8 = vector.broadcast %cst_7 : f32 to vector<16x32xf32>
    %9 = arith.maximumf %7, %8 : vector<16x32xf32>
    %cst_8 = arith.constant 0.000000e+00 : f32
    %10 = vector.broadcast %cst_8 : f32 to vector<16x32xf32>
    %c0_9 = arith.constant 0 : index
    %c0_10 = arith.constant 0 : index
    %c0_11 = arith.constant 0 : index
    %11 = vector.load %arg4[%c0_9, %c0_10, %c0_11] : memref<9x16x16xf32, #tpu.memory_space<vmem>>, vector<1x16x16xf32>
    %12 = vector.shape_cast %11 : vector<1x16x16xf32> to vector<16x16xf32>
    %cst_12 = arith.constant dense<0.000000e+00> : vector<16x32xf32>
    %13 = tpu.matmul %12, %9, %cst_12 {dimension_numbers = #tpu.dot_dimension_numbers<[1], [0], [0], [1], [0, 0, 1, 1], [], []>} : vector<16x16xf32>, vector<16x32xf32>, vector<16x32xf32> -> vector<16x32xf32>
    %c0_13 = arith.constant 0 : index
    %c0_14 = arith.constant 0 : index
    %14 = vector.load %arg5[%c0_13, %c0_14] : memref<9x32xf32, #tpu.memory_space<vmem>>, vector<1x32xf32>
    %15 = vector.shape_cast %14 : vector<1x32xf32> to vector<32xf32>
    %16 = vector.shape_cast %15 : vector<32xf32> to vector<1x32xf32>
    %17 = vector.broadcast %16 : vector<1x32xf32> to vector<16x32xf32>
    %18 = arith.mulf %13, %17 : vector<16x32xf32>
    %19 = arith.addf %10, %18 : vector<16x32xf32>
    %c1 = arith.constant 1 : index
    %c0_15 = arith.constant 0 : index
    %c0_16 = arith.constant 0 : index
    %20 = vector.load %arg4[%c1, %c0_15, %c0_16] : memref<9x16x16xf32, #tpu.memory_space<vmem>>, vector<1x16x16xf32>
    %21 = vector.shape_cast %20 : vector<1x16x16xf32> to vector<16x16xf32>
    %cst_17 = arith.constant dense<0.000000e+00> : vector<16x32xf32>
    %22 = tpu.matmul %21, %9, %cst_17 {dimension_numbers = #tpu.dot_dimension_numbers<[1], [0], [0], [1], [0, 0, 1, 1], [], []>} : vector<16x16xf32>, vector<16x32xf32>, vector<16x32xf32> -> vector<16x32xf32>
    %c1_18 = arith.constant 1 : index
    %c0_19 = arith.constant 0 : index
    %23 = vector.load %arg5[%c1_18, %c0_19] : memref<9x32xf32, #tpu.memory_space<vmem>>, vector<1x32xf32>
    %24 = vector.shape_cast %23 : vector<1x32xf32> to vector<32xf32>
    %25 = vector.shape_cast %24 : vector<32xf32> to vector<1x32xf32>
    %26 = vector.broadcast %25 : vector<1x32xf32> to vector<16x32xf32>
    %27 = arith.mulf %22, %26 : vector<16x32xf32>
    %28 = arith.addf %19, %27 : vector<16x32xf32>
    %c2 = arith.constant 2 : index
    %c0_20 = arith.constant 0 : index
    %c0_21 = arith.constant 0 : index
    %29 = vector.load %arg4[%c2, %c0_20, %c0_21] : memref<9x16x16xf32, #tpu.memory_space<vmem>>, vector<1x16x16xf32>
    %30 = vector.shape_cast %29 : vector<1x16x16xf32> to vector<16x16xf32>
    %cst_22 = arith.constant dense<0.000000e+00> : vector<16x32xf32>
    %31 = tpu.matmul %30, %9, %cst_22 {dimension_numbers = #tpu.dot_dimension_numbers<[1], [0], [0], [1], [0, 0, 1, 1], [], []>} : vector<16x16xf32>, vector<16x32xf32>, vector<16x32xf32> -> vector<16x32xf32>
    %c2_23 = arith.constant 2 : index
    %c0_24 = arith.constant 0 : index
    %32 = vector.load %arg5[%c2_23, %c0_24] : memref<9x32xf32, #tpu.memory_space<vmem>>, vector<1x32xf32>
    %33 = vector.shape_cast %32 : vector<1x32xf32> to vector<32xf32>
    %34 = vector.shape_cast %33 : vector<32xf32> to vector<1x32xf32>
    %35 = vector.broadcast %34 : vector<1x32xf32> to vector<16x32xf32>
    %36 = arith.mulf %31, %35 : vector<16x32xf32>
    %37 = arith.addf %28, %36 : vector<16x32xf32>
    %c3 = arith.constant 3 : index
    %c0_25 = arith.constant 0 : index
    %c0_26 = arith.constant 0 : index
    %38 = vector.load %arg4[%c3, %c0_25, %c0_26] : memref<9x16x16xf32, #tpu.memory_space<vmem>>, vector<1x16x16xf32>
    %39 = vector.shape_cast %38 : vector<1x16x16xf32> to vector<16x16xf32>
    %cst_27 = arith.constant dense<0.000000e+00> : vector<16x32xf32>
    %40 = tpu.matmul %39, %9, %cst_27 {dimension_numbers = #tpu.dot_dimension_numbers<[1], [0], [0], [1], [0, 0, 1, 1], [], []>} : vector<16x16xf32>, vector<16x32xf32>, vector<16x32xf32> -> vector<16x32xf32>
    %c3_28 = arith.constant 3 : index
    %c0_29 = arith.constant 0 : index
    %41 = vector.load %arg5[%c3_28, %c0_29] : memref<9x32xf32, #tpu.memory_space<vmem>>, vector<1x32xf32>
    %42 = vector.shape_cast %41 : vector<1x32xf32> to vector<32xf32>
    %43 = vector.shape_cast %42 : vector<32xf32> to vector<1x32xf32>
    %44 = vector.broadcast %43 : vector<1x32xf32> to vector<16x32xf32>
    %45 = arith.mulf %40, %44 : vector<16x32xf32>
    %46 = arith.addf %37, %45 : vector<16x32xf32>
    %c4 = arith.constant 4 : index
    %c0_30 = arith.constant 0 : index
    %c0_31 = arith.constant 0 : index
    %47 = vector.load %arg4[%c4, %c0_30, %c0_31] : memref<9x16x16xf32, #tpu.memory_space<vmem>>, vector<1x16x16xf32>
    %48 = vector.shape_cast %47 : vector<1x16x16xf32> to vector<16x16xf32>
    %cst_32 = arith.constant dense<0.000000e+00> : vector<16x32xf32>
    %49 = tpu.matmul %48, %9, %cst_32 {dimension_numbers = #tpu.dot_dimension_numbers<[1], [0], [0], [1], [0, 0, 1, 1], [], []>} : vector<16x16xf32>, vector<16x32xf32>, vector<16x32xf32> -> vector<16x32xf32>
    %c4_33 = arith.constant 4 : index
    %c0_34 = arith.constant 0 : index
    %50 = vector.load %arg5[%c4_33, %c0_34] : memref<9x32xf32, #tpu.memory_space<vmem>>, vector<1x32xf32>
    %51 = vector.shape_cast %50 : vector<1x32xf32> to vector<32xf32>
    %52 = vector.shape_cast %51 : vector<32xf32> to vector<1x32xf32>
    %53 = vector.broadcast %52 : vector<1x32xf32> to vector<16x32xf32>
    %54 = arith.mulf %49, %53 : vector<16x32xf32>
    %55 = arith.addf %46, %54 : vector<16x32xf32>
    %c5 = arith.constant 5 : index
    %c0_35 = arith.constant 0 : index
    %c0_36 = arith.constant 0 : index
    %56 = vector.load %arg4[%c5, %c0_35, %c0_36] : memref<9x16x16xf32, #tpu.memory_space<vmem>>, vector<1x16x16xf32>
    %57 = vector.shape_cast %56 : vector<1x16x16xf32> to vector<16x16xf32>
    %cst_37 = arith.constant dense<0.000000e+00> : vector<16x32xf32>
    %58 = tpu.matmul %57, %9, %cst_37 {dimension_numbers = #tpu.dot_dimension_numbers<[1], [0], [0], [1], [0, 0, 1, 1], [], []>} : vector<16x16xf32>, vector<16x32xf32>, vector<16x32xf32> -> vector<16x32xf32>
    %c5_38 = arith.constant 5 : index
    %c0_39 = arith.constant 0 : index
    %59 = vector.load %arg5[%c5_38, %c0_39] : memref<9x32xf32, #tpu.memory_space<vmem>>, vector<1x32xf32>
    %60 = vector.shape_cast %59 : vector<1x32xf32> to vector<32xf32>
    %61 = vector.shape_cast %60 : vector<32xf32> to vector<1x32xf32>
    %62 = vector.broadcast %61 : vector<1x32xf32> to vector<16x32xf32>
    %63 = arith.mulf %58, %62 : vector<16x32xf32>
    %64 = arith.addf %55, %63 : vector<16x32xf32>
    %c6 = arith.constant 6 : index
    %c0_40 = arith.constant 0 : index
    %c0_41 = arith.constant 0 : index
    %65 = vector.load %arg4[%c6, %c0_40, %c0_41] : memref<9x16x16xf32, #tpu.memory_space<vmem>>, vector<1x16x16xf32>
    %66 = vector.shape_cast %65 : vector<1x16x16xf32> to vector<16x16xf32>
    %cst_42 = arith.constant dense<0.000000e+00> : vector<16x32xf32>
    %67 = tpu.matmul %66, %9, %cst_42 {dimension_numbers = #tpu.dot_dimension_numbers<[1], [0], [0], [1], [0, 0, 1, 1], [], []>} : vector<16x16xf32>, vector<16x32xf32>, vector<16x32xf32> -> vector<16x32xf32>
    %c6_43 = arith.constant 6 : index
    %c0_44 = arith.constant 0 : index
    %68 = vector.load %arg5[%c6_43, %c0_44] : memref<9x32xf32, #tpu.memory_space<vmem>>, vector<1x32xf32>
    %69 = vector.shape_cast %68 : vector<1x32xf32> to vector<32xf32>
    %70 = vector.shape_cast %69 : vector<32xf32> to vector<1x32xf32>
    %71 = vector.broadcast %70 : vector<1x32xf32> to vector<16x32xf32>
    %72 = arith.mulf %67, %71 : vector<16x32xf32>
    %73 = arith.addf %64, %72 : vector<16x32xf32>
    %c7 = arith.constant 7 : index
    %c0_45 = arith.constant 0 : index
    %c0_46 = arith.constant 0 : index
    %74 = vector.load %arg4[%c7, %c0_45, %c0_46] : memref<9x16x16xf32, #tpu.memory_space<vmem>>, vector<1x16x16xf32>
    %75 = vector.shape_cast %74 : vector<1x16x16xf32> to vector<16x16xf32>
    %cst_47 = arith.constant dense<0.000000e+00> : vector<16x32xf32>
    %76 = tpu.matmul %75, %9, %cst_47 {dimension_numbers = #tpu.dot_dimension_numbers<[1], [0], [0], [1], [0, 0, 1, 1], [], []>} : vector<16x16xf32>, vector<16x32xf32>, vector<16x32xf32> -> vector<16x32xf32>
    %c7_48 = arith.constant 7 : index
    %c0_49 = arith.constant 0 : index
    %77 = vector.load %arg5[%c7_48, %c0_49] : memref<9x32xf32, #tpu.memory_space<vmem>>, vector<1x32xf32>
    %78 = vector.shape_cast %77 : vector<1x32xf32> to vector<32xf32>
    %79 = vector.shape_cast %78 : vector<32xf32> to vector<1x32xf32>
    %80 = vector.broadcast %79 : vector<1x32xf32> to vector<16x32xf32>
    %81 = arith.mulf %76, %80 : vector<16x32xf32>
    %82 = arith.addf %73, %81 : vector<16x32xf32>
    %c8 = arith.constant 8 : index
    %c0_50 = arith.constant 0 : index
    %c0_51 = arith.constant 0 : index
    %83 = vector.load %arg4[%c8, %c0_50, %c0_51] : memref<9x16x16xf32, #tpu.memory_space<vmem>>, vector<1x16x16xf32>
    %84 = vector.shape_cast %83 : vector<1x16x16xf32> to vector<16x16xf32>
    %cst_52 = arith.constant dense<0.000000e+00> : vector<16x32xf32>
    %85 = tpu.matmul %84, %9, %cst_52 {dimension_numbers = #tpu.dot_dimension_numbers<[1], [0], [0], [1], [0, 0, 1, 1], [], []>} : vector<16x16xf32>, vector<16x32xf32>, vector<16x32xf32> -> vector<16x32xf32>
    %c8_53 = arith.constant 8 : index
    %c0_54 = arith.constant 0 : index
    %86 = vector.load %arg5[%c8_53, %c0_54] : memref<9x32xf32, #tpu.memory_space<vmem>>, vector<1x32xf32>
    %87 = vector.shape_cast %86 : vector<1x32xf32> to vector<32xf32>
    %88 = vector.shape_cast %87 : vector<32xf32> to vector<1x32xf32>
    %89 = vector.broadcast %88 : vector<1x32xf32> to vector<16x32xf32>
    %90 = arith.mulf %85, %89 : vector<16x32xf32>
    %91 = arith.addf %82, %90 : vector<16x32xf32>
    %c0_55 = arith.constant 0 : index
    %c0_56 = arith.constant 0 : index
    %92 = vector.load %arg6[%c0_55, %c0_56] : memref<1x32xf32, #tpu.memory_space<vmem>>, vector<1x32xf32>
    %93 = vector.broadcast %92 : vector<1x32xf32> to vector<16x32xf32>
    %94 = arith.addf %91, %93 : vector<16x32xf32>
    %cst_57 = arith.constant 0.000000e+00 : f32
    %95 = vector.broadcast %cst_57 : f32 to vector<16x32xf32>
    %96 = arith.maximumf %94, %95 : vector<16x32xf32>
    %97 = arith.truncf %96 : vector<16x32xf32> to vector<16x32xbf16>
    %c0_58 = arith.constant 0 : index
    %c0_59 = arith.constant 0 : index
    %98 = vector.load %arg7[%c0_58, %c0_59] : memref<32x128xbf16, #tpu.memory_space<vmem>>, vector<32x128xbf16>
    %cst_60 = arith.constant dense<0.000000e+00> : vector<16x128xf32>
    %99 = tpu.matmul %97, %98, %cst_60 {dimension_numbers = #tpu.dot_dimension_numbers<[1], [0], [0], [1], [0, 0, 1, 1], [], []>} : vector<16x32xbf16>, vector<32x128xbf16>, vector<16x128xf32> -> vector<16x128xf32>
    %c0_61 = arith.constant 0 : index
    %c0_62 = arith.constant 0 : index
    %100 = vector.load %arg8[%c0_61, %c0_62] : memref<1x128xf32, #tpu.memory_space<vmem>>, vector<1x128xf32>
    %101 = vector.broadcast %100 : vector<1x128xf32> to vector<16x128xf32>
    %102 = arith.addf %99, %101 : vector<16x128xf32>
    %103 = arith.truncf %1 : vector<16x64xf32> to vector<16x64xbf16>
    %c0_63 = arith.constant 0 : index
    %c0_64 = arith.constant 0 : index
    %104 = vector.load %arg9[%c0_63, %c0_64] : memref<64x128xbf16, #tpu.memory_space<vmem>>, vector<64x128xbf16>
    %cst_65 = arith.constant dense<0.000000e+00> : vector<16x128xf32>
    %105 = tpu.matmul %103, %104, %cst_65 {dimension_numbers = #tpu.dot_dimension_numbers<[1], [0], [0], [1], [0, 0, 1, 1], [], []>} : vector<16x64xbf16>, vector<64x128xbf16>, vector<16x128xf32> -> vector<16x128xf32>
    %c0_66 = arith.constant 0 : index
    %c0_67 = arith.constant 0 : index
    %106 = vector.load %arg10[%c0_66, %c0_67] : memref<1x128xf32, #tpu.memory_space<vmem>>, vector<1x128xf32>
    %107 = vector.broadcast %106 : vector<1x128xf32> to vector<16x128xf32>
    %108 = arith.addf %105, %107 : vector<16x128xf32>
    %109 = arith.addf %108, %102 : vector<16x128xf32>
    %cst_68 = arith.constant 0.000000e+00 : f32
    %110 = vector.broadcast %cst_68 : f32 to vector<16x128xf32>
    %111 = arith.maximumf %109, %110 : vector<16x128xf32>
    %112 = vector.shape_cast %111 : vector<16x128xf32> to vector<1x4x4x128xf32>
    %c0_69 = arith.constant 0 : index
    %c0_70 = arith.constant 0 : index
    %c0_71 = arith.constant 0 : index
    %c0_72 = arith.constant 0 : index
    %113 = vector.load %arg11[%c0_69, %c0_70, %c0_71, %c0_72] : memref<1x4x4x128xf32, #tpu.memory_space<vmem>>, vector<1x4x4x128xf32>
    tpu.vector_store %arg11[%c0_69, %c0_70, %c0_71, %c0_72], %112 {strides = array<i32>} : memref<1x4x4x128xf32, #tpu.memory_space<vmem>>, vector<1x4x4x128xf32>,
    return
  }
  func.func @transform_0(%arg0: i32) -> (i32, i32, i32, i32) {
    %c0_i32 = arith.constant 0 : i32
    %c0_i32_0 = arith.constant 0 : i32
    %c0_i32_1 = arith.constant 0 : i32
    %c0_i32_2 = arith.constant 0 : i32
    return %arg0, %c0_i32, %c0_i32_0, %c0_i32_1 : i32, i32, i32, i32
  }
  func.func @transform_1(%arg0: i32) -> (i32, i32) {
    %c0_i32 = arith.constant 0 : i32
    %c0_i32_0 = arith.constant 0 : i32
    %c0_i32_1 = arith.constant 0 : i32
    return %c0_i32, %c0_i32_0 : i32, i32
  }
  func.func @transform_2(%arg0: i32) -> (i32, i32) {
    %c0_i32 = arith.constant 0 : i32
    %c0_i32_0 = arith.constant 0 : i32
    %c0_i32_1 = arith.constant 0 : i32
    return %c0_i32, %c0_i32_0 : i32, i32
  }
  func.func @transform_3(%arg0: i32) -> (i32, i32, i32) {
    %c0_i32 = arith.constant 0 : i32
    %c0_i32_0 = arith.constant 0 : i32
    %c0_i32_1 = arith.constant 0 : i32
    %c0_i32_2 = arith.constant 0 : i32
    return %c0_i32, %c0_i32_0, %c0_i32_1 : i32, i32, i32
  }
  func.func @transform_4(%arg0: i32) -> (i32, i32) {
    %c0_i32 = arith.constant 0 : i32
    %c0_i32_0 = arith.constant 0 : i32
    %c0_i32_1 = arith.constant 0 : i32
    return %c0_i32, %c0_i32_0 : i32, i32
  }
  func.func @transform_5(%arg0: i32) -> (i32, i32) {
    %c0_i32 = arith.constant 0 : i32
    %c0_i32_0 = arith.constant 0 : i32
    %c0_i32_1 = arith.constant 0 : i32
    return %c0_i32, %c0_i32_0 : i32, i32
  }
  func.func @transform_6(%arg0: i32) -> (i32, i32) {
    %c0_i32 = arith.constant 0 : i32
    %c0_i32_0 = arith.constant 0 : i32
    %c0_i32_1 = arith.constant 0 : i32
    return %c0_i32, %c0_i32_0 : i32, i32
  }
  func.func @transform_7(%arg0: i32) -> (i32, i32) {
    %c0_i32 = arith.constant 0 : i32
    %c0_i32_0 = arith.constant 0 : i32
    %c0_i32_1 = arith.constant 0 : i32
    return %c0_i32, %c0_i32_0 : i32, i32
  }
  func.func @transform_8(%arg0: i32) -> (i32, i32) {
    %c0_i32 = arith.constant 0 : i32
    %c0_i32_0 = arith.constant 0 : i32
    %c0_i32_1 = arith.constant 0 : i32
    return %c0_i32, %c0_i32_0 : i32, i32
  }
  func.func @transform_9(%arg0: i32) -> (i32, i32) {
    %c0_i32 = arith.constant 0 : i32
    %c0_i32_0 = arith.constant 0 : i32
    %c0_i32_1 = arith.constant 0 : i32
    return %c0_i32, %c0_i32_0 : i32, i32
  }
  func.func @transform_10(%arg0: i32) -> (i32, i32, i32, i32) {
    %c0_i32 = arith.constant 0 : i32
    %c0_i32_0 = arith.constant 0 : i32
    %c0_i32_1 = arith.constant 0 : i32
    %c0_i32_2 = arith.constant 0 : i32
    return %arg0, %c0_i32, %c0_i32_0, %c0_i32_1 : i32, i32, i32, i32
  }
}

module attributes {stable_mosaic.version = 11 : i64} {
  func.func @_fused_block_kernel(%arg0: i32, %arg1: memref<1x4x4x128xf32, #tpu.memory_space<vmem>>, %arg2: memref<128x64xbf16, #tpu.memory_space<vmem>>, %arg3: memref<1x64xf32, #tpu.memory_space<vmem>>, %arg4: memref<9x4x16xf32, #tpu.memory_space<vmem>>, %arg5: memref<9x64xf32, #tpu.memory_space<vmem>>, %arg6: memref<1x64xf32, #tpu.memory_space<vmem>>, %arg7: memref<64x256xbf16, #tpu.memory_space<vmem>>, %arg8: memref<1x256xf32, #tpu.memory_space<vmem>>, %arg9: memref<128x256xbf16, #tpu.memory_space<vmem>>, %arg10: memref<1x256xf32, #tpu.memory_space<vmem>>, %arg11: memref<1x2x2x256xf32, #tpu.memory_space<vmem>>) attributes {dimension_semantics = [#tpu.dimension_semantics<parallel>], iteration_bounds = array<i64: 2>, scalar_prefetch = 0 : i64, scratch_operands = 0 : i64, tpu.core_type = #tpu.core_type<tc>, window_params = [{transform_indices = @transform_0, window_bounds = array<i64: 1, 4, 4, 128>}, {pipeline_mode = #tpu.pipeline_mode<synchronous>, transform_indices = @transform_1, window_bounds = array<i64: 128, 64>}, {pipeline_mode = #tpu.pipeline_mode<synchronous>, transform_indices = @transform_2, window_bounds = array<i64: 1, 64>}, {pipeline_mode = #tpu.pipeline_mode<synchronous>, transform_indices = @transform_3, window_bounds = array<i64: 9, 4, 16>}, {pipeline_mode = #tpu.pipeline_mode<synchronous>, transform_indices = @transform_4, window_bounds = array<i64: 9, 64>}, {pipeline_mode = #tpu.pipeline_mode<synchronous>, transform_indices = @transform_5, window_bounds = array<i64: 1, 64>}, {pipeline_mode = #tpu.pipeline_mode<synchronous>, transform_indices = @transform_6, window_bounds = array<i64: 64, 256>}, {pipeline_mode = #tpu.pipeline_mode<synchronous>, transform_indices = @transform_7, window_bounds = array<i64: 1, 256>}, {pipeline_mode = #tpu.pipeline_mode<synchronous>, transform_indices = @transform_8, window_bounds = array<i64: 128, 256>}, {pipeline_mode = #tpu.pipeline_mode<synchronous>, transform_indices = @transform_9, window_bounds = array<i64: 1, 256>}, {transform_indices = @transform_10, window_bounds = array<i64: 1, 2, 2, 256>}]} {
    %c0 = arith.constant 0 : index
    %c0_0 = arith.constant 0 : index
    %c0_1 = arith.constant 0 : index
    %c0_2 = arith.constant 0 : index
    %0 = vector.load %arg1[%c0, %c0_0, %c0_1, %c0_2] : memref<1x4x4x128xf32, #tpu.memory_space<vmem>>, vector<1x4x4x128xf32>
    %1 = vector.shape_cast %0 : vector<1x4x4x128xf32> to vector<16x128xf32>
    %2 = arith.truncf %1 : vector<16x128xf32> to vector<16x128xbf16>
    %c0_3 = arith.constant 0 : index
    %c0_4 = arith.constant 0 : index
    %3 = vector.load %arg2[%c0_3, %c0_4] : memref<128x64xbf16, #tpu.memory_space<vmem>>, vector<128x64xbf16>
    %cst = arith.constant dense<0.000000e+00> : vector<16x64xf32>
    %4 = tpu.matmul %2, %3, %cst {dimension_numbers = #tpu.dot_dimension_numbers<[1], [0], [0], [1], [0, 0, 1, 1], [], []>} : vector<16x128xbf16>, vector<128x64xbf16>, vector<16x64xf32> -> vector<16x64xf32>
    %c0_5 = arith.constant 0 : index
    %c0_6 = arith.constant 0 : index
    %5 = vector.load %arg3[%c0_5, %c0_6] : memref<1x64xf32, #tpu.memory_space<vmem>>, vector<1x64xf32>
    %6 = vector.broadcast %5 : vector<1x64xf32> to vector<16x64xf32>
    %7 = arith.addf %4, %6 : vector<16x64xf32>
    %cst_7 = arith.constant 0.000000e+00 : f32
    %8 = vector.broadcast %cst_7 : f32 to vector<16x64xf32>
    %9 = arith.maximumf %7, %8 : vector<16x64xf32>
    %cst_8 = arith.constant 0.000000e+00 : f32
    %10 = vector.broadcast %cst_8 : f32 to vector<4x64xf32>
    %c0_9 = arith.constant 0 : index
    %c0_10 = arith.constant 0 : index
    %c0_11 = arith.constant 0 : index
    %11 = vector.load %arg4[%c0_9, %c0_10, %c0_11] : memref<9x4x16xf32, #tpu.memory_space<vmem>>, vector<1x4x16xf32>
    %12 = vector.shape_cast %11 : vector<1x4x16xf32> to vector<4x16xf32>
    %cst_12 = arith.constant dense<0.000000e+00> : vector<4x64xf32>
    %13 = tpu.matmul %12, %9, %cst_12 {dimension_numbers = #tpu.dot_dimension_numbers<[1], [0], [0], [1], [0, 0, 1, 1], [], []>} : vector<4x16xf32>, vector<16x64xf32>, vector<4x64xf32> -> vector<4x64xf32>
    %c0_13 = arith.constant 0 : index
    %c0_14 = arith.constant 0 : index
    %14 = vector.load %arg5[%c0_13, %c0_14] : memref<9x64xf32, #tpu.memory_space<vmem>>, vector<1x64xf32>
    %15 = vector.shape_cast %14 : vector<1x64xf32> to vector<64xf32>
    %16 = vector.shape_cast %15 : vector<64xf32> to vector<1x64xf32>
    %17 = vector.broadcast %16 : vector<1x64xf32> to vector<4x64xf32>
    %18 = arith.mulf %13, %17 : vector<4x64xf32>
    %19 = arith.addf %10, %18 : vector<4x64xf32>
    %c1 = arith.constant 1 : index
    %c0_15 = arith.constant 0 : index
    %c0_16 = arith.constant 0 : index
    %20 = vector.load %arg4[%c1, %c0_15, %c0_16] : memref<9x4x16xf32, #tpu.memory_space<vmem>>, vector<1x4x16xf32>
    %21 = vector.shape_cast %20 : vector<1x4x16xf32> to vector<4x16xf32>
    %cst_17 = arith.constant dense<0.000000e+00> : vector<4x64xf32>
    %22 = tpu.matmul %21, %9, %cst_17 {dimension_numbers = #tpu.dot_dimension_numbers<[1], [0], [0], [1], [0, 0, 1, 1], [], []>} : vector<4x16xf32>, vector<16x64xf32>, vector<4x64xf32> -> vector<4x64xf32>
    %c1_18 = arith.constant 1 : index
    %c0_19 = arith.constant 0 : index
    %23 = vector.load %arg5[%c1_18, %c0_19] : memref<9x64xf32, #tpu.memory_space<vmem>>, vector<1x64xf32>
    %24 = vector.shape_cast %23 : vector<1x64xf32> to vector<64xf32>
    %25 = vector.shape_cast %24 : vector<64xf32> to vector<1x64xf32>
    %26 = vector.broadcast %25 : vector<1x64xf32> to vector<4x64xf32>
    %27 = arith.mulf %22, %26 : vector<4x64xf32>
    %28 = arith.addf %19, %27 : vector<4x64xf32>
    %c2 = arith.constant 2 : index
    %c0_20 = arith.constant 0 : index
    %c0_21 = arith.constant 0 : index
    %29 = vector.load %arg4[%c2, %c0_20, %c0_21] : memref<9x4x16xf32, #tpu.memory_space<vmem>>, vector<1x4x16xf32>
    %30 = vector.shape_cast %29 : vector<1x4x16xf32> to vector<4x16xf32>
    %cst_22 = arith.constant dense<0.000000e+00> : vector<4x64xf32>
    %31 = tpu.matmul %30, %9, %cst_22 {dimension_numbers = #tpu.dot_dimension_numbers<[1], [0], [0], [1], [0, 0, 1, 1], [], []>} : vector<4x16xf32>, vector<16x64xf32>, vector<4x64xf32> -> vector<4x64xf32>
    %c2_23 = arith.constant 2 : index
    %c0_24 = arith.constant 0 : index
    %32 = vector.load %arg5[%c2_23, %c0_24] : memref<9x64xf32, #tpu.memory_space<vmem>>, vector<1x64xf32>
    %33 = vector.shape_cast %32 : vector<1x64xf32> to vector<64xf32>
    %34 = vector.shape_cast %33 : vector<64xf32> to vector<1x64xf32>
    %35 = vector.broadcast %34 : vector<1x64xf32> to vector<4x64xf32>
    %36 = arith.mulf %31, %35 : vector<4x64xf32>
    %37 = arith.addf %28, %36 : vector<4x64xf32>
    %c3 = arith.constant 3 : index
    %c0_25 = arith.constant 0 : index
    %c0_26 = arith.constant 0 : index
    %38 = vector.load %arg4[%c3, %c0_25, %c0_26] : memref<9x4x16xf32, #tpu.memory_space<vmem>>, vector<1x4x16xf32>
    %39 = vector.shape_cast %38 : vector<1x4x16xf32> to vector<4x16xf32>
    %cst_27 = arith.constant dense<0.000000e+00> : vector<4x64xf32>
    %40 = tpu.matmul %39, %9, %cst_27 {dimension_numbers = #tpu.dot_dimension_numbers<[1], [0], [0], [1], [0, 0, 1, 1], [], []>} : vector<4x16xf32>, vector<16x64xf32>, vector<4x64xf32> -> vector<4x64xf32>
    %c3_28 = arith.constant 3 : index
    %c0_29 = arith.constant 0 : index
    %41 = vector.load %arg5[%c3_28, %c0_29] : memref<9x64xf32, #tpu.memory_space<vmem>>, vector<1x64xf32>
    %42 = vector.shape_cast %41 : vector<1x64xf32> to vector<64xf32>
    %43 = vector.shape_cast %42 : vector<64xf32> to vector<1x64xf32>
    %44 = vector.broadcast %43 : vector<1x64xf32> to vector<4x64xf32>
    %45 = arith.mulf %40, %44 : vector<4x64xf32>
    %46 = arith.addf %37, %45 : vector<4x64xf32>
    %c4 = arith.constant 4 : index
    %c0_30 = arith.constant 0 : index
    %c0_31 = arith.constant 0 : index
    %47 = vector.load %arg4[%c4, %c0_30, %c0_31] : memref<9x4x16xf32, #tpu.memory_space<vmem>>, vector<1x4x16xf32>
    %48 = vector.shape_cast %47 : vector<1x4x16xf32> to vector<4x16xf32>
    %cst_32 = arith.constant dense<0.000000e+00> : vector<4x64xf32>
    %49 = tpu.matmul %48, %9, %cst_32 {dimension_numbers = #tpu.dot_dimension_numbers<[1], [0], [0], [1], [0, 0, 1, 1], [], []>} : vector<4x16xf32>, vector<16x64xf32>, vector<4x64xf32> -> vector<4x64xf32>
    %c4_33 = arith.constant 4 : index
    %c0_34 = arith.constant 0 : index
    %50 = vector.load %arg5[%c4_33, %c0_34] : memref<9x64xf32, #tpu.memory_space<vmem>>, vector<1x64xf32>
    %51 = vector.shape_cast %50 : vector<1x64xf32> to vector<64xf32>
    %52 = vector.shape_cast %51 : vector<64xf32> to vector<1x64xf32>
    %53 = vector.broadcast %52 : vector<1x64xf32> to vector<4x64xf32>
    %54 = arith.mulf %49, %53 : vector<4x64xf32>
    %55 = arith.addf %46, %54 : vector<4x64xf32>
    %c5 = arith.constant 5 : index
    %c0_35 = arith.constant 0 : index
    %c0_36 = arith.constant 0 : index
    %56 = vector.load %arg4[%c5, %c0_35, %c0_36] : memref<9x4x16xf32, #tpu.memory_space<vmem>>, vector<1x4x16xf32>
    %57 = vector.shape_cast %56 : vector<1x4x16xf32> to vector<4x16xf32>
    %cst_37 = arith.constant dense<0.000000e+00> : vector<4x64xf32>
    %58 = tpu.matmul %57, %9, %cst_37 {dimension_numbers = #tpu.dot_dimension_numbers<[1], [0], [0], [1], [0, 0, 1, 1], [], []>} : vector<4x16xf32>, vector<16x64xf32>, vector<4x64xf32> -> vector<4x64xf32>
    %c5_38 = arith.constant 5 : index
    %c0_39 = arith.constant 0 : index
    %59 = vector.load %arg5[%c5_38, %c0_39] : memref<9x64xf32, #tpu.memory_space<vmem>>, vector<1x64xf32>
    %60 = vector.shape_cast %59 : vector<1x64xf32> to vector<64xf32>
    %61 = vector.shape_cast %60 : vector<64xf32> to vector<1x64xf32>
    %62 = vector.broadcast %61 : vector<1x64xf32> to vector<4x64xf32>
    %63 = arith.mulf %58, %62 : vector<4x64xf32>
    %64 = arith.addf %55, %63 : vector<4x64xf32>
    %c6 = arith.constant 6 : index
    %c0_40 = arith.constant 0 : index
    %c0_41 = arith.constant 0 : index
    %65 = vector.load %arg4[%c6, %c0_40, %c0_41] : memref<9x4x16xf32, #tpu.memory_space<vmem>>, vector<1x4x16xf32>
    %66 = vector.shape_cast %65 : vector<1x4x16xf32> to vector<4x16xf32>
    %cst_42 = arith.constant dense<0.000000e+00> : vector<4x64xf32>
    %67 = tpu.matmul %66, %9, %cst_42 {dimension_numbers = #tpu.dot_dimension_numbers<[1], [0], [0], [1], [0, 0, 1, 1], [], []>} : vector<4x16xf32>, vector<16x64xf32>, vector<4x64xf32> -> vector<4x64xf32>
    %c6_43 = arith.constant 6 : index
    %c0_44 = arith.constant 0 : index
    %68 = vector.load %arg5[%c6_43, %c0_44] : memref<9x64xf32, #tpu.memory_space<vmem>>, vector<1x64xf32>
    %69 = vector.shape_cast %68 : vector<1x64xf32> to vector<64xf32>
    %70 = vector.shape_cast %69 : vector<64xf32> to vector<1x64xf32>
    %71 = vector.broadcast %70 : vector<1x64xf32> to vector<4x64xf32>
    %72 = arith.mulf %67, %71 : vector<4x64xf32>
    %73 = arith.addf %64, %72 : vector<4x64xf32>
    %c7 = arith.constant 7 : index
    %c0_45 = arith.constant 0 : index
    %c0_46 = arith.constant 0 : index
    %74 = vector.load %arg4[%c7, %c0_45, %c0_46] : memref<9x4x16xf32, #tpu.memory_space<vmem>>, vector<1x4x16xf32>
    %75 = vector.shape_cast %74 : vector<1x4x16xf32> to vector<4x16xf32>
    %cst_47 = arith.constant dense<0.000000e+00> : vector<4x64xf32>
    %76 = tpu.matmul %75, %9, %cst_47 {dimension_numbers = #tpu.dot_dimension_numbers<[1], [0], [0], [1], [0, 0, 1, 1], [], []>} : vector<4x16xf32>, vector<16x64xf32>, vector<4x64xf32> -> vector<4x64xf32>
    %c7_48 = arith.constant 7 : index
    %c0_49 = arith.constant 0 : index
    %77 = vector.load %arg5[%c7_48, %c0_49] : memref<9x64xf32, #tpu.memory_space<vmem>>, vector<1x64xf32>
    %78 = vector.shape_cast %77 : vector<1x64xf32> to vector<64xf32>
    %79 = vector.shape_cast %78 : vector<64xf32> to vector<1x64xf32>
    %80 = vector.broadcast %79 : vector<1x64xf32> to vector<4x64xf32>
    %81 = arith.mulf %76, %80 : vector<4x64xf32>
    %82 = arith.addf %73, %81 : vector<4x64xf32>
    %c8 = arith.constant 8 : index
    %c0_50 = arith.constant 0 : index
    %c0_51 = arith.constant 0 : index
    %83 = vector.load %arg4[%c8, %c0_50, %c0_51] : memref<9x4x16xf32, #tpu.memory_space<vmem>>, vector<1x4x16xf32>
    %84 = vector.shape_cast %83 : vector<1x4x16xf32> to vector<4x16xf32>
    %cst_52 = arith.constant dense<0.000000e+00> : vector<4x64xf32>
    %85 = tpu.matmul %84, %9, %cst_52 {dimension_numbers = #tpu.dot_dimension_numbers<[1], [0], [0], [1], [0, 0, 1, 1], [], []>} : vector<4x16xf32>, vector<16x64xf32>, vector<4x64xf32> -> vector<4x64xf32>
    %c8_53 = arith.constant 8 : index
    %c0_54 = arith.constant 0 : index
    %86 = vector.load %arg5[%c8_53, %c0_54] : memref<9x64xf32, #tpu.memory_space<vmem>>, vector<1x64xf32>
    %87 = vector.shape_cast %86 : vector<1x64xf32> to vector<64xf32>
    %88 = vector.shape_cast %87 : vector<64xf32> to vector<1x64xf32>
    %89 = vector.broadcast %88 : vector<1x64xf32> to vector<4x64xf32>
    %90 = arith.mulf %85, %89 : vector<4x64xf32>
    %91 = arith.addf %82, %90 : vector<4x64xf32>
    %c0_55 = arith.constant 0 : index
    %c0_56 = arith.constant 0 : index
    %92 = vector.load %arg6[%c0_55, %c0_56] : memref<1x64xf32, #tpu.memory_space<vmem>>, vector<1x64xf32>
    %93 = vector.broadcast %92 : vector<1x64xf32> to vector<4x64xf32>
    %94 = arith.addf %91, %93 : vector<4x64xf32>
    %cst_57 = arith.constant 0.000000e+00 : f32
    %95 = vector.broadcast %cst_57 : f32 to vector<4x64xf32>
    %96 = arith.maximumf %94, %95 : vector<4x64xf32>
    %97 = arith.truncf %96 : vector<4x64xf32> to vector<4x64xbf16>
    %c0_58 = arith.constant 0 : index
    %c0_59 = arith.constant 0 : index
    %98 = vector.load %arg7[%c0_58, %c0_59] : memref<64x256xbf16, #tpu.memory_space<vmem>>, vector<64x256xbf16>
    %cst_60 = arith.constant dense<0.000000e+00> : vector<4x256xf32>
    %99 = tpu.matmul %97, %98, %cst_60 {dimension_numbers = #tpu.dot_dimension_numbers<[1], [0], [0], [1], [0, 0, 1, 1], [], []>} : vector<4x64xbf16>, vector<64x256xbf16>, vector<4x256xf32> -> vector<4x256xf32>
    %c0_61 = arith.constant 0 : index
    %c0_62 = arith.constant 0 : index
    %100 = vector.load %arg8[%c0_61, %c0_62] : memref<1x256xf32, #tpu.memory_space<vmem>>, vector<1x256xf32>
    %101 = vector.broadcast %100 : vector<1x256xf32> to vector<4x256xf32>
    %102 = arith.addf %99, %101 : vector<4x256xf32>
    %c4_63 = arith.constant 4 : index
    %c0_64 = arith.constant 0 : index
    %c0_65 = arith.constant 0 : index
    %103 = vector.load %arg4[%c4_63, %c0_64, %c0_65] : memref<9x4x16xf32, #tpu.memory_space<vmem>>, vector<1x4x16xf32>
    %104 = vector.shape_cast %103 : vector<1x4x16xf32> to vector<4x16xf32>
    %cst_66 = arith.constant dense<0.000000e+00> : vector<4x128xf32>
    %105 = tpu.matmul %104, %1, %cst_66 {dimension_numbers = #tpu.dot_dimension_numbers<[1], [0], [0], [1], [0, 0, 1, 1], [], []>} : vector<4x16xf32>, vector<16x128xf32>, vector<4x128xf32> -> vector<4x128xf32>
    %106 = arith.truncf %105 : vector<4x128xf32> to vector<4x128xbf16>
    %c0_67 = arith.constant 0 : index
    %c0_68 = arith.constant 0 : index
    %107 = vector.load %arg9[%c0_67, %c0_68] : memref<128x256xbf16, #tpu.memory_space<vmem>>, vector<128x256xbf16>
    %cst_69 = arith.constant dense<0.000000e+00> : vector<4x256xf32>
    %108 = tpu.matmul %106, %107, %cst_69 {dimension_numbers = #tpu.dot_dimension_numbers<[1], [0], [0], [1], [0, 0, 1, 1], [], []>} : vector<4x128xbf16>, vector<128x256xbf16>, vector<4x256xf32> -> vector<4x256xf32>
    %c0_70 = arith.constant 0 : index
    %c0_71 = arith.constant 0 : index
    %109 = vector.load %arg10[%c0_70, %c0_71] : memref<1x256xf32, #tpu.memory_space<vmem>>, vector<1x256xf32>
    %110 = vector.broadcast %109 : vector<1x256xf32> to vector<4x256xf32>
    %111 = arith.addf %108, %110 : vector<4x256xf32>
    %112 = arith.addf %111, %102 : vector<4x256xf32>
    %cst_72 = arith.constant 0.000000e+00 : f32
    %113 = vector.broadcast %cst_72 : f32 to vector<4x256xf32>
    %114 = arith.maximumf %112, %113 : vector<4x256xf32>
    %115 = vector.shape_cast %114 : vector<4x256xf32> to vector<1x2x2x256xf32>
    %c0_73 = arith.constant 0 : index
    %c0_74 = arith.constant 0 : index
    %c0_75 = arith.constant 0 : index
    %c0_76 = arith.constant 0 : index
    %116 = vector.load %arg11[%c0_73, %c0_74, %c0_75, %c0_76] : memref<1x2x2x256xf32, #tpu.memory_space<vmem>>, vector<1x2x2x256xf32>
    tpu.vector_store %arg11[%c0_73, %c0_74, %c0_75, %c0_76], %115 {strides = array<i32>} : memref<1x2x2x256xf32, #tpu.memory_space<vmem>>, vector<1x2x2x256xf32>,
    return
  }
  func.func @transform_0(%arg0: i32) -> (i32, i32, i32, i32) {
    %c0_i32 = arith.constant 0 : i32
    %c0_i32_0 = arith.constant 0 : i32
    %c0_i32_1 = arith.constant 0 : i32
    %c0_i32_2 = arith.constant 0 : i32
    return %arg0, %c0_i32, %c0_i32_0, %c0_i32_1 : i32, i32, i32, i32
  }
  func.func @transform_1(%arg0: i32) -> (i32, i32) {
    %c0_i32 = arith.constant 0 : i32
    %c0_i32_0 = arith.constant 0 : i32
    %c0_i32_1 = arith.constant 0 : i32
    return %c0_i32, %c0_i32_0 : i32, i32
  }
  func.func @transform_2(%arg0: i32) -> (i32, i32) {
    %c0_i32 = arith.constant 0 : i32
    %c0_i32_0 = arith.constant 0 : i32
    %c0_i32_1 = arith.constant 0 : i32
    return %c0_i32, %c0_i32_0 : i32, i32
  }
  func.func @transform_3(%arg0: i32) -> (i32, i32, i32) {
    %c0_i32 = arith.constant 0 : i32
    %c0_i32_0 = arith.constant 0 : i32
    %c0_i32_1 = arith.constant 0 : i32
    %c0_i32_2 = arith.constant 0 : i32
    return %c0_i32, %c0_i32_0, %c0_i32_1 : i32, i32, i32
  }
  func.func @transform_4(%arg0: i32) -> (i32, i32) {
    %c0_i32 = arith.constant 0 : i32
    %c0_i32_0 = arith.constant 0 : i32
    %c0_i32_1 = arith.constant 0 : i32
    return %c0_i32, %c0_i32_0 : i32, i32
  }
  func.func @transform_5(%arg0: i32) -> (i32, i32) {
    %c0_i32 = arith.constant 0 : i32
    %c0_i32_0 = arith.constant 0 : i32
    %c0_i32_1 = arith.constant 0 : i32
    return %c0_i32, %c0_i32_0 : i32, i32
  }
  func.func @transform_6(%arg0: i32) -> (i32, i32) {
    %c0_i32 = arith.constant 0 : i32
    %c0_i32_0 = arith.constant 0 : i32
    %c0_i32_1 = arith.constant 0 : i32
    return %c0_i32, %c0_i32_0 : i32, i32
  }
  func.func @transform_7(%arg0: i32) -> (i32, i32) {
    %c0_i32 = arith.constant 0 : i32
    %c0_i32_0 = arith.constant 0 : i32
    %c0_i32_1 = arith.constant 0 : i32
    return %c0_i32, %c0_i32_0 : i32, i32
  }
  func.func @transform_8(%arg0: i32) -> (i32, i32) {
    %c0_i32 = arith.constant 0 : i32
    %c0_i32_0 = arith.constant 0 : i32
    %c0_i32_1 = arith.constant 0 : i32
    return %c0_i32, %c0_i32_0 : i32, i32
  }
  func.func @transform_9(%arg0: i32) -> (i32, i32) {
    %c0_i32 = arith.constant 0 : i32
    %c0_i32_0 = arith.constant 0 : i32
    %c0_i32_1 = arith.constant 0 : i32
    return %c0_i32, %c0_i32_0 : i32, i32
  }
  func.func @transform_10(%arg0: i32) -> (i32, i32, i32, i32) {
    %c0_i32 = arith.constant 0 : i32
    %c0_i32_0 = arith.constant 0 : i32
    %c0_i32_1 = arith.constant 0 : i32
    %c0_i32_2 = arith.constant 0 : i32
    return %arg0, %c0_i32, %c0_i32_0, %c0_i32_1 : i32, i32, i32, i32
  }
}

module attributes {stable_mosaic.version = 11 : i64} {
  func.func @_head_kernel(%arg0: memref<2x4x256xf32, #tpu.memory_space<vmem>>, %arg1: memref<256x10xbf16, #tpu.memory_space<vmem>>, %arg2: memref<1x10xf32, #tpu.memory_space<vmem>>, %arg3: memref<2x10xf32, #tpu.memory_space<vmem>>) attributes {dimension_semantics = [], scalar_prefetch = 0 : i64, scratch_operands = 0 : i64, tpu.core_type = #tpu.core_type<tc>} {
    %c0 = arith.constant 0 : index
    %c0_0 = arith.constant 0 : index
    %c0_1 = arith.constant 0 : index
    %0 = vector.load %arg0[%c0, %c0_0, %c0_1] : memref<2x4x256xf32, #tpu.memory_space<vmem>>, vector<2x4x256xf32>
    %cst = arith.constant dense<0.000000e+00> : vector<2x256xf32>
    %1 = vector.multi_reduction <add>, %0, %cst [1] : vector<2x4x256xf32> to vector<2x256xf32>
    %cst_2 = arith.constant 4.000000e+00 : f32
    %2 = vector.broadcast %cst_2 : f32 to vector<2x256xf32>
    %3 = arith.divf %1, %2 : vector<2x256xf32>
    %4 = arith.truncf %3 : vector<2x256xf32> to vector<2x256xbf16>
    %c0_3 = arith.constant 0 : index
    %c0_4 = arith.constant 0 : index
    %5 = vector.load %arg1[%c0_3, %c0_4] : memref<256x10xbf16, #tpu.memory_space<vmem>>, vector<256x10xbf16>
    %cst_5 = arith.constant dense<0.000000e+00> : vector<2x10xf32>
    %6 = tpu.matmul %4, %5, %cst_5 {dimension_numbers = #tpu.dot_dimension_numbers<[1], [0], [0], [1], [0, 0, 1, 1], [], []>} : vector<2x256xbf16>, vector<256x10xbf16>, vector<2x10xf32> -> vector<2x10xf32>
    %c0_6 = arith.constant 0 : index
    %c0_7 = arith.constant 0 : index
    %7 = vector.load %arg2[%c0_6, %c0_7] : memref<1x10xf32, #tpu.memory_space<vmem>>, vector<1x10xf32>
    %8 = vector.broadcast %7 : vector<1x10xf32> to vector<2x10xf32>
    %9 = arith.addf %6, %8 : vector<2x10xf32>
    %c0_8 = arith.constant 0 : index
    %c0_9 = arith.constant 0 : index
    %10 = vector.load %arg3[%c0_8, %c0_9] : memref<2x10xf32, #tpu.memory_space<vmem>>, vector<2x10xf32>
    tpu.vector_store %arg3[%c0_8, %c0_9], %9 {strides = array<i32>} : memref<2x10xf32, #tpu.memory_space<vmem>>, vector<2x10xf32>,
    return
  }
}

</mosaic_0001>

<bundles_post_ra>
// kernel: robust_resnet_forward.6
= control target key start
LH: loop header
LB: loop body
LE: loop exit
PB: predicated region body
PF: predicated region fallthrough
CT: control target
= control target key end

     0   :  { %s2520_s21 = smov 0   ;;  %s2884_s0 = inlined_call_operand.vmem [shape: f32[2,4,4,768], index: 0, kind: input, shape index: {}]   ;;  %s2885_s1 = inlined_call_operand.vmem [shape: bf16[768,8], index: 1, kind: input, shape index: {}]   ;;  %s2886_s2 = inlined_call_operand.vmem [shape: f32[1,8], index: 2, kind: input, shape index: {}, may-alias: {2,4,7}]   ;;  %s2887_s3 = inlined_call_operand.vmem [shape: bf16[8,8], index: 3, kind: input, shape index: {}]   ;;  %s2888_s4 = inlined_call_operand.vmem [shape: f32[1,8], index: 4, kind: input, shape index: {}, may-alias: {2,4,7}]   ;;  %s2889_s5 = inlined_call_operand.vmem [shape: f32[9,16,16], index: 5, kind: input, shape index: {}]   ;;  %s2890_s6 = inlined_call_operand.vmem [shape: f32[9,8], index: 6, kind: input, shape index: {}]   ;;  %s2891_s7 = inlined_call_operand.vmem [shape: f32[1,8], index: 7, kind: input, shape index: {}, may-alias: {2,4,7}]   ;;  %s2892_s8 = inlined_call_operand.vmem [shape: bf16[8,32], index: 8, kind: input, shape index: {}]   ;;  %s2893_s9 = inlined_call_operand.vmem [shape: f32[1,32], index: 9, kind: input, shape index: {}, may-alias: {9,11}]   ;;  %s2894_s10 = inlined_call_operand.vmem [shape: bf16[8,32], index: 10, kind: input, shape index: {}]   ;;  %s2895_s11 = inlined_call_operand.vmem [shape: f32[1,32], index: 11, kind: input, shape index: {}, may-alias: {9,11}]   ;;  %s2896_s12 = inlined_call_operand.vmem [shape: f32[2,4,4,32], index: 12, kind: output, shape index: {}]  }
   0x1 LB: > { %s2069_s22 = sadd.s32 4294967295, %s2451_s21   ;;  %p2073_p0 = scmp.ge.s32.totalorder %s2451_s21, 1  ;;  %s2451_s21 = sphi %s2520_s21, %s22_s21  }
   0x2   : > { %p362_p1 = scmp.lt.s32.totalorder %s2451_s21, 3 }
   0x4   : > { %p363_p2 = pnand %p2073_p0, %p362_p1 }
   0x5   : > { %p404_p3 = scmp.lt.s32.totalorder (!%p363_p2), %s2069_s22, 1 }
   0x6   : > { %366 = sbr.rel (%p363_p2) target bundleno = 926 (0x39e), region = 68 }
   0xb   : > { %v2379_v0 = vld [vmem:[%s2885_s1 + $0x78] sm:$0xff]   ;;  %v2383_v4 = vld [vmem:[%s2885_s1 + $0x70] sm:$0xff]   ;;  %v2387_v8 = vld [vmem:[%s2885_s1 + $0x68] sm:$0xff]   ;;  %s2898_s22 = smov (!%p404_p3, %s2069_s22), 1  ;;  %vm996_vm0 = vcmask 1043456   ;;  %vm2454_vm1 = vmmov 0  }
   0xc   : > { %v2380_v1 = vld [vmem:[%s2885_s1 + $0x38] sm:$0xff]   ;;  %2179 = vmatprep.subr.bf16.mxu0 %v2379_v0  ;;  %v2384_v5 = vld [vmem:[%s2885_s1 + $0x30] sm:$0xff]   ;;  %v2388_v9 = vld [vmem:[%s2885_s1 + $0x28] sm:$0xff]   ;;  %s2368_s27 = smul.u32 96, %s2898_s22  ;;  %vm992_vm2 = vcmask 64512   ;;  %vm1045_vm3 = vcmask 130048  }
   0xd   : > { %v2381_v2 = vld [vmem:[%s2885_s1 + $0xf8] sm:$0xff]   ;;  %2180 = vmatpush3.bf16.msra.mxu0 %v2380_v1  ;;  %v2385_v6 = vld [vmem:[%s2885_s1 + $0xf0] sm:$0xff]   ;;  %v2389_v10 = vld [vmem:[%s2885_s1 + $0xe8] sm:$0xff]   ;;  %s2178_s16 = sshll.u32 %s2898_s22, 4  ;;  %vm2009_vm4 = vcmask 257024  }
   0xe   : > { %v2382_v3 = vld [vmem:[%s2885_s1 + $0xb8] sm:$0xff]   ;;  %2201 = vmatprep.subr.bf16.mxu1 %v2381_v2  ;;  %2181 = vmatprep.subr.bf16.mxu0 %v2383_v4  ;;  %v2386_v7 = vld [vmem:[%s2885_s1 + $0xb0] sm:$0xff]   ;;  %v2390_v11 = vld [vmem:[%s2885_s1 + $0xa8] sm:$0xff]   ;;  %s2628_s20 = scalar_lea.vmem %s2884_s0, %s2368_s27  ;;  %s413_s19 = scalar_lea.vmem %s2896_s12, %s2178_s16 }
   0xf   : > { %2202 = vmatpush3.bf16.msra.mxu1 %v2382_v3  ;;  %v2391_v12 = vld [vmem:[%s2885_s1 + $0x60] sm:$0xff]   ;;  %v2395_v16 = vld [vmem:[%s2885_s1 + $0x58] sm:$0xff]   ;;  %v2399_v20 = vld [vmem:[%s2885_s1 + $0x50] sm:$0xff]   ;;  %v2453_v3 = vmov 0.0  }
  0x10   : > { %2203 = vmatprep.subr.bf16.mxu1 %v2385_v6  ;;  %v2392_v13 = vld [vmem:[%s2885_s1 + $0x20] sm:$0xff]   ;;  %v2396_v17 = vld [vmem:[%s2885_s1 + $0x18] sm:$0xff]   ;;  %v2400_v21 = vld [vmem:[%s2885_s1 + $0x10] sm:$0xff]  }
  0x11   : > { %2182 = vmatpush3.bf16.msra.mxu0 %v2384_v5  ;;  %v2393_v14 = vld [vmem:[%s2885_s1 + $0xe0] sm:$0xff]   ;;  %v2397_v18 = vld [vmem:[%s2885_s1 + $0xd8] sm:$0xff]   ;;  %v2401_v22 = vld [vmem:[%s2885_s1 + $0xd0] sm:$0xff]  }
  0x12   : > { %2183 = vmatprep.subr.bf16.mxu0 %v2387_v8  ;;  %v2394_v15 = vld [vmem:[%s2885_s1 + $0xa0] sm:$0xff]   ;;  %v2398_v19 = vld [vmem:[%s2885_s1 + $0x98] sm:$0xff]   ;;  %v2402_v23 = vld [vmem:[%s2885_s1 + $0x90] sm:$0xff]  }
  0x13   : > { %2204 = vmatpush3.bf16.msra.mxu1 %v2386_v7  ;;  %v2403_v24 = vld [vmem:[%s2885_s1 + $0x48] sm:$0xff]   ;;  %v2407_v28 = vld [vmem:[%s2885_s1 + $0x40] sm:$0xff]   ;;  %v2417_v38 = vld [vmem:[%s2885_s1 + $0x178] sm:$0xff]  }
  0x14   : > { %2205 = vmatprep.subr.bf16.mxu1 %v2389_v10  ;;  %v2404_v25 = vld [vmem:[%s2885_s1 + $0x8] sm:$0xff]   ;;  %v2408_v29 = vld [vmem:[%s2885_s1] sm:$0xff]   ;;  %v2421_v41 = vld [vmem:[%s2628_s20 + $0x38] ss:$24 sps:$4 sm:$0xff]  }
  0x15   : > { %2184 = vmatpush3.bf16.msra.mxu0 %v2388_v9  ;;  %v2405_v26 = vld [vmem:[%s2885_s1 + $0xc8] sm:$0xff]   ;;  %v2409_v30 = vld [vmem:[%s2885_s1 + $0xc0] sm:$0xff]   ;;  %v2423_v42 = vld [vmem:[%s2628_s20 + $0x3c] ss:$24 sps:$4 sm:$0xff]  }
  0x16   : > { %2185 = vmatprep.subr.bf16.mxu0 %v2391_v12  ;;  %v2406_v27 = vld [vmem:[%s2885_s1 + $0x88] sm:$0xff]   ;;  %v2410_v31 = vld [vmem:[%s2628_s20] ss:$24 sps:$4 sm:$0xff]   ;;  %v2412_v32 = vld [vmem:[%s2628_s20 + $0x4] ss:$24 sps:$4 sm:$0xff]  }
  0x17   : > { %2206 = vmatpush3.bf16.msra.mxu1 %v2390_v11  ;;  %v2413_v33 = vld [vmem:[%s2628_s20 + $0x30] ss:$24 sps:$4 sm:$0xff]   ;;  %v2415_v34 = vld [vmem:[%s2628_s20 + $0x34] ss:$24 sps:$4 sm:$0xff]   ;;  %v2416_v35 = vld [vmem:[%s2885_s1 + $0x80] sm:$0xff]  }
  0x18   : > { %2207 = vmatprep.subr.bf16.mxu1 %v2393_v14  ;;  %v464_v36 = vpack.c.bf16 %v2415_v34, %v2412_v32  ;;  %v463_v37 = vpack.c.bf16 %v2413_v33, %v2410_v31  ;;  %v2418_v39 = vld [vmem:[%s2628_s20 + $0x8] ss:$24 sps:$4 sm:$0xff]   ;;  %v2420_v40 = vld [vmem:[%s2628_s20 + $0xc] ss:$24 sps:$4 sm:$0xff]   ;;  %v2424_v43 = vld [vmem:[%s2885_s1 + $0x138] sm:$0xff]  }
  0x19   : > { %2186 = vmatpush3.bf16.msra.mxu0 %v2392_v13  ;;  %v465_v44 = vpack.c.bf16 %v2421_v41, %v2418_v39  ;;  %v466_v45 = vpack.c.bf16 %v2423_v42, %v2420_v40  ;;  %v2425_v46 = vld [vmem:[%s2885_s1 + $0x170] sm:$0xff]   ;;  %v2427_v48 = vld [vmem:[%s2885_s1 + $0x168] sm:$0xff]   ;;  %v2429_v50 = vld [vmem:[%s2885_s1 + $0x160] sm:$0xff]  }
  0x1a   : > { %2187 = vmatprep.subr.bf16.mxu0 %v2395_v16  ;;  %892 = vmatprep.mubr.bf16.mxu0 %v464_v36  ;;  %v2426_v47 = vld [vmem:[%s2885_s1 + $0x130] sm:$0xff]   ;;  %v2428_v49 = vld [vmem:[%s2885_s1 + $0x128] sm:$0xff]   ;;  %v2430_v51 = vld [vmem:[%s2885_s1 + $0x120] sm:$0xff]  }
  0x1b   : > { %2208 = vmatpush3.bf16.msra.mxu1 %v2394_v15  ;;  %933 = vmatprep.mubr.bf16.mxu1 %v466_v45  ;;  %v2431_v52 = vld [vmem:[%s2885_s1 + $0x158] sm:$0xff]   ;;  %v2433_v54 = vld [vmem:[%s2885_s1 + $0x150] sm:$0xff]   ;;  %v2435_v59 = vld [vmem:[%s2885_s1 + $0x148] sm:$0xff]  }
  0x1c   : > { %2209 = vmatprep.subr.bf16.mxu1 %v2397_v18  ;;  %v2432_v53 = vld [vmem:[%s2885_s1 + $0x118] sm:$0xff]   ;;  %v2441_v55 = vld [vmem:[%s2628_s20 + $0x14] ss:$24 sps:$4 sm:$0xff]   ;;  %v2437_v61 = vld [vmem:[%s2885_s1 + $0x140] sm:$0xff]  }
  0x1d   : > { %2188 = vmatpush3.bf16.msra.mxu0 %v2396_v17  ;;  %v2444_v56 = vld [vmem:[%s2628_s20 + $0x44] ss:$24 sps:$4 sm:$0xff]   ;;  %v2434_v57 = vld [vmem:[%s2885_s1 + $0x110] sm:$0xff]   ;;  %v2436_v60 = vld [vmem:[%s2885_s1 + $0x108] sm:$0xff]  }
  0x1e   : > { %2189 = vmatprep.subr.bf16.mxu0 %v2399_v20  ;;  %v468_v58 = vpack.c.bf16 %v2444_v56, %v2441_v55  ;;  %v2439_v62 = vld [vmem:[%s2628_s20 + $0x10] ss:$24 sps:$4 sm:$0xff]   ;;  %v2442_v63 = vld [vmem:[%s2628_s20 + $0x40] ss:$24 sps:$4 sm:$0xff]  }
  0x1f   : > { %2210 = vmatpush3.bf16.msra.mxu1 %v2398_v19  ;;  %v2438_v0 = vld [vmem:[%s2885_s1 + $0x100] sm:$0xff]   ;;  %v467_v1 = vpack.c.bf16 %v2442_v63, %v2439_v62  ;;  %v1044_v42 = vld [vmem:[%s2889_s5 + $0x8] sm:$0xff]  ;;  %v2151_v56 = vld [vmem:[%s2889_s5 + $0x50] sm:$0xff] }
  0x20   : > { %2211 = vmatprep.subr.bf16.mxu1 %v2401_v22  ;;  %v984_v2 = vld [vmem:[%s2887_s3] sm:$0xf]  ;;  %v2147_v55 = vld [vmem:[%s2889_s5 + $0x48] sm:$0xff] }
  0x21   : > { %2190 = vmatpush3.bf16.msra.mxu0 %v2400_v21  ;;  %v998_v4 = vsel %vm996_vm0, %v984_v2, 0  ;;  %v2077_v14 = vld [vmem:[%s2886_s2] ss:$0 sm:$0xff] }
  0x22   : > { %2191 = vmatprep.subr.bf16.mxu0 %v2403_v24  ;;  %v1043_v31 = vld [vmem:[%s2889_s5] sm:$0xff] }
  0x23   : > { %2212 = vmatpush3.bf16.msra.mxu1 %v2402_v23  ;;  %v2156_v32 = vld [vmem:[%s2889_s5 + $0x60] sm:$0xff] }
  0x24   : > { %2213 = vmatprep.subr.bf16.mxu1 %v2405_v26  ;;  %v2126_v34 = vld [vmem:[%s2888_s4] ss:$0 sm:$0xff] }
  0x25   : > { %2192 = vmatpush3.bf16.msra.mxu0 %v2404_v25  ;;  %v2166_v45 = vld [vmem:[%s2889_s5 + $0x80] sm:$0xff] }
  0x26   : > { %2193 = vmatprep.subr.bf16.mxu0 %v2407_v28 }
  0x27   : > { %2214 = vmatpush3.bf16.msra.mxu1 %v2406_v27 }
  0x28   : > { %2215 = vmatprep.subr.bf16.mxu1 %v2409_v30 }
  0x29   : > { %2194 = vmatpush3.bf16.msra.mxu0 %v2408_v29 }
  0x2a   : > { %2223 = vmatprep.subr.bf16.mxu0 %v2417_v38 }
  0x2b   : > { %2216 = vmatpush3.bf16.msra.mxu1 %v2416_v35 }
  0x2c   : > { %893 = vmatmul.mubr.bf16.vlgmr.msra.gmra.mxu0 %v463_v37  ;;  %2287 = vmatprep.subr.bf16.mxu1 %v2453_v3 }
  0x2d   : > { %2224 = vmatpush3.bf16.msra.mxu0 %v2424_v43  ;;  %974 = vmatprep.mubr.bf16.mxu0 %v468_v58  ;;  %v2157_v43 = vld [vmem:[%s2889_s5 + $0x68] sm:$0xff]  ;;  %v2161_v58 = vld [vmem:[%s2889_s5 + $0x70] sm:$0xff] }
  0x2e   : > { %2225 = vmatprep.subr.bf16.mxu0 %v2425_v46  ;;  %934 = vmatmul.mubr.bf16.vlgmr.msra.gmra.mxu1 %v465_v44  ;;  %v2131_v44 = vld [vmem:[%s2889_s5 + $0x10] sm:$0xff]  ;;  %v1947_v46 = vld [vmem:[%s2894_s10] sm:$0xf] }
  0x2f   : > { %2288 = vmatpush3.bf16.msra.mxu1 %v998_v4  ;;  %2289 = vmatprep.mubr.msk.bf16.mxu1 %vm2454_vm1, %v2453_v3 }
  0x31   : > { %2226 = vmatpush3.bf16.msra.mxu0 %v2426_v47  ;;  %v2132_v47 = vld [vmem:[%s2889_s5 + $0x18] sm:$0xff] }
  0x32   : > { %2227 = vmatprep.subr.bf16.mxu0 %v2427_v48  ;;  %v2167_v48 = vld [vmem:[%s2889_s5 + $0x88] sm:$0xff] }
  0x35   : > { %2228 = vmatpush3.bf16.msra.mxu0 %v2428_v49  ;;  %v1956_v49 = vsel %vm996_vm0, %v1947_v46, 0 }
  0x36   : > { %2229 = vmatprep.subr.bf16.mxu0 %v2429_v50  ;;  %v2136_v50 = vld [vmem:[%s2889_s5 + $0x20] sm:$0xff] }
  0x39   : > { %2230 = vmatpush3.bf16.msra.mxu0 %v2430_v51  ;;  %v2137_v51 = vld [vmem:[%s2889_s5 + $0x28] sm:$0xff] }
  0x3a   : > { %2231 = vmatprep.subr.bf16.mxu0 %v2431_v52  ;;  %v2141_v52 = vld [vmem:[%s2889_s5 + $0x30] sm:$0xff] }
  0x3d   : > { %2232 = vmatpush3.bf16.msra.mxu0 %v2432_v53  ;;  %v2142_v53 = vld [vmem:[%s2889_s5 + $0x38] sm:$0xff] }
  0x3e   : > { %2233 = vmatprep.subr.bf16.mxu0 %v2433_v54  ;;  %v2146_v54 = vld [vmem:[%s2889_s5 + $0x40] sm:$0xff] }
  0x41   : > { %2234 = vmatpush3.bf16.msra.mxu0 %v2434_v57  ;;  %v2152_v57 = vld [vmem:[%s2889_s5 + $0x58] sm:$0xff] }
  0x42   : > { %2235 = vmatprep.subr.bf16.mxu0 %v2435_v59  ;;  %v2162_v59 = vld [vmem:[%s2889_s5 + $0x78] sm:$0xff] }
  0x45   : > { %2236 = vmatpush3.bf16.msra.mxu0 %v2436_v60  ;;  %v1892_v60 = vld [vmem:[%s2892_s8] sm:$0xf] }
  0x46   : > { %2237 = vmatprep.subr.bf16.mxu0 %v2437_v61  ;;  %v1904_v61 = vsel %vm996_vm0, %v1892_v60, 0 }
  0x49   : > { %2238 = vmatpush3.bf16.msra.mxu0 %v2438_v0 }
  0x4c   : > { %975 = vmatmul.mubr.bf16.vlgmr.msra.gmra.mxu0 %v467_v1 }
  0x4d   : > { %2339 = vmatprep.mubr.msk.f32.mxu0 %vm1045_vm3, %v2156_v32  ;;  %v2160_v32 = vld [vmem:[%s2890_s6 + $0x6] ss:$0 sm:$0xff] }
  0xec   : > { %v2195_v5 = vpop.f32.mrf.mxu0 }
  0xee   : > { %v2196_v6 = vpop.f32.mrf.mxu0  ;;  %v2217_v7 = vpop.f32.mrf.mxu1 }
  0xef   : > { %v2197_v12 = vadd.f32 %v2196_v6, %v2195_v5 }
  0xf0   : > { %v2198_v8 = vpop.f32.mrf.mxu0  ;;  %v2218_v9 = vpop.f32.mrf.mxu1 }
  0xf1   : > { %v895_v18 = vadd.f32 %v2197_v12, %v2077_v14  ;;  %v2219_v19 = vadd.f32 %v2218_v9, %v2217_v7  ;;  %v2135_v7 = vld [vmem:[%s2890_s6 + $0x1] ss:$0 sm:$0xff]  ;;  %v2130_v9 = vld [vmem:[%s2890_s6] ss:$0 sm:$0xff] }
  0xf2   : > { %v2199_v10 = vpop.f32.mrf.mxu0  ;;  %v2220_v11 = vpop.f32.mrf.mxu1 }
  0xf3   : > { %v2200_v13 = vadd.f32 %v2199_v10, %v2198_v8  ;;  %v936_v25 = vadd.f32 %v2219_v19, %v895_v18  ;;  %v2140_v10 = vld [vmem:[%s2890_s6 + $0x2] ss:$0 sm:$0xff] }
  0xf4   : > { %v2221_v15 = vpop.f32.mrf.mxu1 }
  0xf5   : > { %v898_v20 = vadd.f32 %v2200_v13, %v2077_v14  ;;  %v2222_v21 = vadd.f32 %v2221_v15, %v2220_v11  ;;  %v2145_v15 = vld [vmem:[%s2890_s6 + $0x3] ss:$0 sm:$0xff] }
  0xf7   : > { %v939_v26 = vadd.f32 %v2222_v21, %v898_v20  ;;  %v2150_v21 = vld [vmem:[%s2890_s6 + $0x4] ss:$0 sm:$0xff] }
 0x10c   : > { %v2239_v16 = vpop.f32.mrf.mxu0 }
 0x10e   : > { %v2240_v17 = vpop.f32.mrf.mxu0 }
 0x10f   : > { %v2241_v23 = vadd.f32 %v2240_v17, %v2239_v16 }
 0x110   : > { %v2242_v22 = vpop.f32.mrf.mxu0 }
 0x111   : > { %v977_v28 = vadd.f32 %v2241_v23, %v936_v25 }
 0x112   : > { %v2243_v24 = vpop.f32.mrf.mxu0 }
 0x113   : > { %v2244_v27 = vadd.f32 %v2243_v24, %v2242_v22 }
 0x115   : > { %v980_v29 = vadd.f32 %v2244_v27, %v939_v26 }
 0x117   : > { %v983_v30 = vpack.c.bf16 %v980_v29, %v977_v28 }
 0x119   : > { %2290 = vmatmul.mubr.msk.bf16.vlgmr.msra.gmra.mxu1 %vm992_vm2, %v983_v30 }
 0x11a   : > { %2297 = vmatprep.mubr.msk.f32.mxu1 %vm1045_vm3, %v1043_v31 }
 0x1d9   : > { %v1034_v33 = vpop.f32.mrf.mxu1 }
 0x1da   : > { %v1035_v37 = vadd.f32 %v2126_v34, %v1034_v33 }
 0x1db   : > { %v2291_v35 = vpop.f32.mrf.mxu1 }
 0x1dc   : > { %v2720_v41 = vmax.f32 %v1035_v37, 0.0 }
 0x1dd   : > { %v1037_v36 = vpop.f32.mrf.mxu1 }
 0x1de   : > { %v1038_v38 = vadd.f32 %v2126_v34, %v1037_v36  ;;  %v2155_v34 = vld [vmem:[%s2890_s6 + $0x5] ss:$0 sm:$0xff] }
 0x1df   : > { %v2292_v39 = vpop.f32.mrf.mxu1 }
 0x1e0   : > { %v2718_v40 = vmax.f32 %v1038_v38, 0.0 }
 0x1e2   : > { %2293 = vmatprep.subr.mxu1 %v2718_v40  ;;  %2335 = vmatprep.subr.mxu0 %v2718_v40 }
 0x1e3   : > { %2294 = vmatpush3.msra.mxu1 %v2718_v40  ;;  %2336 = vmatpush3.msra.mxu0 %v2718_v40 }
 0x1e4   : > { %2295 = vmatprep.subr.mxu1 %v2720_v41  ;;  %2337 = vmatprep.subr.mxu0 %v2720_v41 }
 0x1e5   : > { %2296 = vmatpush3.msra.mxu1 %v2720_v41  ;;  %2338 = vmatpush3.msra.mxu0 %v2720_v41 }
 0x1e6   : > { %2298 = vmatmul.mubr.msk.f32.vlgmr.msra.gmra.mxu1 %vm1045_vm3, %v1044_v42  ;;  %2300 = vmatprep.subr.mxu1 %v2718_v40 }
 0x1e7   : > { %2340 = vmatmul.mubr.msk.f32.vlgmr.msra.gmra.mxu0 %vm1045_vm3, %v2157_v43  ;;  %2349 = vmatprep.subr.mxu0 %v2718_v40  ;;  %v2170_v43 = vld [vmem:[%s2890_s6 + $0x8] ss:$0 sm:$0xff] }
 0x1e8   : > { %2301 = vmatpush3.msra.mxu1 %v2718_v40  ;;  %2350 = vmatpush3.msra.mxu0 %v2718_v40 }
 0x1e9   : > { %2302 = vmatprep.subr.mxu1 %v2720_v41  ;;  %2351 = vmatprep.subr.mxu0 %v2720_v41 }
 0x1ea   : > { %2303 = vmatpush3.msra.mxu1 %v2720_v41  ;;  %2304 = vmatprep.mubr.msk.f32.mxu1 %vm1045_vm3, %v2131_v44 }
 0x1eb   : > { %2352 = vmatpush3.msra.mxu0 %v2720_v41  ;;  %2353 = vmatprep.mubr.msk.f32.mxu0 %vm1045_vm3, %v2166_v45  ;;  %v2165_v45 = vld [vmem:[%s2890_s6 + $0x7] ss:$0 sm:$0xff] }
 0x1ec   : > { %2305 = vmatmul.mubr.msk.f32.vlgmr.msra.gmra.mxu1 %vm1045_vm3, %v2132_v47  ;;  %2307 = vmatprep.subr.mxu1 %v2718_v40 }
 0x1ed   : > { %2354 = vmatmul.mubr.msk.f32.vlgmr.msra.gmra.mxu0 %vm1045_vm3, %v2167_v48  ;;  %2362 = vmatprep.subr.bf16.mxu0 %v2453_v3 }
 0x1ee   : > { %2308 = vmatpush3.msra.mxu1 %v2718_v40  ;;  %2363 = vmatpush3.bf16.msra.mxu0 %v1956_v49 }
 0x1ef   : > { %2309 = vmatprep.subr.mxu1 %v2720_v41  ;;  %2311 = vmatprep.mubr.msk.f32.mxu1 %vm1045_vm3, %v2136_v50 }
 0x1f0   : > { %2310 = vmatpush3.msra.mxu1 %v2720_v41  ;;  %2364 = vmatprep.mubr.msk.bf16.mxu0 %vm2454_vm1, %v2453_v3 }
 0x1f1   : > { %2312 = vmatmul.mubr.msk.f32.vlgmr.msra.gmra.mxu1 %vm1045_vm3, %v2137_v51  ;;  %2314 = vmatprep.subr.mxu1 %v2718_v40 }
 0x1f2   : > { %2365 = vmatmul.mubr.msk.bf16.vlgmr.msra.gmra.mxu0 %vm992_vm2, %v983_v30  ;;  %2315 = vmatpush3.msra.mxu1 %v2718_v40 }
 0x1f3   : > { %2316 = vmatprep.subr.mxu1 %v2720_v41  ;;  %2318 = vmatprep.mubr.msk.f32.mxu1 %vm1045_vm3, %v2141_v52 }
 0x1f4   : > { %2317 = vmatpush3.msra.mxu1 %v2720_v41 }
 0x1f5   : > { %2319 = vmatmul.mubr.msk.f32.vlgmr.msra.gmra.mxu1 %vm1045_vm3, %v2142_v53  ;;  %2321 = vmatprep.subr.mxu1 %v2718_v40 }
 0x1f6   : > { %2322 = vmatpush3.msra.mxu1 %v2718_v40  ;;  %2325 = vmatprep.mubr.msk.f32.mxu1 %vm1045_vm3, %v2146_v54 }
 0x1f7   : > { %2323 = vmatprep.subr.mxu1 %v2720_v41 }
 0x1f8   : > { %2324 = vmatpush3.msra.mxu1 %v2720_v41 }
 0x1f9   : > { %2326 = vmatmul.mubr.msk.f32.vlgmr.msra.gmra.mxu1 %vm1045_vm3, %v2147_v55  ;;  %2328 = vmatprep.subr.mxu1 %v2718_v40 }
 0x1fa   : > { %2329 = vmatpush3.msra.mxu1 %v2718_v40  ;;  %2332 = vmatprep.mubr.msk.f32.mxu1 %vm1045_vm3, %v2151_v56 }
 0x1fb   : > { %2330 = vmatprep.subr.mxu1 %v2720_v41 }
 0x1fc   : > { %2331 = vmatpush3.msra.mxu1 %v2720_v41 }
 0x1fd   : > { %2333 = vmatmul.mubr.msk.f32.vlgmr.msra.gmra.mxu1 %vm1045_vm3, %v2152_v57  ;;  %2342 = vmatprep.subr.mxu1 %v2718_v40 }
 0x1fe   : > { %2343 = vmatpush3.msra.mxu1 %v2718_v40  ;;  %2346 = vmatprep.mubr.msk.f32.mxu1 %vm1045_vm3, %v2161_v58 }
 0x1ff   : > { %2344 = vmatprep.subr.mxu1 %v2720_v41 }
 0x200   : > { %2345 = vmatpush3.msra.mxu1 %v2720_v41 }
 0x201   : > { %2347 = vmatmul.mubr.msk.f32.vlgmr.msra.gmra.mxu1 %vm1045_vm3, %v2162_v59  ;;  %2356 = vmatprep.subr.bf16.mxu1 %v2453_v3  ;;  %v2171_v59 = vld [vmem:[%s2891_s7] ss:$0 sm:$0xff] }
 0x202   : > { %2358 = vmatprep.mubr.msk.bf16.mxu1 %vm2454_vm1, %v2453_v3  ;;  %2357 = vmatpush3.bf16.msra.mxu1 %v1904_v61 }
 0x2a6   : > { %v2299_v62 = vpop.f32.mrf.mxu1 }
 0x2a7   : > { %v2341_v63 = vpop.f32.mrf.mxu0  ;;  %v1133_v16 = vmul.f32 %v2299_v62, %v2130_v9 }
 0x2a8   : > { %v1118_v0 = vpop.f32.mrf.mxu1  ;;  %v1691_v39 = vmul.f32 %v2341_v63, %v2160_v32 }
 0x2a9   : > { %v1676_v1 = vpop.f32.mrf.mxu0  ;;  %v1132_v22 = vmul.f32 %v2130_v9, %v1118_v0 }
 0x2aa   : > { %v1690_v49 = vmul.f32 %v2160_v32, %v1676_v1 }
 0x2ac   : > { %v2306_v2 = vpop.f32.mrf.mxu1 }
 0x2ad   : > { %v2355_v4 = vpop.f32.mrf.mxu0  ;;  %v1226_v12 = vmul.f32 %v2306_v2, %v2135_v7 }
 0x2ae   : > { %v1211_v5 = vpop.f32.mrf.mxu1  ;;  %v1877_v51 = vmul.f32 %v2355_v4, %v2170_v43 }
 0x2af   : > { %v1862_v6 = vpop.f32.mrf.mxu0  ;;  %v1225_v17 = vmul.f32 %v2135_v7, %v1211_v5  ;;  %v1228_v23 = vadd.f32 %v1226_v12, %v1133_v16  ;;  %v2174_v7 = vld [vmem:[%s2895_s11] ss:$0 sm:$0xff] }
 0x2b0   : > { %v1876_v60 = vmul.f32 %v2170_v43, %v1862_v6 }
 0x2b1   : > { %v2313_v3 = vpop.f32.mrf.mxu1  ;;  %v1227_v28 = vadd.f32 %v1225_v17, %v1132_v22 }
 0x2b2   : > { %v2840_v8 = vpop.f32.mrf.mxu0  ;;  %v1319_v18 = vmul.f32 %v2313_v3, %v2140_v10  ;;  %v2172_v3 = vld [vmem:[%s2893_s9] ss:$0 sm:$0xff] }
 0x2b3   : > { %v1304_v11 = vpop.f32.mrf.mxu1  ;;  %v1993_v6 = vadd.f32 %v2174_v7, %v2840_v8 }
 0x2b4   : > { %v2366_v13 = vpop.f32.mrf.mxu0  ;;  %v1318_v24 = vmul.f32 %v2140_v10, %v1304_v11  ;;  %v1321_v29 = vadd.f32 %v1319_v18, %v1228_v23 }
 0x2b5   : > { %v2320_v14 = vpop.f32.mrf.mxu1 }
 0x2b6   : > { %v1995_v19 = vpop.f32.mrf.mxu0  ;;  %v1412_v25 = vmul.f32 %v2320_v14, %v2145_v15  ;;  %v1320_v35 = vadd.f32 %v1318_v24, %v1227_v28 }
 0x2b7   : > { %v1397_v20 = vpop.f32.mrf.mxu1  ;;  %v1996_v14 = vadd.f32 %v2174_v7, %v1995_v19 }
 0x2b8   : > { %v2367_v26 = vpop.f32.mrf.mxu0  ;;  %v1411_v30 = vmul.f32 %v2145_v15, %v1397_v20  ;;  %v1414_v36 = vadd.f32 %v1412_v25, %v1321_v29 }
 0x2b9   : > { %v2327_v27 = vpop.f32.mrf.mxu1 }
 0x2ba   : > { %v1505_v31 = vmul.f32 %v2327_v27, %v2150_v21  ;;  %v1413_v40 = vadd.f32 %v1411_v30, %v1320_v35 }
 0x2bb   : > { %v1490_v33 = vpop.f32.mrf.mxu1 }
 0x2bc   : > { %v1504_v37 = vmul.f32 %v2150_v21, %v1490_v33  ;;  %v1507_v41 = vadd.f32 %v1505_v31, %v1414_v36 }
 0x2bd   : > { %v2334_v38 = vpop.f32.mrf.mxu1 }
 0x2be   : > { %v1598_v42 = vmul.f32 %v2334_v38, %v2155_v34  ;;  %v1506_v46 = vadd.f32 %v1504_v37, %v1413_v40 }
 0x2bf   : > { %v1583_v44 = vpop.f32.mrf.mxu1 }
 0x2c0   : > { %v1600_v47 = vadd.f32 %v1598_v42, %v1507_v41  ;;  %v1597_v48 = vmul.f32 %v2155_v34, %v1583_v44 }
 0x2c1   : > { %v2348_v50 = vpop.f32.mrf.mxu1 }
 0x2c2   : > { %v1599_v52 = vadd.f32 %v1597_v48, %v1506_v46  ;;  %v1693_v53 = vadd.f32 %v1691_v39, %v1600_v47  ;;  %v1784_v54 = vmul.f32 %v2348_v50, %v2165_v45 }
 0x2c3   : > { %v1769_v55 = vpop.f32.mrf.mxu1 }
 0x2c4   : > { %v1786_v56 = vadd.f32 %v1784_v54, %v1693_v53  ;;  %v1692_v57 = vadd.f32 %v1690_v49, %v1599_v52  ;;  %v1783_v58 = vmul.f32 %v2165_v45, %v1769_v55 }
 0x2c6   : > { %v1879_v61 = vadd.f32 %v1877_v51, %v1786_v56  ;;  %v1785_v62 = vadd.f32 %v1783_v58, %v1692_v57 }
 0x2c8   : > { %v1888_v63 = vadd.f32 %v2171_v59, %v1879_v61  ;;  %v1878_v0 = vadd.f32 %v1876_v60, %v1785_v62 }
 0x2ca   : > { %v1887_v1 = vadd.f32 %v2171_v59, %v1878_v0  ;;  %v1890_v2 = vmax.f32 %v1888_v63, 0.0 }
 0x2cc   : > { %v1889_v4 = vmax.f32 %v1887_v1, 0.0 }
 0x2ce   : > { %v1891_v5 = vpack.c.bf16 %v1890_v2, %v1889_v4 }
 0x2d0   : > { %2359 = vmatmul.mubr.msk.bf16.vlgmr.msra.gmra.mxu1 %vm992_vm2, %v1891_v5 }
 0x390   : > { %v1940_v9 = vpop.f32.mrf.mxu1 }
 0x391   : > { %v1941_v10 = vadd.f32 %v2172_v3, %v1940_v9 }
 0x392   : > { %v2360_v11 = vpop.f32.mrf.mxu1 }
 0x393   : > { %v1999_v12 = vadd.f32 %v1993_v6, %v1941_v10 }
 0x394   : > { %v1943_v13 = vpop.f32.mrf.mxu1 }
 0x395   : > { %v2001_v15 = vmax.f32 %v1999_v12, 0.0  ;;  %v1944_v16 = vadd.f32 %v2172_v3, %v1943_v13 }
 0x396   : > { %v2361_v17 = vpop.f32.mrf.mxu1 }
 0x397   : > { %v2005_v18 = vcombine.high %v2001_v15, %v2001_v15  ;;  %2010 = vst.msk [vmem:[%s413_s19] sm:$0xf] %vm2009_vm4, %v2001_v15  ;;  %v2000_v20 = vadd.f32 %v1996_v14, %v1944_v16 }
 0x399   : > { %2011 = vst.msk [vmem:[%s413_s19 + $0x4] sm:$0xf] %vm2009_vm4, %v2005_v18  ;;  %v2002_v21 = vmax.f32 %v2000_v20, 0.0 }
 0x39b   : > { %v2006_v8 = vcombine.high %v2002_v21, %v2002_v21  ;;  %2012 = vst.msk [vmem:[%s413_s19 + $0x8] sm:$0xf] %vm2009_vm4, %v2002_v21 }
 0x39d   : > { %2013 = vst.msk [vmem:[%s413_s19 + $0xc] sm:$0xf] %vm2009_vm4, %v2006_v8 }
 0x39e PF: > { %s22_s21 = sadd.s32 1, %s2451_s21  }
 0x39f   : > { %p19_p4 = scmp.ge.s32.totalorder %s22_s21, 4  }
 0x3a1   :  { %21 = sbr.rel (!%p19_p4) target bundleno = 1 (0x1), region = 106 }

// kernel: robust_resnet_forward.7
= control target key start
LH: loop header
LB: loop body
LE: loop exit
PB: predicated region body
PF: predicated region fallthrough
CT: control target
= control target key end

     0   :  { %s1620_s27 = smov 0   ;;  %s1824_s0 = inlined_call_operand.vmem [shape: f32[2,4,4,32], index: 0, kind: input, shape index: {}]   ;;  %s1825_s1 = inlined_call_operand.vmem [shape: bf16[32,8], index: 1, kind: input, shape index: {}]   ;;  %s1826_s2 = inlined_call_operand.vmem [shape: f32[1,8], index: 2, kind: input, shape index: {}, may-alias: {2,5}]   ;;  %s1827_s3 = inlined_call_operand.vmem [shape: f32[9,16,16], index: 3, kind: input, shape index: {}]   ;;  %s1828_s4 = inlined_call_operand.vmem [shape: f32[9,8], index: 4, kind: input, shape index: {}]   ;;  %s1829_s5 = inlined_call_operand.vmem [shape: f32[1,8], index: 5, kind: input, shape index: {}, may-alias: {2,5}]   ;;  %s1830_s6 = inlined_call_operand.vmem [shape: bf16[8,32], index: 6, kind: input, shape index: {}]   ;;  %s1831_s7 = inlined_call_operand.vmem [shape: f32[1,32], index: 7, kind: input, shape index: {}]   ;;  %s1832_s8 = inlined_call_operand.vmem [shape: f32[2,4,4,32], index: 8, kind: output, shape index: {}]  }
   0x1 LB: > { %s1370_s28 = sadd.s32 4294967295, %s1571_s27   ;;  %p1374_p0 = scmp.ge.s32.totalorder %s1571_s27, 1  ;;  %s1571_s27 = sphi %s1620_s27, %s18_s27  }
   0x2   : > { %p262_p1 = scmp.lt.s32.totalorder %s1571_s27, 3 }
   0x4   : > { %p263_p2 = pnand %p1374_p0, %p262_p1 }
   0x5   : > { %p296_p3 = scmp.lt.s32.totalorder (!%p263_p2), %s1370_s28, 1 }
   0x6   : > { %266 = sbr.rel (%p263_p2) target bundleno = 662 (0x296), region = 52 }
   0xb   : > { %v1561_v0 = vld [vmem:[%s1825_s1 + $0x8] sm:$0xff]   ;;  %v1573_v1 = vmov 0.0   ;;  %v1562_v2 = vld [vmem:[%s1825_s1] sm:$0xff]   ;;  %vm1574_vm0 = vmmov 0   ;;  %s1834_s28 = smov (!%p296_p3, %s1370_s28), 1  ;;  %vm343_vm1 = vcmask 261120  }
   0xc   : > { %1474 = vmatprep.subr.bf16.mxu0 %v1573_v1  ;;  %1478 = vmatprep.mubr.msk.bf16.mxu0 %vm1574_vm0, %v1573_v1  ;;  %s1431_s11 = sshll.u32 %s1834_s28, 4  ;;  %v390_v10 = vld [vmem:[%s1827_s3] sm:$0xff]  ;;  %vm392_vm2 = vcmask 130048   ;;  %v1406_v11 = vld [vmem:[%s1827_s3 + $0x50] sm:$0xff]  ;;  %v391_v21 = vld [vmem:[%s1827_s3 + $0x8] sm:$0xff]  ;;  %vm1251_vm3 = vcmask 1043456  }
   0xd   : > { %1475 = vmatpush3.bf16.msra.mxu0 %v1561_v0  ;;  %s300_s14 = scalar_lea.vmem %s1824_s0, %s1431_s11  ;;  %1486 = vmatprep.mubr.msk.f32.mxu1 %vm392_vm2, %v390_v10  ;;  %v1379_v13 = vld [vmem:[%s1826_s2] ss:$0 sm:$0xff]  ;;  %v1407_v22 = vld [vmem:[%s1827_s3 + $0x58] sm:$0xff]  ;;  %v1386_v23 = vld [vmem:[%s1827_s3 + $0x10] sm:$0xff]  ;;  %vm1247_vm4 = vcmask 64512   ;;  %s305_s22 = scalar_lea.vmem %s1832_s8, %s1431_s11  ;;  %vm1310_vm5 = vcmask 257024  }
   0xe   : > { %1476 = vmatprep.subr.bf16.mxu0 %v1573_v1  ;;  %v1646_v3 = vld [vmem:[%s300_s14] sm:$0xf]  ;;  %v1648_v4 = vld [vmem:[%s300_s14 + $0x4] sm:$0xf]  ;;  %v1650_v5 = vld [vmem:[%s300_s14 + $0x8] sm:$0xf] }
   0xf   : > { %v1652_v6 = vld [vmem:[%s300_s14 + $0xc] sm:$0xf]  ;;  %v315_v7 = vcombine.low %v1646_v3, %v1648_v4  ;;  %v1387_v24 = vld [vmem:[%s1827_s3 + $0x18] sm:$0xff]  ;;  %v1391_v25 = vld [vmem:[%s1827_s3 + $0x20] sm:$0xff] }
  0x10   : > { %v316_v8 = vcombine.low %v1650_v5, %v1652_v6  ;;  %v1416_v26 = vld [vmem:[%s1827_s3 + $0x70] sm:$0xff]  ;;  %v1417_v27 = vld [vmem:[%s1827_s3 + $0x78] sm:$0xff]  ;;  %v1392_v28 = vld [vmem:[%s1827_s3 + $0x28] sm:$0xff] }
  0x11   : > { %1477 = vmatpush3.bf16.msra.mxu0 %v1562_v2  ;;  %v1396_v29 = vld [vmem:[%s1827_s3 + $0x30] sm:$0xff]  ;;  %v1397_v30 = vld [vmem:[%s1827_s3 + $0x38] sm:$0xff]  ;;  %v1401_v31 = vld [vmem:[%s1827_s3 + $0x40] sm:$0xff] }
  0x12   : > { %v319_v9 = vpack.c.bf16 %v316_v8, %v315_v7  ;;  %v1402_v32 = vld [vmem:[%s1827_s3 + $0x48] sm:$0xff]  ;;  %v1411_v33 = vld [vmem:[%s1827_s3 + $0x60] sm:$0xff] }
  0x13   : > { %v1412_v34 = vld [vmem:[%s1827_s3 + $0x68] sm:$0xff]  ;;  %v1421_v35 = vld [vmem:[%s1827_s3 + $0x80] sm:$0xff] }
  0x14   : > { %1479 = vmatmul.mubr.msk.bf16.vlgmr.msra.gmra.mxu0 %vm343_vm1, %v319_v9  ;;  %v1422_v36 = vld [vmem:[%s1827_s3 + $0x88] sm:$0xff]  ;;  %v1239_v37 = vld [vmem:[%s1830_s6] sm:$0xf]  ;;  %v1405_v60 = vld [vmem:[%s1828_s4 + $0x4] ss:$0 sm:$0xff] }
  0x15   : > { %1521 = vmatprep.mubr.msk.f32.mxu0 %vm392_vm2, %v1406_v11  ;;  %v1253_v38 = vsel %vm1251_vm3, %v1239_v37, 0  ;;  %v1390_v43 = vld [vmem:[%s1828_s4 + $0x1] ss:$0 sm:$0xff]  ;;  %v1385_v44 = vld [vmem:[%s1828_s4] ss:$0 sm:$0xff] }
  0x16   : > { %v1395_v46 = vld [vmem:[%s1828_s4 + $0x2] ss:$0 sm:$0xff]  ;;  %v1400_v49 = vld [vmem:[%s1828_s4 + $0x3] ss:$0 sm:$0xff]  ;;  %v1410_v61 = vld [vmem:[%s1828_s4 + $0x5] ss:$0 sm:$0xff] }
  0xd4   : > { %v381_v12 = vpop.f32.mrf.mxu0 }
  0xd5   : > { %v382_v16 = vadd.f32 %v1379_v13, %v381_v12  ;;  %v1415_v12 = vld [vmem:[%s1828_s4 + $0x6] ss:$0 sm:$0xff] }
  0xd6   : > { %v1480_v14 = vpop.f32.mrf.mxu0 }
  0xd7   : > { %v1671_v20 = vmax.f32 %v382_v16, 0.0  ;;  %v1420_v14 = vld [vmem:[%s1828_s4 + $0x7] ss:$0 sm:$0xff] }
  0xd8   : > { %v384_v15 = vpop.f32.mrf.mxu0 }
  0xd9   : > { %v385_v17 = vadd.f32 %v1379_v13, %v384_v15 }
  0xda   : > { %v1481_v18 = vpop.f32.mrf.mxu0 }
  0xdb   : > { %v1669_v19 = vmax.f32 %v385_v17, 0.0 }
  0xdd   : > { %1482 = vmatprep.subr.mxu1 %v1669_v19  ;;  %1517 = vmatprep.subr.mxu0 %v1669_v19 }
  0xde   : > { %1483 = vmatpush3.msra.mxu1 %v1669_v19  ;;  %1518 = vmatpush3.msra.mxu0 %v1669_v19 }
  0xdf   : > { %1484 = vmatprep.subr.mxu1 %v1671_v20  ;;  %1519 = vmatprep.subr.mxu0 %v1671_v20 }
  0xe0   : > { %1485 = vmatpush3.msra.mxu1 %v1671_v20  ;;  %1520 = vmatpush3.msra.mxu0 %v1671_v20 }
  0xe1   : > { %1487 = vmatmul.mubr.msk.f32.vlgmr.msra.gmra.mxu1 %vm392_vm2, %v391_v21  ;;  %1489 = vmatprep.subr.mxu1 %v1669_v19 }
  0xe2   : > { %1531 = vmatprep.subr.mxu0 %v1669_v19  ;;  %1490 = vmatpush3.msra.mxu1 %v1669_v19 }
  0xe3   : > { %1522 = vmatmul.mubr.msk.f32.vlgmr.msra.gmra.mxu0 %vm392_vm2, %v1407_v22  ;;  %1491 = vmatprep.subr.mxu1 %v1671_v20 }
  0xe4   : > { %1532 = vmatpush3.msra.mxu0 %v1669_v19  ;;  %1492 = vmatpush3.msra.mxu1 %v1671_v20 }
  0xe5   : > { %1533 = vmatprep.subr.mxu0 %v1671_v20  ;;  %1493 = vmatprep.mubr.msk.f32.mxu1 %vm392_vm2, %v1386_v23 }
  0xe6   : > { %1534 = vmatpush3.msra.mxu0 %v1671_v20  ;;  %1494 = vmatmul.mubr.msk.f32.vlgmr.msra.gmra.mxu1 %vm392_vm2, %v1387_v24 }
  0xe7   : > { %1496 = vmatprep.subr.mxu1 %v1669_v19  ;;  %1500 = vmatprep.mubr.msk.f32.mxu1 %vm392_vm2, %v1391_v25 }
  0xe8   : > { %1497 = vmatpush3.msra.mxu1 %v1669_v19  ;;  %1535 = vmatprep.mubr.msk.f32.mxu0 %vm392_vm2, %v1416_v26  ;;  %v1425_v26 = vld [vmem:[%s1828_s4 + $0x8] ss:$0 sm:$0xff] }
  0xe9   : > { %1498 = vmatprep.subr.mxu1 %v1671_v20  ;;  %1536 = vmatmul.mubr.msk.f32.vlgmr.msra.gmra.mxu0 %vm392_vm2, %v1417_v27 }
  0xea   : > { %1499 = vmatpush3.msra.mxu1 %v1671_v20  ;;  %1545 = vmatprep.subr.bf16.mxu0 %v1573_v1 }
  0xeb   : > { %1501 = vmatmul.mubr.msk.f32.vlgmr.msra.gmra.mxu1 %vm392_vm2, %v1392_v28  ;;  %1503 = vmatprep.subr.mxu1 %v1669_v19 }
  0xec   : > { %1504 = vmatpush3.msra.mxu1 %v1669_v19  ;;  %1507 = vmatprep.mubr.msk.f32.mxu1 %vm392_vm2, %v1396_v29 }
  0xed   : > { %1505 = vmatprep.subr.mxu1 %v1671_v20  ;;  %1547 = vmatprep.mubr.msk.bf16.mxu0 %vm1574_vm0, %v1573_v1 }
  0xee   : > { %1506 = vmatpush3.msra.mxu1 %v1671_v20  ;;  %1546 = vmatpush3.bf16.msra.mxu0 %v1253_v38 }
  0xef   : > { %1508 = vmatmul.mubr.msk.f32.vlgmr.msra.gmra.mxu1 %vm392_vm2, %v1397_v30  ;;  %1510 = vmatprep.subr.mxu1 %v1669_v19 }
  0xf0   : > { %1511 = vmatpush3.msra.mxu1 %v1669_v19  ;;  %1514 = vmatprep.mubr.msk.f32.mxu1 %vm392_vm2, %v1401_v31 }
  0xf1   : > { %1512 = vmatprep.subr.mxu1 %v1671_v20 }
  0xf2   : > { %1513 = vmatpush3.msra.mxu1 %v1671_v20 }
  0xf3   : > { %1515 = vmatmul.mubr.msk.f32.vlgmr.msra.gmra.mxu1 %vm392_vm2, %v1402_v32  ;;  %1524 = vmatprep.subr.mxu1 %v1669_v19 }
  0xf4   : > { %1525 = vmatpush3.msra.mxu1 %v1669_v19  ;;  %1528 = vmatprep.mubr.msk.f32.mxu1 %vm392_vm2, %v1411_v33 }
  0xf5   : > { %1526 = vmatprep.subr.mxu1 %v1671_v20 }
  0xf6   : > { %1527 = vmatpush3.msra.mxu1 %v1671_v20 }
  0xf7   : > { %1529 = vmatmul.mubr.msk.f32.vlgmr.msra.gmra.mxu1 %vm392_vm2, %v1412_v34  ;;  %1538 = vmatprep.subr.mxu1 %v1669_v19 }
  0xf8   : > { %1539 = vmatpush3.msra.mxu1 %v1669_v19  ;;  %1542 = vmatprep.mubr.msk.f32.mxu1 %vm392_vm2, %v1421_v35  ;;  %v1426_v35 = vld [vmem:[%s1829_s5] ss:$0 sm:$0xff] }
  0xf9   : > { %1540 = vmatprep.subr.mxu1 %v1671_v20 }
  0xfa   : > { %1541 = vmatpush3.msra.mxu1 %v1671_v20 }
  0xfb   : > { %1543 = vmatmul.mubr.msk.f32.vlgmr.msra.gmra.mxu1 %vm392_vm2, %v1422_v36 }
 0x1a1   : > { %v1488_v39 = vpop.f32.mrf.mxu1 }
 0x1a2   : > { %v480_v51 = vmul.f32 %v1488_v39, %v1385_v44 }
 0x1a3   : > { %v465_v40 = vpop.f32.mrf.mxu1  ;;  %v1523_v50 = vpop.f32.mrf.mxu0 }
 0x1a4   : > { %v479_v55 = vmul.f32 %v1385_v44, %v465_v40  ;;  %v945_v10 = vmul.f32 %v1523_v50, %v1410_v61 }
 0x1a5   : > { %v930_v62 = vpop.f32.mrf.mxu0 }
 0x1a6   : > { %v1495_v41 = vpop.f32.mrf.mxu1  ;;  %v944_v18 = vmul.f32 %v1410_v61, %v930_v62 }
 0x1a7   : > { %v573_v47 = vmul.f32 %v1495_v41, %v1390_v43 }
 0x1a8   : > { %v558_v42 = vpop.f32.mrf.mxu1 }
 0x1a9   : > { %v572_v52 = vmul.f32 %v1390_v43, %v558_v42  ;;  %v575_v56 = vadd.f32 %v573_v47, %v480_v51  ;;  %v1537_v13 = vpop.f32.mrf.mxu0 }
 0x1aa   : > { %v1131_v23 = vmul.f32 %v1537_v13, %v1420_v14 }
 0x1ab   : > { %v1502_v45 = vpop.f32.mrf.mxu1  ;;  %v574_v63 = vadd.f32 %v572_v52, %v479_v55  ;;  %v1116_v25 = vpop.f32.mrf.mxu0 }
 0x1ac   : > { %v666_v53 = vmul.f32 %v1502_v45, %v1395_v46  ;;  %v1130_v33 = vmul.f32 %v1420_v14, %v1116_v25 }
 0x1ad   : > { %v651_v48 = vpop.f32.mrf.mxu1 }
 0x1ae   : > { %v665_v57 = vmul.f32 %v1395_v46, %v651_v48  ;;  %v668_v0 = vadd.f32 %v666_v53, %v575_v56  ;;  %v1427_v46 = vld [vmem:[%s1831_s7] ss:$0 sm:$0xff] }
 0x1af   : > { %v1509_v54 = vpop.f32.mrf.mxu1 }
 0x1b0   : > { %v759_v58 = vmul.f32 %v1509_v54, %v1400_v49  ;;  %v667_v7 = vadd.f32 %v665_v57, %v574_v63 }
 0x1b1   : > { %v744_v59 = vpop.f32.mrf.mxu1 }
 0x1b2   : > { %v758_v1 = vmul.f32 %v1400_v49, %v744_v59  ;;  %v761_v8 = vadd.f32 %v759_v58, %v668_v0 }
 0x1b3   : > { %v1516_v2 = vpop.f32.mrf.mxu1 }
 0x1b4   : > { %v852_v9 = vmul.f32 %v1516_v2, %v1405_v60  ;;  %v760_v15 = vadd.f32 %v758_v1, %v667_v7 }
 0x1b5   : > { %v837_v11 = vpop.f32.mrf.mxu1 }
 0x1b6   : > { %v854_v16 = vadd.f32 %v852_v9, %v761_v8  ;;  %v851_v17 = vmul.f32 %v1405_v60, %v837_v11 }
 0x1b7   : > { %v1530_v19 = vpop.f32.mrf.mxu1 }
 0x1b8   : > { %v947_v20 = vadd.f32 %v945_v10, %v854_v16  ;;  %v853_v21 = vadd.f32 %v851_v17, %v760_v15  ;;  %v1038_v22 = vmul.f32 %v1530_v19, %v1415_v12 }
 0x1b9   : > { %v1023_v24 = vpop.f32.mrf.mxu1 }
 0x1ba   : > { %v946_v27 = vadd.f32 %v944_v18, %v853_v21  ;;  %v1040_v28 = vadd.f32 %v1038_v22, %v947_v20  ;;  %v1037_v29 = vmul.f32 %v1415_v12, %v1023_v24 }
 0x1bb   : > { %v1544_v30 = vpop.f32.mrf.mxu1 }
 0x1bc   : > { %v1133_v31 = vadd.f32 %v1131_v23, %v1040_v28  ;;  %v1039_v32 = vadd.f32 %v1037_v29, %v946_v27  ;;  %v1224_v34 = vmul.f32 %v1544_v30, %v1425_v26 }
 0x1bd   : > { %v1209_v36 = vpop.f32.mrf.mxu1 }
 0x1be   : > { %v1132_v37 = vadd.f32 %v1130_v33, %v1039_v32  ;;  %v1226_v38 = vadd.f32 %v1224_v34, %v1133_v31  ;;  %v1223_v39 = vmul.f32 %v1425_v26, %v1209_v36 }
 0x1c0   : > { %v1235_v40 = vadd.f32 %v1426_v35, %v1226_v38  ;;  %v1225_v41 = vadd.f32 %v1223_v39, %v1132_v37 }
 0x1c2   : > { %v1234_v42 = vadd.f32 %v1426_v35, %v1225_v41  ;;  %v1237_v43 = vmax.f32 %v1235_v40, 0.0 }
 0x1c4   : > { %v1236_v44 = vmax.f32 %v1234_v42, 0.0 }
 0x1c6   : > { %v1238_v45 = vpack.c.bf16 %v1237_v43, %v1236_v44 }
 0x1c8   : > { %1548 = vmatmul.mubr.msk.bf16.vlgmr.msra.gmra.mxu0 %vm1247_vm4, %v1238_v45 }
 0x288   : > { %v1289_v47 = vpop.f32.mrf.mxu0 }
 0x289   : > { %v1290_v48 = vadd.f32 %v1427_v46, %v1289_v47 }
 0x28a   : > { %v1549_v49 = vpop.f32.mrf.mxu0 }
 0x28b   : > { %v1298_v50 = vcombine.high %v1290_v48, %v1290_v48  ;;  %v1302_v51 = vadd.f32 %v1290_v48, %v1646_v3 }
 0x28c   : > { %v1292_v52 = vpop.f32.mrf.mxu0 }
 0x28d   : > { %v1303_v53 = vadd.f32 %v1298_v50, %v1648_v4  ;;  %v1306_v54 = vmax.f32 %v1302_v51, 0.0  ;;  %v1293_v55 = vadd.f32 %v1427_v46, %v1292_v52 }
 0x28e   : > { %v1550_v56 = vpop.f32.mrf.mxu0 }
 0x28f   : > { %v1307_v57 = vmax.f32 %v1303_v53, 0.0  ;;  %1311 = vst.msk [vmem:[%s305_s22] sm:$0xf] %vm1310_vm5, %v1306_v54  ;;  %v1299_v58 = vcombine.high %v1293_v55, %v1293_v55  ;;  %v1304_v59 = vadd.f32 %v1293_v55, %v1650_v5 }
 0x291   : > { %1312 = vst.msk [vmem:[%s305_s22 + $0x4] sm:$0xf] %vm1310_vm5, %v1307_v57  ;;  %v1305_v3 = vadd.f32 %v1299_v58, %v1652_v6  ;;  %v1308_v60 = vmax.f32 %v1304_v59, 0.0 }
 0x293   : > { %v1309_v61 = vmax.f32 %v1305_v3, 0.0  ;;  %1313 = vst.msk [vmem:[%s305_s22 + $0x8] sm:$0xf] %vm1310_vm5, %v1308_v60 }
 0x295   : > { %1314 = vst.msk [vmem:[%s305_s22 + $0xc] sm:$0xf] %vm1310_vm5, %v1309_v61 }
 0x296 PF: > { %s18_s27 = sadd.s32 1, %s1571_s27  }
 0x297   : > { %p15_p4 = scmp.ge.s32.totalorder %s18_s27, 4  }
 0x299   :  { %17 = sbr.rel (!%p15_p4) target bundleno = 1 (0x1), region = 90 }

// kernel: robust_resnet_forward.8
= control target key start
LH: loop header
LB: loop body
LE: loop exit
PB: predicated region body
PF: predicated region fallthrough
CT: control target
= control target key end

     0   :  { %s1765_s13 = smov 0   ;;  %s1973_s0 = inlined_call_operand.vmem [shape: f32[2,4,4,32], index: 0, kind: input, shape index: {}]   ;;  %s1974_s1 = inlined_call_operand.vmem [shape: bf16[32,16], index: 1, kind: input, shape index: {}]   ;;  %s1975_s2 = inlined_call_operand.vmem [shape: f32[1,16], index: 2, kind: input, shape index: {}, may-alias: {2,5}]   ;;  %s1976_s3 = inlined_call_operand.vmem [shape: f32[9,16,16], index: 3, kind: input, shape index: {}]   ;;  %s1977_s4 = inlined_call_operand.vmem [shape: f32[9,16], index: 4, kind: input, shape index: {}]   ;;  %s1978_s5 = inlined_call_operand.vmem [shape: f32[1,16], index: 5, kind: input, shape index: {}, may-alias: {2,5}]   ;;  %s1979_s6 = inlined_call_operand.vmem [shape: bf16[16,64], index: 6, kind: input, shape index: {}]   ;;  %s1980_s7 = inlined_call_operand.vmem [shape: f32[1,64], index: 7, kind: input, shape index: {}, may-alias: {7,9}]   ;;  %s1981_s8 = inlined_call_operand.vmem [shape: bf16[32,64], index: 8, kind: input, shape index: {}]   ;;  %s1982_s9 = inlined_call_operand.vmem [shape: f32[1,64], index: 9, kind: input, shape index: {}, may-alias: {7,9}]   ;;  %s1983_s10 = inlined_call_operand.vmem [shape: f32[2,4,4,64], index: 10, kind: output, shape index: {}]  }
   0x1 LB: > { %s1486_s14 = sadd.s32 4294967295, %s1706_s13   ;;  %p1490_p0 = scmp.ge.s32.totalorder %s1706_s13, 1  ;;  %s1706_s13 = sphi %s1765_s13, %s20_s13  }
   0x2   : > { %p312_p1 = scmp.lt.s32.totalorder %s1706_s13, 3 }
   0x4   : > { %p313_p2 = pnand %p1490_p0, %p312_p1 }
   0x5   : > { %p350_p3 = scmp.lt.s32.totalorder (!%p313_p2), %s1486_s14, 1 }
   0x6   : > { %316 = sbr.rel (%p313_p2) target bundleno = 660 (0x294), region = 60 }
   0xb   : > { %v1693_v0 = vld [vmem:[%s1974_s1 + $0x8] sm:$0xff]   ;;  %v1708_v1 = vmov 0.0   ;;  %v1694_v2 = vld [vmem:[%s1974_s1] sm:$0xff]   ;;  %vm1709_vm0 = vmmov 0   ;;  %s1985_s14 = smov (!%p350_p3, %s1486_s14), 1  ;;  %vm397_vm1 = vcmask 261120  }
   0xc   : > { %1598 = vmatprep.subr.bf16.mxu0 %v1708_v1  ;;  %1602 = vmatprep.mubr.msk.bf16.mxu0 %vm1709_vm0, %v1708_v1  ;;  %s1552_s19 = sshll.u32 %s1985_s14, 4  ;;  %v444_v6 = vld [vmem:[%s1976_s3] sm:$0xff]  ;;  %vm446_vm2 = vcmask 130048   ;;  %v1512_v7 = vld [vmem:[%s1976_s3 + $0x30] sm:$0xff]  ;;  %v445_v17 = vld [vmem:[%s1976_s3 + $0x8] sm:$0xff]  ;;  %vm1426_vm3 = vcmask 519168  }
   0xd   : > { %1599 = vmatpush3.bf16.msra.mxu0 %v1693_v0  ;;  %s354_s22 = scalar_lea.vmem %s1973_s0, %s1552_s19  ;;  %1610 = vmatprep.mubr.msk.f32.mxu1 %vm446_vm2, %v444_v6  ;;  %v1495_v9 = vld [vmem:[%s1975_s2] ss:$0 sm:$0xff]  ;;  %v1513_v18 = vld [vmem:[%s1976_s3 + $0x38] sm:$0xff]  ;;  %v1502_v19 = vld [vmem:[%s1976_s3 + $0x10] sm:$0xff]  ;;  %s359_s25 = scalar_lea.vmem %s1983_s10, %s1552_s19 }
   0xe   : > { %1600 = vmatprep.subr.bf16.mxu0 %v1708_v1  ;;  %v1695_v3 = vld [vmem:[%s354_s22] sm:$0xff]   ;;  %v1696_v4 = vld [vmem:[%s354_s22 + $0x8] sm:$0xff]   ;;  %v1503_v20 = vld [vmem:[%s1976_s3 + $0x18] sm:$0xff] }
   0xf   : > { %v1791_v5 = vpack.c.bf16 %v1696_v4, %v1695_v3  ;;  %v1522_v21 = vld [vmem:[%s1976_s3 + $0x50] sm:$0xff]  ;;  %v1523_v22 = vld [vmem:[%s1976_s3 + $0x58] sm:$0xff]  ;;  %v1507_v23 = vld [vmem:[%s1976_s3 + $0x20] sm:$0xff] }
  0x10   : > { %v1508_v24 = vld [vmem:[%s1976_s3 + $0x28] sm:$0xff]  ;;  %v1517_v25 = vld [vmem:[%s1976_s3 + $0x40] sm:$0xff]  ;;  %v1532_v26 = vld [vmem:[%s1976_s3 + $0x70] sm:$0xff] }
  0x11   : > { %1601 = vmatpush3.bf16.msra.mxu0 %v1694_v2  ;;  %v1533_v27 = vld [vmem:[%s1976_s3 + $0x78] sm:$0xff]  ;;  %v1518_v28 = vld [vmem:[%s1976_s3 + $0x48] sm:$0xff]  ;;  %v1527_v29 = vld [vmem:[%s1976_s3 + $0x60] sm:$0xff] }
  0x12   : > { %v1528_v30 = vld [vmem:[%s1976_s3 + $0x68] sm:$0xff]  ;;  %v1537_v31 = vld [vmem:[%s1976_s3 + $0x80] sm:$0xff] }
  0x13   : > { %v1538_v32 = vld [vmem:[%s1976_s3 + $0x88] sm:$0xff]  ;;  %v1698_v34 = vld [vmem:[%s1981_s8] sm:$0xff]  }
  0x14   : > { %1603 = vmatmul.mubr.msk.bf16.vlgmr.msra.gmra.mxu0 %vm397_vm1, %v1791_v5  ;;  %v1697_v33 = vld [vmem:[%s1981_s8 + $0x8] sm:$0xff]   ;;  %v1699_v35 = vld [vmem:[%s1979_s6] sm:$0xff]  }
  0x15   : > { %1631 = vmatprep.mubr.msk.f32.mxu0 %vm446_vm2, %v1512_v7  ;;  %v1506_v40 = vld [vmem:[%s1977_s4 + $0x1] ss:$0 sm:$0xff]  ;;  %v1501_v42 = vld [vmem:[%s1977_s4] ss:$0 sm:$0xff]  ;;  %v1511_v45 = vld [vmem:[%s1977_s4 + $0x2] ss:$0 sm:$0xff] }
  0x16   : > { %v1516_v46 = vld [vmem:[%s1977_s4 + $0x3] ss:$0 sm:$0xff]  ;;  %v1521_v59 = vld [vmem:[%s1977_s4 + $0x4] ss:$0 sm:$0xff]  ;;  %v1526_v60 = vld [vmem:[%s1977_s4 + $0x5] ss:$0 sm:$0xff] }
  0x17   : > { %v1531_v6 = vld [vmem:[%s1977_s4 + $0x6] ss:$0 sm:$0xff] }
  0xd4   : > { %v435_v8 = vpop.f32.mrf.mxu0 }
  0xd5   : > { %v436_v12 = vadd.f32 %v1495_v9, %v435_v8  ;;  %v1536_v8 = vld [vmem:[%s1977_s4 + $0x7] ss:$0 sm:$0xff] }
  0xd6   : > { %v1604_v10 = vpop.f32.mrf.mxu0 }
  0xd7   : > { %v1808_v16 = vmax.f32 %v436_v12, 0.0 }
  0xd8   : > { %v438_v11 = vpop.f32.mrf.mxu0 }
  0xd9   : > { %v439_v13 = vadd.f32 %v1495_v9, %v438_v11 }
  0xda   : > { %v1605_v14 = vpop.f32.mrf.mxu0 }
  0xdb   : > { %v1806_v15 = vmax.f32 %v439_v13, 0.0 }
  0xdd   : > { %1606 = vmatprep.subr.mxu1 %v1806_v15  ;;  %1627 = vmatprep.subr.mxu0 %v1806_v15 }
  0xde   : > { %1607 = vmatpush3.msra.mxu1 %v1806_v15  ;;  %1628 = vmatpush3.msra.mxu0 %v1806_v15 }
  0xdf   : > { %1608 = vmatprep.subr.mxu1 %v1808_v16  ;;  %1629 = vmatprep.subr.mxu0 %v1808_v16 }
  0xe0   : > { %1609 = vmatpush3.msra.mxu1 %v1808_v16  ;;  %1630 = vmatpush3.msra.mxu0 %v1808_v16 }
  0xe1   : > { %1611 = vmatmul.mubr.msk.f32.vlgmr.msra.gmra.mxu1 %vm446_vm2, %v445_v17  ;;  %1613 = vmatprep.subr.mxu1 %v1806_v15 }
  0xe2   : > { %1641 = vmatprep.subr.mxu0 %v1806_v15  ;;  %1614 = vmatpush3.msra.mxu1 %v1806_v15 }
  0xe3   : > { %1632 = vmatmul.mubr.msk.f32.vlgmr.msra.gmra.mxu0 %vm446_vm2, %v1513_v18  ;;  %1615 = vmatprep.subr.mxu1 %v1808_v16 }
  0xe4   : > { %1642 = vmatpush3.msra.mxu0 %v1806_v15  ;;  %1616 = vmatpush3.msra.mxu1 %v1808_v16 }
  0xe5   : > { %1643 = vmatprep.subr.mxu0 %v1808_v16  ;;  %1617 = vmatprep.mubr.msk.f32.mxu1 %vm446_vm2, %v1502_v19  ;;  %v1541_v19 = vld [vmem:[%s1977_s4 + $0x8] ss:$0 sm:$0xff] }
  0xe6   : > { %1644 = vmatpush3.msra.mxu0 %v1808_v16  ;;  %1618 = vmatmul.mubr.msk.f32.vlgmr.msra.gmra.mxu1 %vm446_vm2, %v1503_v20 }
  0xe7   : > { %1620 = vmatprep.subr.mxu1 %v1806_v15  ;;  %1645 = vmatprep.mubr.msk.f32.mxu0 %vm446_vm2, %v1522_v21 }
  0xe8   : > { %1655 = vmatprep.subr.mxu0 %v1806_v15  ;;  %1621 = vmatpush3.msra.mxu1 %v1806_v15 }
  0xe9   : > { %1646 = vmatmul.mubr.msk.f32.vlgmr.msra.gmra.mxu0 %vm446_vm2, %v1523_v22  ;;  %1622 = vmatprep.subr.mxu1 %v1808_v16 }
  0xea   : > { %1656 = vmatpush3.msra.mxu0 %v1806_v15  ;;  %1623 = vmatpush3.msra.mxu1 %v1808_v16 }
  0xeb   : > { %1657 = vmatprep.subr.mxu0 %v1808_v16  ;;  %1624 = vmatprep.mubr.msk.f32.mxu1 %vm446_vm2, %v1507_v23 }
  0xec   : > { %1658 = vmatpush3.msra.mxu0 %v1808_v16  ;;  %1625 = vmatmul.mubr.msk.f32.vlgmr.msra.gmra.mxu1 %vm446_vm2, %v1508_v24 }
  0xed   : > { %1634 = vmatprep.subr.mxu1 %v1806_v15  ;;  %1638 = vmatprep.mubr.msk.f32.mxu1 %vm446_vm2, %v1517_v25 }
  0xee   : > { %1635 = vmatpush3.msra.mxu1 %v1806_v15  ;;  %1659 = vmatprep.mubr.msk.f32.mxu0 %vm446_vm2, %v1532_v26 }
  0xef   : > { %1636 = vmatprep.subr.mxu1 %v1808_v16  ;;  %1660 = vmatmul.mubr.msk.f32.vlgmr.msra.gmra.mxu0 %vm446_vm2, %v1533_v27 }
  0xf0   : > { %1637 = vmatpush3.msra.mxu1 %v1808_v16  ;;  %1669 = vmatprep.subr.bf16.mxu0 %v1708_v1 }
  0xf1   : > { %1639 = vmatmul.mubr.msk.f32.vlgmr.msra.gmra.mxu1 %vm446_vm2, %v1518_v28  ;;  %1648 = vmatprep.subr.mxu1 %v1806_v15  ;;  %v1542_v28 = vld [vmem:[%s1978_s5] ss:$0 sm:$0xff] }
  0xf2   : > { %1649 = vmatpush3.msra.mxu1 %v1806_v15  ;;  %1652 = vmatprep.mubr.msk.f32.mxu1 %vm446_vm2, %v1527_v29 }
  0xf3   : > { %1650 = vmatprep.subr.mxu1 %v1808_v16  ;;  %1671 = vmatprep.mubr.msk.bf16.mxu0 %vm1709_vm0, %v1708_v1 }
  0xf4   : > { %1651 = vmatpush3.msra.mxu1 %v1808_v16  ;;  %1670 = vmatpush3.bf16.msra.mxu0 %v1699_v35 }
  0xf5   : > { %1653 = vmatmul.mubr.msk.f32.vlgmr.msra.gmra.mxu1 %vm446_vm2, %v1528_v30  ;;  %1662 = vmatprep.subr.mxu1 %v1806_v15 }
  0xf6   : > { %1663 = vmatpush3.msra.mxu1 %v1806_v15  ;;  %1666 = vmatprep.mubr.msk.f32.mxu1 %vm446_vm2, %v1537_v31 }
  0xf7   : > { %1664 = vmatprep.subr.mxu1 %v1808_v16 }
  0xf8   : > { %1665 = vmatpush3.msra.mxu1 %v1808_v16 }
  0xf9   : > { %1667 = vmatmul.mubr.msk.f32.vlgmr.msra.gmra.mxu1 %vm446_vm2, %v1538_v32  ;;  %1675 = vmatprep.subr.bf16.mxu1 %v1708_v1 }
  0xfa   : > { %1679 = vmatprep.mubr.msk.bf16.mxu1 %vm1709_vm0, %v1708_v1  ;;  %1676 = vmatpush3.bf16.msra.mxu1 %v1697_v33 }
  0xfb   : > { %1677 = vmatprep.subr.bf16.mxu1 %v1708_v1 }
  0xfe   : > { %1678 = vmatpush3.bf16.msra.mxu1 %v1698_v34 }
 0x101   : > { %1680 = vmatmul.mubr.msk.bf16.vlgmr.msra.gmra.mxu1 %vm397_vm1, %v1791_v5 }
 0x1a1   : > { %v1612_v36 = vpop.f32.mrf.mxu1 }
 0x1a2   : > { %v534_v47 = vmul.f32 %v1612_v36, %v1501_v42 }
 0x1a3   : > { %v519_v37 = vpop.f32.mrf.mxu1  ;;  %v1633_v38 = vpop.f32.mrf.mxu0 }
 0x1a4   : > { %v533_v51 = vmul.f32 %v1501_v42, %v519_v37  ;;  %v813_v54 = vmul.f32 %v1633_v38, %v1516_v46 }
 0x1a5   : > { %v798_v41 = vpop.f32.mrf.mxu0 }
 0x1a6   : > { %v1619_v39 = vpop.f32.mrf.mxu1  ;;  %v812_v0 = vmul.f32 %v1516_v46, %v798_v41 }
 0x1a7   : > { %v627_v44 = vmul.f32 %v1619_v39, %v1506_v40 }
 0x1a8   : > { %v612_v43 = vpop.f32.mrf.mxu1 }
 0x1a9   : > { %v626_v48 = vmul.f32 %v1506_v40, %v612_v43  ;;  %v1647_v49 = vpop.f32.mrf.mxu0  ;;  %v629_v52 = vadd.f32 %v627_v44, %v534_v47  ;;  %v1546_v43 = vld [vmem:[%s1982_s9] ss:$0 sm:$0xff] }
 0x1aa   : > { %v999_v3 = vmul.f32 %v1647_v49, %v1526_v60  ;;  %v1543_v44 = vld [vmem:[%s1980_s7] ss:$0 sm:$0xff] }
 0x1ab   : > { %v628_v56 = vadd.f32 %v626_v48, %v533_v51  ;;  %v984_v61 = vpop.f32.mrf.mxu0 }
 0x1ac   : > { %v1626_v50 = vpop.f32.mrf.mxu1  ;;  %v998_v11 = vmul.f32 %v1526_v60, %v984_v61 }
 0x1ad   : > { %v720_v53 = vmul.f32 %v1626_v50, %v1511_v45 }
 0x1ae   : > { %v705_v55 = vpop.f32.mrf.mxu1 }
 0x1af   : > { %v722_v57 = vadd.f32 %v720_v53, %v629_v52  ;;  %v719_v58 = vmul.f32 %v1511_v45, %v705_v55  ;;  %v1661_v7 = vpop.f32.mrf.mxu0 }
 0x1b0   : > { %v1185_v16 = vmul.f32 %v1661_v7, %v1536_v8 }
 0x1b1   : > { %v815_v62 = vadd.f32 %v813_v54, %v722_v57  ;;  %v721_v63 = vadd.f32 %v719_v58, %v628_v56  ;;  %v1640_v1 = vpop.f32.mrf.mxu1  ;;  %v1170_v18 = vpop.f32.mrf.mxu0 }
 0x1b2   : > { %v906_v2 = vmul.f32 %v1640_v1, %v1521_v59  ;;  %v1184_v26 = vmul.f32 %v1536_v8, %v1170_v18 }
 0x1b3   : > { %v814_v4 = vadd.f32 %v812_v0, %v721_v63  ;;  %v891_v5 = vpop.f32.mrf.mxu1 }
 0x1b4   : > { %v908_v9 = vadd.f32 %v906_v2, %v815_v62  ;;  %v905_v10 = vmul.f32 %v1521_v59, %v891_v5 }
 0x1b5   : > { %v1654_v12 = vpop.f32.mrf.mxu1 }
 0x1b6   : > { %v1001_v13 = vadd.f32 %v999_v3, %v908_v9  ;;  %v907_v14 = vadd.f32 %v905_v10, %v814_v4  ;;  %v1092_v15 = vmul.f32 %v1654_v12, %v1531_v6 }
 0x1b7   : > { %v1077_v17 = vpop.f32.mrf.mxu1 }
 0x1b8   : > { %v1000_v20 = vadd.f32 %v998_v11, %v907_v14  ;;  %v1094_v21 = vadd.f32 %v1092_v15, %v1001_v13  ;;  %v1091_v22 = vmul.f32 %v1531_v6, %v1077_v17 }
 0x1b9   : > { %v1668_v23 = vpop.f32.mrf.mxu1 }
 0x1ba   : > { %v1187_v24 = vadd.f32 %v1185_v16, %v1094_v21  ;;  %v1093_v25 = vadd.f32 %v1091_v22, %v1000_v20  ;;  %v1278_v27 = vmul.f32 %v1668_v23, %v1541_v19 }
 0x1bb   : > { %v1263_v29 = vpop.f32.mrf.mxu1 }
 0x1bc   : > { %v1186_v30 = vadd.f32 %v1184_v26, %v1093_v25  ;;  %v1280_v31 = vadd.f32 %v1278_v27, %v1187_v24  ;;  %v1277_v32 = vmul.f32 %v1541_v19, %v1263_v29 }
 0x1be   : > { %v1289_v33 = vadd.f32 %v1542_v28, %v1280_v31  ;;  %v1279_v34 = vadd.f32 %v1277_v32, %v1186_v30 }
 0x1c0   : > { %v1288_v35 = vadd.f32 %v1542_v28, %v1279_v34  ;;  %v1291_v36 = vmax.f32 %v1289_v33, 0.0 }
 0x1c1   : > { %v1409_v39 = vpop.f32.mrf.mxu1 }
 0x1c2   : > { %v1290_v37 = vmax.f32 %v1288_v35, 0.0  ;;  %v1410_v45 = vadd.f32 %v1546_v43, %v1409_v39 }
 0x1c3   : > { %v1681_v40 = vpop.f32.mrf.mxu1 }
 0x1c4   : > { %v1292_v38 = vpack.c.bf16 %v1291_v36, %v1290_v37 }
 0x1c5   : > { %v1412_v41 = vpop.f32.mrf.mxu1 }
 0x1c6   : > { %1672 = vmatmul.mubr.msk.bf16.vlgmr.msra.gmra.mxu0 %vm446_vm2, %v1292_v38  ;;  %v1413_v51 = vadd.f32 %v1546_v43, %v1412_v41 }
 0x1c7   : > { %v1682_v42 = vpop.f32.mrf.mxu1 }
 0x286   : > { %v1345_v46 = vpop.f32.mrf.mxu0 }
 0x287   : > { %v1346_v47 = vadd.f32 %v1543_v44, %v1345_v46 }
 0x288   : > { %v1673_v48 = vpop.f32.mrf.mxu0 }
 0x289   : > { %v1416_v49 = vadd.f32 %v1410_v45, %v1346_v47 }
 0x28a   : > { %v1348_v50 = vpop.f32.mrf.mxu0 }
 0x28b   : > { %v1418_v52 = vmax.f32 %v1416_v49, 0.0  ;;  %v1349_v53 = vadd.f32 %v1543_v44, %v1348_v50 }
 0x28c   : > { %v1674_v54 = vpop.f32.mrf.mxu0 }
 0x28d   : > { %v1422_v55 = vcombine.high %v1418_v52, %v1418_v52  ;;  %1427 = vst.msk [vmem:[%s359_s25] sm:$0xf] %vm1426_vm3, %v1418_v52  ;;  %v1417_v56 = vadd.f32 %v1413_v51, %v1349_v53 }
 0x28f   : > { %1428 = vst.msk [vmem:[%s359_s25 + $0x4] sm:$0xf] %vm1426_vm3, %v1422_v55  ;;  %v1419_v57 = vmax.f32 %v1417_v56, 0.0 }
 0x291   : > { %v1423_v58 = vcombine.high %v1419_v57, %v1419_v57  ;;  %1429 = vst.msk [vmem:[%s359_s25 + $0x8] sm:$0xf] %vm1426_vm3, %v1419_v57 }
 0x293   : > { %1430 = vst.msk [vmem:[%s359_s25 + $0xc] sm:$0xf] %vm1426_vm3, %v1423_v58 }
 0x294 PF: > { %s20_s13 = sadd.s32 1, %s1706_s13  }
 0x295   : > { %p17_p4 = scmp.ge.s32.totalorder %s20_s13, 4  }
 0x297   :  { %19 = sbr.rel (!%p17_p4) target bundleno = 1 (0x1), region = 98 }

// kernel: robust_resnet_forward.9
= control target key start
LH: loop header
LB: loop body
LE: loop exit
PB: predicated region body
PF: predicated region fallthrough
CT: control target
= control target key end

     0   :  { %s1830_s13 = smov 0   ;;  %s2057_s0 = inlined_call_operand.vmem [shape: f32[2,4,4,64], index: 0, kind: input, shape index: {}]   ;;  %s2058_s1 = inlined_call_operand.vmem [shape: bf16[64,32], index: 1, kind: input, shape index: {}]   ;;  %s2059_s2 = inlined_call_operand.vmem [shape: f32[1,32], index: 2, kind: input, shape index: {}, may-alias: {2,5}]   ;;  %s2060_s3 = inlined_call_operand.vmem [shape: f32[9,16,16], index: 3, kind: input, shape index: {}]   ;;  %s2061_s4 = inlined_call_operand.vmem [shape: f32[9,32], index: 4, kind: input, shape index: {}]   ;;  %s2062_s5 = inlined_call_operand.vmem [shape: f32[1,32], index: 5, kind: input, shape index: {}, may-alias: {2,5}]   ;;  %s2063_s6 = inlined_call_operand.vmem [shape: bf16[32,128], index: 6, kind: input, shape index: {}]   ;;  %s2064_s7 = inlined_call_operand.vmem [shape: f32[1,128], index: 7, kind: input, shape index: {}, may-alias: {7,9}]   ;;  %s2065_s8 = inlined_call_operand.vmem [shape: bf16[64,128], index: 8, kind: input, shape index: {}]   ;;  %s2066_s9 = inlined_call_operand.vmem [shape: f32[1,128], index: 9, kind: input, shape index: {}, may-alias: {7,9}]   ;;  %s2067_s10 = inlined_call_operand.vmem [shape: f32[2,4,4,128], index: 10, kind: output, shape index: {}]  }
   0x1 LB: > { %s1526_s14 = sadd.s32 4294967295, %s1771_s13   ;;  %p1530_p0 = scmp.ge.s32.totalorder %s1771_s13, 1  ;;  %s1771_s13 = sphi %s1830_s13, %s20_s13  }
   0x2   : > { %p312_p1 = scmp.lt.s32.totalorder %s1771_s13, 3 }
   0x4   : > { %p313_p2 = pnand %p1530_p0, %p312_p1 }
   0x5   : > { %p350_p3 = scmp.lt.s32.totalorder (!%p313_p2), %s1526_s14, 1 }
   0x6   : > { %316 = sbr.rel (%p313_p2) target bundleno = 668 (0x29c), region = 60 }
   0xb   : > { %v1753_v0 = vld [vmem:[%s2058_s1 + $0x18] sm:$0xff]   ;;  %v1773_v1 = vmov 0.0   ;;  %v1754_v2 = vld [vmem:[%s2058_s1 + $0x10] sm:$0xff]   ;;  %vm1774_vm0 = vmmov 0   ;;  %s2069_s14 = smov (!%p350_p3, %s1526_s14), 1  ;;  %v1755_v3 = vld [vmem:[%s2058_s1 + $0x8] sm:$0xff]  }
   0xc   : > { %1648 = vmatprep.subr.bf16.mxu0 %v1773_v1  ;;  %1656 = vmatprep.mubr.msk.bf16.mxu0 %vm1774_vm0, %v1773_v1  ;;  %s1597_s21 = sshll.u32 %s2069_s14, 4  ;;  %v1756_v4 = vld [vmem:[%s2058_s1] sm:$0xff]   ;;  %vm413_vm1 = vcmask 523264   ;;  %vm462_vm2 = vcmask 130048   ;;  %v1544_v9 = vld [vmem:[%s2060_s3 + $0x10] sm:$0xff]  ;;  %v461_v19 = vld [vmem:[%s2060_s3 + $0x8] sm:$0xff] }
   0xd   : > { %1649 = vmatpush3.bf16.msra.mxu0 %v1753_v0  ;;  %s354_s24 = scalar_lea.vmem %s2057_s0, %s1597_s21  ;;  %v460_v8 = vld [vmem:[%s2060_s3] sm:$0xff]  ;;  %1671 = vmatprep.mubr.msk.f32.mxu1 %vm462_vm2, %v1544_v9  ;;  %v1545_v20 = vld [vmem:[%s2060_s3 + $0x18] sm:$0xff]  ;;  %v1550_v22 = vld [vmem:[%s2060_s3 + $0x28] sm:$0xff]  ;;  %vm1332_vm3 = vcmask 261120   ;;  %s359_s17 = scalar_lea.vmem %s2067_s10, %s1597_s21 }
   0xe   : > { %1650 = vmatprep.subr.bf16.mxu0 %v1773_v1  ;;  %v1757_v5 = vld [vmem:[%s354_s24] sm:$0xff]   ;;  %v1758_v6 = vld [vmem:[%s354_s24 + $0x8] sm:$0xff]   ;;  %v1564_v23 = vld [vmem:[%s2060_s3 + $0x50] sm:$0xff] }
   0xf   : > { %v1864_v7 = vpack.c.bf16 %v1758_v6, %v1757_v5  ;;  %v1535_v11 = vld [vmem:[%s2059_s2] ss:$0 sm:$0xff]  ;;  %v1565_v24 = vld [vmem:[%s2060_s3 + $0x58] sm:$0xff]  ;;  %v1554_v25 = vld [vmem:[%s2060_s3 + $0x30] sm:$0xff] }
  0x10   : > { %v1549_v21 = vld [vmem:[%s2060_s3 + $0x20] sm:$0xff]  ;;  %v1555_v26 = vld [vmem:[%s2060_s3 + $0x38] sm:$0xff]  ;;  %v1574_v28 = vld [vmem:[%s2060_s3 + $0x70] sm:$0xff] }
  0x11   : > { %1651 = vmatpush3.bf16.msra.mxu0 %v1754_v2  ;;  %v1559_v27 = vld [vmem:[%s2060_s3 + $0x40] sm:$0xff]  ;;  %v1575_v29 = vld [vmem:[%s2060_s3 + $0x78] sm:$0xff]  ;;  %v1560_v30 = vld [vmem:[%s2060_s3 + $0x48] sm:$0xff] }
  0x12   : > { %1652 = vmatprep.subr.bf16.mxu0 %v1773_v1  ;;  %v1569_v31 = vld [vmem:[%s2060_s3 + $0x60] sm:$0xff]  ;;  %v1570_v32 = vld [vmem:[%s2060_s3 + $0x68] sm:$0xff]  ;;  %v1759_v35 = vld [vmem:[%s2065_s8 + $0x18] sm:$0xff]  }
  0x13   : > { %v1579_v33 = vld [vmem:[%s2060_s3 + $0x80] sm:$0xff]  ;;  %v1580_v34 = vld [vmem:[%s2060_s3 + $0x88] sm:$0xff]  ;;  %v1760_v36 = vld [vmem:[%s2065_s8 + $0x10] sm:$0xff]  }
  0x14   : > { %v1761_v37 = vld [vmem:[%s2065_s8 + $0x8] sm:$0xff]   ;;  %v1762_v38 = vld [vmem:[%s2065_s8] sm:$0xff]  }
  0x15   : > { %1653 = vmatpush3.bf16.msra.mxu0 %v1755_v3  ;;  %v1763_v39 = vld [vmem:[%s2063_s6 + $0x8] sm:$0xff]   ;;  %v1764_v40 = vld [vmem:[%s2063_s6] sm:$0xff]  }
  0x16   : > { %1654 = vmatprep.subr.bf16.mxu0 %v1773_v1  ;;  %v1543_v45 = vld [vmem:[%s2061_s4] ss:$0 sm:$0xff]  ;;  %v1548_v46 = vld [vmem:[%s2061_s4 + $0x1] ss:$0 sm:$0xff]  ;;  %v1553_v49 = vld [vmem:[%s2061_s4 + $0x2] ss:$0 sm:$0xff] }
  0x17   : > { %v1558_v52 = vld [vmem:[%s2061_s4 + $0x3] ss:$0 sm:$0xff]  ;;  %v1563_v62 = vld [vmem:[%s2061_s4 + $0x4] ss:$0 sm:$0xff]  ;;  %v1568_v63 = vld [vmem:[%s2061_s4 + $0x5] ss:$0 sm:$0xff] }
  0x19   : > { %1655 = vmatpush3.bf16.msra.mxu0 %v1756_v4 }
  0x1c   : > { %1657 = vmatmul.mubr.msk.bf16.vlgmr.msra.gmra.mxu0 %vm413_vm1, %v1864_v7 }
  0x1d   : > { %1664 = vmatprep.mubr.msk.f32.mxu0 %vm462_vm2, %v460_v8 }
  0xdc   : > { %v451_v10 = vpop.f32.mrf.mxu0 }
  0xdd   : > { %v452_v14 = vadd.f32 %v1535_v11, %v451_v10  ;;  %v1573_v10 = vld [vmem:[%s2061_s4 + $0x6] ss:$0 sm:$0xff] }
  0xde   : > { %v1658_v12 = vpop.f32.mrf.mxu0 }
  0xdf   : > { %v1881_v18 = vmax.f32 %v452_v14, 0.0  ;;  %v1578_v12 = vld [vmem:[%s2061_s4 + $0x7] ss:$0 sm:$0xff] }
  0xe0   : > { %v454_v13 = vpop.f32.mrf.mxu0 }
  0xe1   : > { %v455_v15 = vadd.f32 %v1535_v11, %v454_v13 }
  0xe2   : > { %v1659_v16 = vpop.f32.mrf.mxu0 }
  0xe3   : > { %v1879_v17 = vmax.f32 %v455_v15, 0.0 }
  0xe5   : > { %1660 = vmatprep.subr.mxu0 %v1879_v17  ;;  %1667 = vmatprep.subr.mxu1 %v1879_v17 }
  0xe6   : > { %1661 = vmatpush3.msra.mxu0 %v1879_v17  ;;  %1668 = vmatpush3.msra.mxu1 %v1879_v17 }
  0xe7   : > { %1662 = vmatprep.subr.mxu0 %v1881_v18  ;;  %1669 = vmatprep.subr.mxu1 %v1881_v18 }
  0xe8   : > { %1663 = vmatpush3.msra.mxu0 %v1881_v18  ;;  %1670 = vmatpush3.msra.mxu1 %v1881_v18 }
  0xe9   : > { %1665 = vmatmul.mubr.msk.f32.vlgmr.msra.gmra.mxu0 %vm462_vm2, %v461_v19  ;;  %1672 = vmatmul.mubr.msk.f32.vlgmr.msra.gmra.mxu1 %vm462_vm2, %v1545_v20 }
  0xea   : > { %1674 = vmatprep.subr.mxu1 %v1879_v17  ;;  %1695 = vmatprep.subr.mxu0 %v1879_v17 }
  0xeb   : > { %1675 = vmatpush3.msra.mxu1 %v1879_v17  ;;  %1696 = vmatpush3.msra.mxu0 %v1879_v17 }
  0xec   : > { %1676 = vmatprep.subr.mxu1 %v1881_v18  ;;  %1697 = vmatprep.subr.mxu0 %v1881_v18 }
  0xed   : > { %1677 = vmatpush3.msra.mxu1 %v1881_v18  ;;  %1678 = vmatprep.mubr.msk.f32.mxu1 %vm462_vm2, %v1549_v21 }
  0xee   : > { %1698 = vmatpush3.msra.mxu0 %v1881_v18  ;;  %1679 = vmatmul.mubr.msk.f32.vlgmr.msra.gmra.mxu1 %vm462_vm2, %v1550_v22 }
  0xef   : > { %1681 = vmatprep.subr.mxu1 %v1879_v17  ;;  %1699 = vmatprep.mubr.msk.f32.mxu0 %vm462_vm2, %v1564_v23 }
  0xf0   : > { %1709 = vmatprep.subr.mxu0 %v1879_v17  ;;  %1682 = vmatpush3.msra.mxu1 %v1879_v17 }
  0xf1   : > { %1700 = vmatmul.mubr.msk.f32.vlgmr.msra.gmra.mxu0 %vm462_vm2, %v1565_v24  ;;  %1683 = vmatprep.subr.mxu1 %v1881_v18  ;;  %v1583_v24 = vld [vmem:[%s2061_s4 + $0x8] ss:$0 sm:$0xff] }
  0xf2   : > { %1710 = vmatpush3.msra.mxu0 %v1879_v17  ;;  %1684 = vmatpush3.msra.mxu1 %v1881_v18 }
  0xf3   : > { %1711 = vmatprep.subr.mxu0 %v1881_v18  ;;  %1685 = vmatprep.mubr.msk.f32.mxu1 %vm462_vm2, %v1554_v25 }
  0xf4   : > { %1712 = vmatpush3.msra.mxu0 %v1881_v18  ;;  %1686 = vmatmul.mubr.msk.f32.vlgmr.msra.gmra.mxu1 %vm462_vm2, %v1555_v26 }
  0xf5   : > { %1688 = vmatprep.subr.mxu1 %v1879_v17  ;;  %1692 = vmatprep.mubr.msk.f32.mxu1 %vm462_vm2, %v1559_v27 }
  0xf6   : > { %1689 = vmatpush3.msra.mxu1 %v1879_v17  ;;  %1713 = vmatprep.mubr.msk.f32.mxu0 %vm462_vm2, %v1574_v28 }
  0xf7   : > { %1690 = vmatprep.subr.mxu1 %v1881_v18  ;;  %1714 = vmatmul.mubr.msk.f32.vlgmr.msra.gmra.mxu0 %vm462_vm2, %v1575_v29 }
  0xf8   : > { %1691 = vmatpush3.msra.mxu1 %v1881_v18  ;;  %1723 = vmatprep.subr.bf16.mxu0 %v1773_v1 }
  0xf9   : > { %1693 = vmatmul.mubr.msk.f32.vlgmr.msra.gmra.mxu1 %vm462_vm2, %v1560_v30  ;;  %1702 = vmatprep.subr.mxu1 %v1879_v17 }
  0xfa   : > { %1703 = vmatpush3.msra.mxu1 %v1879_v17  ;;  %1706 = vmatprep.mubr.msk.f32.mxu1 %vm462_vm2, %v1569_v31 }
  0xfb   : > { %1704 = vmatprep.subr.mxu1 %v1881_v18  ;;  %1727 = vmatprep.mubr.msk.bf16.mxu0 %vm1774_vm0, %v1773_v1 }
  0xfc   : > { %1705 = vmatpush3.msra.mxu1 %v1881_v18  ;;  %1724 = vmatpush3.bf16.msra.mxu0 %v1763_v39 }
  0xfd   : > { %1707 = vmatmul.mubr.msk.f32.vlgmr.msra.gmra.mxu1 %vm462_vm2, %v1570_v32  ;;  %1716 = vmatprep.subr.mxu1 %v1879_v17 }
  0xfe   : > { %1717 = vmatpush3.msra.mxu1 %v1879_v17  ;;  %1720 = vmatprep.mubr.msk.f32.mxu1 %vm462_vm2, %v1579_v33  ;;  %v1584_v33 = vld [vmem:[%s2062_s5] ss:$0 sm:$0xff] }
  0xff   : > { %1718 = vmatprep.subr.mxu1 %v1881_v18  ;;  %1725 = vmatprep.subr.bf16.mxu0 %v1773_v1 }
 0x100   : > { %1719 = vmatpush3.msra.mxu1 %v1881_v18  ;;  %1726 = vmatpush3.bf16.msra.mxu0 %v1764_v40 }
 0x101   : > { %1721 = vmatmul.mubr.msk.f32.vlgmr.msra.gmra.mxu1 %vm462_vm2, %v1580_v34  ;;  %1731 = vmatprep.subr.bf16.mxu1 %v1773_v1 }
 0x102   : > { %1739 = vmatprep.mubr.msk.bf16.mxu1 %vm1774_vm0, %v1773_v1  ;;  %1732 = vmatpush3.bf16.msra.mxu1 %v1759_v35 }
 0x103   : > { %1733 = vmatprep.subr.bf16.mxu1 %v1773_v1 }
 0x106   : > { %1734 = vmatpush3.bf16.msra.mxu1 %v1760_v36 }
 0x107   : > { %1735 = vmatprep.subr.bf16.mxu1 %v1773_v1 }
 0x10a   : > { %1736 = vmatpush3.bf16.msra.mxu1 %v1761_v37 }
 0x10b   : > { %1737 = vmatprep.subr.bf16.mxu1 %v1773_v1 }
 0x10e   : > { %1738 = vmatpush3.bf16.msra.mxu1 %v1762_v38 }
 0x111   : > { %1740 = vmatmul.mubr.msk.bf16.vlgmr.msra.gmra.mxu1 %vm413_vm1, %v1864_v7 }
 0x1a9   : > { %v1673_v41 = vpop.f32.mrf.mxu1  ;;  %v1666_v43 = vpop.f32.mrf.mxu0 }
 0x1aa   : > { %v550_v50 = vmul.f32 %v1666_v43, %v1543_v45  ;;  %v643_v51 = vmul.f32 %v1673_v41, %v1548_v46 }
 0x1ab   : > { %v628_v42 = vpop.f32.mrf.mxu1  ;;  %v535_v48 = vpop.f32.mrf.mxu0 }
 0x1ac   : > { %v549_v54 = vmul.f32 %v1543_v45, %v535_v48  ;;  %v642_v55 = vmul.f32 %v1548_v46, %v628_v42  ;;  %v645_v58 = vadd.f32 %v643_v51, %v550_v50  ;;  %v1589_v48 = vld [vmem:[%s2066_s9] ss:$0 sm:$0xff] }
 0x1ae   : > { %v1680_v44 = vpop.f32.mrf.mxu1  ;;  %v644_v1 = vadd.f32 %v642_v55, %v549_v54 }
 0x1af   : > { %v736_v56 = vmul.f32 %v1680_v44, %v1553_v49 }
 0x1b0   : > { %v721_v47 = vpop.f32.mrf.mxu1 }
 0x1b1   : > { %v1701_v53 = vpop.f32.mrf.mxu0  ;;  %v735_v59 = vmul.f32 %v1553_v49, %v721_v47  ;;  %v738_v2 = vadd.f32 %v736_v56, %v645_v58  ;;  %v1585_v49 = vld [vmem:[%s2064_s7] ss:$0 sm:$0xff] }
 0x1b2   : > { %v1015_v8 = vmul.f32 %v1701_v53, %v1568_v63 }
 0x1b3   : > { %v1000_v0 = vpop.f32.mrf.mxu0  ;;  %v737_v5 = vadd.f32 %v735_v59, %v644_v1 }
 0x1b4   : > { %v1687_v57 = vpop.f32.mrf.mxu1  ;;  %v1014_v16 = vmul.f32 %v1568_v63, %v1000_v0 }
 0x1b5   : > { %v829_v60 = vmul.f32 %v1687_v57, %v1558_v52 }
 0x1b6   : > { %v814_v61 = vpop.f32.mrf.mxu1 }
 0x1b7   : > { %v828_v3 = vmul.f32 %v1558_v52, %v814_v61  ;;  %v831_v6 = vadd.f32 %v829_v60, %v738_v2  ;;  %v1715_v11 = vpop.f32.mrf.mxu0 }
 0x1b8   : > { %v1201_v21 = vmul.f32 %v1715_v11, %v1578_v12 }
 0x1b9   : > { %v1694_v4 = vpop.f32.mrf.mxu1  ;;  %v830_v13 = vadd.f32 %v828_v3, %v737_v5  ;;  %v1186_v23 = vpop.f32.mrf.mxu0 }
 0x1ba   : > { %v922_v7 = vmul.f32 %v1694_v4, %v1563_v62  ;;  %v1200_v31 = vmul.f32 %v1578_v12, %v1186_v23 }
 0x1bb   : > { %v907_v9 = vpop.f32.mrf.mxu1 }
 0x1bc   : > { %v924_v14 = vadd.f32 %v922_v7, %v831_v6  ;;  %v921_v15 = vmul.f32 %v1563_v62, %v907_v9 }
 0x1bd   : > { %v1708_v17 = vpop.f32.mrf.mxu1 }
 0x1be   : > { %v1017_v18 = vadd.f32 %v1015_v8, %v924_v14  ;;  %v923_v19 = vadd.f32 %v921_v15, %v830_v13  ;;  %v1108_v20 = vmul.f32 %v1708_v17, %v1573_v10 }
 0x1bf   : > { %v1093_v22 = vpop.f32.mrf.mxu1 }
 0x1c0   : > { %v1016_v25 = vadd.f32 %v1014_v16, %v923_v19  ;;  %v1110_v26 = vadd.f32 %v1108_v20, %v1017_v18  ;;  %v1107_v27 = vmul.f32 %v1573_v10, %v1093_v22 }
 0x1c1   : > { %v1722_v28 = vpop.f32.mrf.mxu1 }
 0x1c2   : > { %v1203_v29 = vadd.f32 %v1201_v21, %v1110_v26  ;;  %v1109_v30 = vadd.f32 %v1107_v27, %v1016_v25  ;;  %v1294_v32 = vmul.f32 %v1722_v28, %v1583_v24 }
 0x1c3   : > { %v1279_v34 = vpop.f32.mrf.mxu1 }
 0x1c4   : > { %v1202_v35 = vadd.f32 %v1200_v31, %v1109_v30  ;;  %v1296_v36 = vadd.f32 %v1294_v32, %v1203_v29  ;;  %v1293_v37 = vmul.f32 %v1583_v24, %v1279_v34 }
 0x1c6   : > { %v1305_v38 = vadd.f32 %v1584_v33, %v1296_v36  ;;  %v1295_v39 = vadd.f32 %v1293_v37, %v1202_v35 }
 0x1c8   : > { %v1304_v40 = vadd.f32 %v1584_v33, %v1295_v39  ;;  %v1307_v41 = vmax.f32 %v1305_v38, 0.0 }
 0x1ca   : > { %v1306_v42 = vmax.f32 %v1304_v40, 0.0 }
 0x1cc   : > { %v1308_v43 = vpack.c.bf16 %v1307_v41, %v1306_v42 }
 0x1ce   : > { %1728 = vmatmul.mubr.msk.bf16.vlgmr.msra.gmra.mxu0 %vm1332_vm3, %v1308_v43 }
 0x1d1   : > { %v1450_v44 = vpop.f32.mrf.mxu1 }
 0x1d2   : > { %v1451_v50 = vadd.f32 %v1589_v48, %v1450_v44 }
 0x1d3   : > { %v1741_v45 = vpop.f32.mrf.mxu1 }
 0x1d5   : > { %v1453_v46 = vpop.f32.mrf.mxu1 }
 0x1d6   : > { %v1454_v56 = vadd.f32 %v1589_v48, %v1453_v46 }
 0x1d7   : > { %v1742_v47 = vpop.f32.mrf.mxu1 }
 0x28e   : > { %v1370_v51 = vpop.f32.mrf.mxu0 }
 0x28f   : > { %v1371_v52 = vadd.f32 %v1585_v49, %v1370_v51 }
 0x290   : > { %v1729_v53 = vpop.f32.mrf.mxu0 }
 0x291   : > { %v1457_v54 = vadd.f32 %v1451_v50, %v1371_v52 }
 0x292   : > { %v1373_v55 = vpop.f32.mrf.mxu0 }
 0x293   : > { %v1459_v57 = vmax.f32 %v1457_v54, 0.0  ;;  %v1374_v58 = vadd.f32 %v1585_v49, %v1373_v55 }
 0x294   : > { %v1730_v59 = vpop.f32.mrf.mxu0 }
 0x295   : > { %v1463_v60 = vcombine.high %v1459_v57, %v1459_v57  ;;  %1467 = vst [vmem:[%s359_s17] sm:$0xf] %v1459_v57  ;;  %v1458_v61 = vadd.f32 %v1454_v56, %v1374_v58 }
 0x297   : > { %1468 = vst [vmem:[%s359_s17 + $0x4] sm:$0xf] %v1463_v60  ;;  %v1460_v62 = vmax.f32 %v1458_v61, 0.0 }
 0x299   : > { %v1464_v63 = vcombine.high %v1460_v62, %v1460_v62  ;;  %1469 = vst [vmem:[%s359_s17 + $0x8] sm:$0xf] %v1460_v62 }
 0x29b   : > { %1470 = vst [vmem:[%s359_s17 + $0xc] sm:$0xf] %v1464_v63 }
 0x29c PF: > { %s20_s13 = sadd.s32 1, %s1771_s13  }
 0x29d   : > { %p17_p4 = scmp.ge.s32.totalorder %s20_s13, 4  }
 0x29f   :  { %19 = sbr.rel (!%p17_p4) target bundleno = 1 (0x1), region = 98 }

// kernel: robust_resnet_forward.11
= control target key start
LH: loop header
LB: loop body
LE: loop exit
PB: predicated region body
PF: predicated region fallthrough
CT: control target
= control target key end

     0   :  { %vm24_vm0 = vcmask 1043456   ;;  %s433_s0 = inlined_call_operand.vmem [shape: f32[2,4,256], index: 0, kind: input, shape index: {}]   ;;  %s434_s1 = inlined_call_operand.vmem [shape: bf16[256,10], index: 1, kind: input, shape index: {}]   ;;  %s435_s2 = inlined_call_operand.vmem [shape: f32[1,10], index: 2, kind: input, shape index: {}]   ;;  %s436_s3 = inlined_call_operand.hbm [shape: f32[2,10], index: 3, kind: output, shape index: {}]  }
   0x1   :  { %v308_v0 = vld [vmem:[%s434_s1 + $0x78] sm:$0xff]   ;;  %v310_v2 = vld [vmem:[%s434_s1 + $0x70] sm:$0xff]   ;;  %v312_v4 = vld [vmem:[%s434_s1 + $0x68] sm:$0xff]  }
   0x2   :  { %v309_v1 = vld [vmem:[%s434_s1 + $0x38] sm:$0xff]   ;;  %285 = vmatprep.subr.bf16.mxu0 %v308_v0  ;;  %v311_v3 = vld [vmem:[%s434_s1 + $0x30] sm:$0xff]   ;;  %v313_v5 = vld [vmem:[%s434_s1 + $0x28] sm:$0xff]  }
   0x3   :  { %286 = vmatpush3.bf16.msra.mxu0 %v309_v1  ;;  %v314_v6 = vld [vmem:[%s434_s1 + $0x60] sm:$0xff]   ;;  %v316_v8 = vld [vmem:[%s434_s1 + $0x58] sm:$0xff]   ;;  %v318_v10 = vld [vmem:[%s434_s1 + $0x50] sm:$0xff]  }
   0x4   :  { %287 = vmatprep.subr.bf16.mxu0 %v310_v2  ;;  %v315_v7 = vld [vmem:[%s434_s1 + $0x20] sm:$0xff]   ;;  %v317_v9 = vld [vmem:[%s434_s1 + $0x18] sm:$0xff]   ;;  %v17_v12 = vld [vmem:[%s433_s0 + $0x8] sm:$0xff] }
   0x5   :  { %v16_v11 = vld [vmem:[%s433_s0] sm:$0xff] }
   0x7   :  { %288 = vmatpush3.bf16.msra.mxu0 %v311_v3 }
   0x8   :  { %289 = vmatprep.subr.bf16.mxu0 %v312_v4 }
   0xb   :  { %290 = vmatpush3.bf16.msra.mxu0 %v313_v5 }
   0xc   :  { %291 = vmatprep.subr.bf16.mxu0 %v314_v6 }
   0xf   :  { %292 = vmatpush3.bf16.msra.mxu0 %v315_v7 }
  0x10   :  { %293 = vmatprep.subr.bf16.mxu0 %v316_v8 }
  0x11   :  { %8 = vsyncpa [#allocation3], 0  ;;  %v20_v13 = vcombine.high %v16_v11, %v16_v11  ;;  %v21_v14 = vcombine.high %v17_v12, %v17_v12  ;;  %v25_v15 = vsel %vm24_vm0, %v16_v11, 0.0  ;;  %v39_v16 = vsel %vm24_vm0, %v17_v12, 0.0  ;;  %v319_v19 = vld [vmem:[%s434_s1 + $0x10] sm:$0xff]   ;;  %v320_v22 = vld [vmem:[%s434_s1 + $0x48] sm:$0xff]  }
  0x12   :  { %v26_v17 = vrot.slane %v25_v15, 4  ;;  %v40_v18 = vrot.slane %v39_v16, 4  ;;  %v321_v31 = vld [vmem:[%s434_s1 + $0x8] sm:$0xff]   ;;  %v322_v32 = vld [vmem:[%s434_s1 + $0x40] sm:$0xff]   ;;  %vm109_vm1 = vcmask 1041409   ;;  %s348_s21 = smov [#allocation2]  }
  0x13   :  { %294 = vmatpush3.bf16.msra.mxu0 %v317_v9  ;;  %v32_v20 = vsel %vm24_vm0, %v20_v13, 0.0  ;;  %v46_v21 = vsel %vm24_vm0, %v21_v14, 0.0  ;;  %v323_v41 = vld [vmem:[%s434_s1] sm:$0xff]   ;;  %s260_s22 = sshll.u32 %s348_s21, 4  ;;  %vm252_vm2 = vcmask 74752   ;;  %s261_s22 = int_to_ptr.vmem [resolvable:$true] %s260_s22 }
  0x14   :  { %295 = vmatprep.subr.bf16.mxu0 %v318_v10  ;;  %v33_v23 = vrot.slane %v32_v20, 4  ;;  %v47_v24 = vrot.slane %v46_v21, 4  ;;  %v27_v25 = vadd.f32 %v26_v17, %v25_v15  ;;  %v41_v26 = vadd.f32 %v40_v18, %v39_v16  ;;  %v268_v1 = vld [vmem:[%s435_s2] ss:$0 sm:$0xff]  ;;  %s326_s23 = scalar_lea.vmem %s261_s22, 32  ;;  %p331_p1 = scmp.lt.s32.totalorder %s261_s22, %s261_s22 }
  0x15   :  { %p327_p0 = scmp.ne.s32.totalorder %s261_s22, %s326_s23  ;;  %p332_p2 = scmp.lt.s32.totalorder %s326_s23, %s326_s23 }
  0x16   :  { %v34_v27 = vadd.f32 %v33_v23, %v32_v20  ;;  %v48_v28 = vadd.f32 %v47_v24, %v46_v21  ;;  %v28_v29 = vrot.slane %v27_v25, 2  ;;  %v42_v30 = vrot.slane %v41_v26, 2 }
  0x17   :  { %296 = vmatpush3.bf16.msra.mxu0 %v319_v19  ;;  %p333_p3 = por %p332_p2, %p331_p1 }
  0x18   :  { %297 = vmatprep.subr.bf16.mxu0 %v320_v22  ;;  %v35_v33 = vrot.slane %v34_v27, 2  ;;  %v49_v34 = vrot.slane %v48_v28, 2  ;;  %v29_v35 = vadd.f32 %v28_v29, %v27_v25  ;;  %v43_v36 = vadd.f32 %v42_v30, %v41_v26 }
  0x19   :  { %p334_p4 = pnand %p333_p3, %p327_p0 }
  0x1a   :  { %v36_v37 = vadd.f32 %v35_v33, %v34_v27  ;;  %v50_v38 = vadd.f32 %v49_v34, %v48_v28  ;;  %v30_v39 = vrot.slane %v29_v35, 1  ;;  %v44_v40 = vrot.slane %v43_v36, 1 }
  0x1b   :  { %298 = vmatpush3.bf16.msra.mxu0 %v321_v31 }
  0x1c   :  { %299 = vmatprep.subr.bf16.mxu0 %v322_v32  ;;  %v37_v42 = vrot.slane %v36_v37, 1  ;;  %v51_v43 = vrot.slane %v50_v38, 1  ;;  %v31_v44 = vadd.f32 %v30_v39, %v29_v35  ;;  %v45_v45 = vadd.f32 %v44_v40, %v43_v36 }
  0x1e   :  { %v38_v46 = vadd.f32 %v37_v42, %v36_v37  ;;  %v52_v47 = vadd.f32 %v51_v43, %v50_v38  ;;  %v54_v48 = vmul.f32 0.25, %v31_v44  ;;  %v56_v49 = vmul.f32 0.25, %v45_v45 }
  0x1f   :  { %300 = vmatpush3.bf16.msra.mxu0 %v323_v41 }
  0x20   :  { %v55_v50 = vmul.f32 0.25, %v38_v46  ;;  %v57_v51 = vmul.f32 0.25, %v52_v47  ;;  %v58_v52 = vpack.c.bf16 %v54_v48, %v54_v48  ;;  %v60_v53 = vpack.c.bf16 %v56_v49, %v56_v49 }
  0x22   :  { %v59_v54 = vpack.c.bf16 %v55_v50, %v55_v50  ;;  %v61_v55 = vpack.c.bf16 %v57_v51, %v57_v51  ;;  %v105_v56 = vunpack.c.l.b16 %v58_v52  ;;  %v107_v57 = vunpack.c.l.b16 %v60_v53 }
  0x24   :  { %v106_v58 = vunpack.c.l.b16 %v59_v54  ;;  %v108_v59 = vunpack.c.l.b16 %v61_v55  ;;  %v110_v60 = vsel %vm109_vm1, %v107_v57, %v105_v56 }
  0x25   :  { %v112_v62 = vpack.c.b16 %v110_v60, %v110_v60 }
  0x26   :  { %v111_v61 = vsel %vm109_vm1, %v108_v59, %v106_v58 }
  0x27   :  { %v113_v63 = vpack.c.b16 %v111_v61, %v111_v61 }
  0x29   :  { %244 = vmatprep.mubr.bf16.mxu0 %v113_v63 }
  0x2a   :  { %245 = vmatmul.mubr.bf16.vlgmr.msra.gmra.mxu0 %v112_v62 }
  0xea   :  { %v301_v0 = vpop.f32.mrf.mxu0 }
  0xec   :  { %v302_v2 = vpop.f32.mrf.mxu0 }
  0xed   :  { %v303_v3 = vadd.f32 %v302_v2, %v301_v0 }
  0xee   :  { %v304_v4 = vpop.f32.mrf.mxu0 }
  0xef   :  { %v247_v5 = vadd.f32 %v303_v3, %v268_v1 }
  0xf0   :  { %v305_v6 = vpop.f32.mrf.mxu0 }
  0xf1   :  { %253 = vst.msk [vmem:[#allocation2] sm:$0x3] %vm252_vm2, %v247_v5 }
  0xf2   :  { %337 = shalt.err (!%p334_p4)
}
  0xf3   :  { %263 = dma.vmem_to_hbm [thread:$0]  %s261_s22, 32, %s436_s3, [#allocation3]  }
  0xf4   :  { %346 = dma.done.wait [#allocation3], 32  }
  0xf5   :  { %347 = vsyncadd [#allocation3], 4294967264 }
  0xf6   :  { %267 = vsyncpa [#allocation3], 1 }

// kernel: robust_resnet_forward.10
= control target key start
LH: loop header
LB: loop body
LE: loop exit
PB: predicated region body
PF: predicated region fallthrough
CT: control target
= control target key end

     0   :  { %s1965_s13 = smov 0   ;;  %s2216_s0 = inlined_call_operand.vmem [shape: f32[2,4,4,128], index: 0, kind: input, shape index: {}]   ;;  %s2217_s1 = inlined_call_operand.vmem [shape: bf16[128,64], index: 1, kind: input, shape index: {}]   ;;  %s2218_s2 = inlined_call_operand.vmem [shape: f32[1,64], index: 2, kind: input, shape index: {}, may-alias: {2,5}]   ;;  %s2219_s3 = inlined_call_operand.vmem [shape: f32[9,4,16], index: 3, kind: input, shape index: {}]   ;;  %s2220_s4 = inlined_call_operand.vmem [shape: f32[9,64], index: 4, kind: input, shape index: {}]   ;;  %s2221_s5 = inlined_call_operand.vmem [shape: f32[1,64], index: 5, kind: input, shape index: {}, may-alias: {2,5}]   ;;  %s2222_s6 = inlined_call_operand.vmem [shape: bf16[64,256], index: 6, kind: input, shape index: {}]   ;;  %s2223_s7 = inlined_call_operand.vmem [shape: f32[1,256], index: 7, kind: input, shape index: {}, may-alias: {7,9}]   ;;  %s2224_s8 = inlined_call_operand.vmem [shape: bf16[128,256], index: 8, kind: input, shape index: {}]   ;;  %s2225_s9 = inlined_call_operand.vmem [shape: f32[1,256], index: 9, kind: input, shape index: {}, may-alias: {7,9}]   ;;  %s2226_s10 = inlined_call_operand.vmem [shape: f32[2,2,2,256], index: 10, kind: output, shape index: {}]  }
   0x1 LB: > { %s1635_s14 = sadd.s32 4294967295, %s1904_s13   ;;  %p1639_p0 = scmp.ge.s32.totalorder %s1904_s13, 1  ;;  %s1904_s13 = sphi %s1965_s13, %s20_s13  }
   0x2   : > { %p312_p1 = scmp.lt.s32.totalorder %s1904_s13, 3 }
   0x4   : > { %p313_p2 = pnand %p1639_p0, %p312_p1 }
   0x5   : > { %p350_p3 = scmp.lt.s32.totalorder (!%p313_p2), %s1635_s14, 1 }
   0x6   : > { %316 = sbr.rel (%p313_p2) target bundleno = 686 (0x2ae), region = 60 }
   0xb   : > { %v1852_v0 = vld [vmem:[%s2217_s1 + $0x38] sm:$0xff]   ;;  %v1906_v1 = vmov 0.0   ;;  %v1853_v2 = vld [vmem:[%s2217_s1 + $0x30] sm:$0xff]   ;;  %vm1907_vm0 = vmmov 0   ;;  %s2228_s14 = smov (!%p350_p3, %s1635_s14), 1  ;;  %v1854_v3 = vld [vmem:[%s2217_s1 + $0x28] sm:$0xff]  }
   0xc   : > { %1750 = vmatprep.subr.bf16.mxu0 %v1906_v1  ;;  %1784 = vmatprep.subr.mxu1 %v1906_v1  ;;  %s1709_s21 = sshll.u32 %s2228_s14, 4  ;;  %v1855_v4 = vld [vmem:[%s2217_s1 + $0x20] sm:$0xff]   ;;  %v1856_v5 = vld [vmem:[%s2217_s1 + $0x18] sm:$0xff]   ;;  %v1857_v6 = vld [vmem:[%s2217_s1 + $0x10] sm:$0xff]   ;;  %vm489_vm1 = vcmask 130048   ;;  %v1908_v53 = vmov 0  }
   0xd   : > { %1751 = vmatpush3.bf16.msra.mxu0 %v1852_v0  ;;  %1766 = vmatprep.mubr.msk.bf16.mxu0 %vm1907_vm0, %v1906_v1  ;;  %s354_s24 = scalar_lea.vmem %s2216_s0, %s1709_s21  ;;  %v1858_v7 = vld [vmem:[%s2217_s1 + $0x8] sm:$0xff]   ;;  %v1859_v10 = vld [vmem:[%s2217_s1] sm:$0xff]   ;;  %v1664_v25 = vld [vmem:[%s2219_s3 + $0x10] sm:$0xf]  ;;  %vm1296_vm2 = vcmask 523264   ;;  %s1710_s19 = sshll.u32 %s2228_s14, 3 }
   0xe   : > { %1752 = vmatprep.subr.bf16.mxu0 %v1906_v1  ;;  %1788 = vmatprep.mubr.msk.f32.mxu1 %vm1907_vm0, %v1906_v1  ;;  %v2012_v8 = vld [vmem:[%s354_s24] sm:$0xff]   ;;  %v2014_v9 = vld [vmem:[%s354_s24 + $0x8] sm:$0xff]   ;;  %v1667_v26 = vld [vmem:[%s2219_s3 + $0x14] sm:$0xf]  ;;  %s359_s22 = scalar_lea.vmem %s2226_s10, %s1710_s19 }
   0xf   : > { %v373_v11 = vpack.c.bf16 %v2014_v9, %v2012_v8  ;;  %v1644_v13 = vld [vmem:[%s2218_s2] ss:$0 sm:$0xff]  ;;  %v1658_v22 = vld [vmem:[%s2219_s3 + $0x8] sm:$0xf]  ;;  %v1655_v23 = vld [vmem:[%s2219_s3 + $0x4] sm:$0xf] }
  0x10   : > { %v488_v21 = vld [vmem:[%s2219_s3] sm:$0xf]  ;;  %v1661_v24 = vld [vmem:[%s2219_s3 + $0xc] sm:$0xf]  ;;  %v1670_v27 = vld [vmem:[%s2219_s3 + $0x18] sm:$0xf] }
  0x11   : > { %1753 = vmatpush3.bf16.msra.mxu0 %v1853_v2  ;;  %v1673_v28 = vld [vmem:[%s2219_s3 + $0x1c] sm:$0xf]  ;;  %v1676_v29 = vld [vmem:[%s2219_s3 + $0x20] sm:$0xf]  ;;  %v1862_v31 = vld [vmem:[%s2224_s8 + $0x70] ss:$8 sps:$4 sm:$0xff]  }
  0x12   : > { %1754 = vmatprep.subr.bf16.mxu0 %v1906_v1  ;;  %v1864_v30 = vld [vmem:[%s2224_s8 + $0x74] ss:$8 sps:$4 sm:$0xff]   ;;  %v1865_v32 = vld [vmem:[%s2224_s8 + $0x60] ss:$8 sps:$4 sm:$0xff]   ;;  %v1867_v33 = vld [vmem:[%s2224_s8 + $0x64] ss:$8 sps:$4 sm:$0xff]  }
  0x13   : > { %v1870_v34 = vld [vmem:[%s2224_s8 + $0x54] ss:$8 sps:$4 sm:$0xff]   ;;  %v1868_v35 = vld [vmem:[%s2224_s8 + $0x50] ss:$8 sps:$4 sm:$0xff]   ;;  %v1873_v36 = vld [vmem:[%s2224_s8 + $0x44] ss:$8 sps:$4 sm:$0xff]  }
  0x14   : > { %v1871_v37 = vld [vmem:[%s2224_s8 + $0x40] ss:$8 sps:$4 sm:$0xff]   ;;  %v1876_v38 = vld [vmem:[%s2224_s8 + $0x34] ss:$8 sps:$4 sm:$0xff]   ;;  %v1874_v39 = vld [vmem:[%s2224_s8 + $0x30] ss:$8 sps:$4 sm:$0xff]  }
  0x15   : > { %1755 = vmatpush3.bf16.msra.mxu0 %v1854_v3  ;;  %v1879_v40 = vld [vmem:[%s2222_s6 + $0x34] ss:$8 sps:$4 sm:$0xff]   ;;  %v1882_v41 = vld [vmem:[%s2224_s8 + $0x24] ss:$8 sps:$4 sm:$0xff]   ;;  %v1877_v42 = vld [vmem:[%s2222_s6 + $0x30] ss:$8 sps:$4 sm:$0xff]  }
  0x16   : > { %1756 = vmatprep.subr.bf16.mxu0 %v1906_v1  ;;  %v1880_v43 = vld [vmem:[%s2224_s8 + $0x20] ss:$8 sps:$4 sm:$0xff]   ;;  %v1885_v44 = vld [vmem:[%s2222_s6 + $0x24] ss:$8 sps:$4 sm:$0xff]   ;;  %v1888_v45 = vld [vmem:[%s2224_s8 + $0x14] ss:$8 sps:$4 sm:$0xff]  }
  0x17   : > { %v1883_v46 = vld [vmem:[%s2222_s6 + $0x20] ss:$8 sps:$4 sm:$0xff]   ;;  %v1886_v47 = vld [vmem:[%s2224_s8 + $0x10] ss:$8 sps:$4 sm:$0xff]   ;;  %v1891_v48 = vld [vmem:[%s2222_s6 + $0x14] ss:$8 sps:$4 sm:$0xff]  }
  0x18   : > { %v1894_v49 = vld [vmem:[%s2224_s8 + $0x4] ss:$8 sps:$4 sm:$0xff]   ;;  %v1889_v50 = vld [vmem:[%s2222_s6 + $0x10] ss:$8 sps:$4 sm:$0xff]   ;;  %v1892_v51 = vld [vmem:[%s2224_s8] ss:$8 sps:$4 sm:$0xff]  }
  0x19   : > { %1757 = vmatpush3.bf16.msra.mxu0 %v1855_v4  ;;  %v1897_v52 = vld [vmem:[%s2222_s6 + $0x4] ss:$8 sps:$4 sm:$0xff]   ;;  %v1895_v54 = vld [vmem:[%s2222_s6] ss:$8 sps:$4 sm:$0xff]  }
  0x1a   : > { %1758 = vmatprep.subr.bf16.mxu0 %v1906_v1  ;;  %v1654_v57 = vld [vmem:[%s2220_s4] ss:$0 sm:$0xff]  ;;  %v1657_v60 = vld [vmem:[%s2220_s4 + $0x1] ss:$0 sm:$0xff]  ;;  %v1660_v0 = vld [vmem:[%s2220_s4 + $0x2] ss:$0 sm:$0xff] }
  0x1d   : > { %1759 = vmatpush3.bf16.msra.mxu0 %v1856_v5 }
  0x1e   : > { %1760 = vmatprep.subr.bf16.mxu0 %v1906_v1 }
  0x21   : > { %1761 = vmatpush3.bf16.msra.mxu0 %v1857_v6  ;;  %v1663_v6 = vld [vmem:[%s2220_s4 + $0x3] ss:$0 sm:$0xff] }
  0x22   : > { %1762 = vmatprep.subr.bf16.mxu0 %v1906_v1 }
  0x25   : > { %1763 = vmatpush3.bf16.msra.mxu0 %v1858_v7 }
  0x26   : > { %1764 = vmatprep.subr.bf16.mxu0 %v1906_v1 }
  0x29   : > { %1765 = vmatpush3.bf16.msra.mxu0 %v1859_v10 }
  0x2a   : > { %1770 = vmatprep.subr.mxu0 %v1906_v1 }
  0x2c   : > { %1767 = vmatmul.mubr.bf16.vlgmr.msra.gmra.mxu0 %v373_v11  ;;  %v1666_v11 = vld [vmem:[%s2220_s4 + $0x4] ss:$0 sm:$0xff] }
  0x2d   : > { %1774 = vmatprep.mubr.msk.f32.mxu0 %vm1907_vm0, %v1906_v1 }
  0xec   : > { %v479_v12 = vpop.f32.mrf.mxu0 }
  0xed   : > { %v480_v16 = vadd.f32 %v1644_v13, %v479_v12 }
  0xee   : > { %v1768_v14 = vpop.f32.mrf.mxu0 }
  0xef   : > { %v486_v20 = vmax.f32 %v480_v16, 0.0  ;;  %v1669_v14 = vld [vmem:[%s2220_s4 + $0x5] ss:$0 sm:$0xff] }
  0xf0   : > { %v482_v15 = vpop.f32.mrf.mxu0 }
  0xf1   : > { %v483_v17 = vadd.f32 %v1644_v13, %v482_v15 }
  0xf2   : > { %v1769_v18 = vpop.f32.mrf.mxu0 }
  0xf3   : > { %v487_v19 = vmax.f32 %v483_v17, 0.0  ;;  %v1672_v18 = vld [vmem:[%s2220_s4 + $0x6] ss:$0 sm:$0xff] }
  0xf5   : > { %1771 = vmatpush3.msra.mxu0 %v487_v19  ;;  %1785 = vmatpush3.msra.mxu1 %v487_v19 }
  0xf6   : > { %1772 = vmatprep.subr.mxu0 %v1906_v1  ;;  %1786 = vmatprep.subr.mxu1 %v1906_v1 }
  0xf7   : > { %1773 = vmatpush3.msra.mxu0 %v486_v20  ;;  %1787 = vmatpush3.msra.mxu1 %v486_v20 }
  0xf8   : > { %1775 = vmatmul.mubr.msk.f32.vlgmr.msra.gmra.mxu0 %vm489_vm1, %v488_v21  ;;  %1777 = vmatprep.subr.mxu0 %v1906_v1 }
  0xf9   : > { %1789 = vmatmul.mubr.msk.f32.vlgmr.msra.gmra.mxu1 %vm489_vm1, %v1658_v22  ;;  %1791 = vmatprep.subr.mxu1 %v1906_v1  ;;  %v1675_v22 = vld [vmem:[%s2220_s4 + $0x7] ss:$0 sm:$0xff] }
  0xfa   : > { %1778 = vmatpush3.msra.mxu0 %v487_v19  ;;  %1792 = vmatpush3.msra.mxu1 %v487_v19 }
  0xfb   : > { %1779 = vmatprep.subr.mxu0 %v1906_v1  ;;  %1793 = vmatprep.subr.mxu1 %v1906_v1 }
  0xfc   : > { %1780 = vmatpush3.msra.mxu0 %v486_v20  ;;  %1781 = vmatprep.mubr.msk.f32.mxu0 %vm1907_vm0, %v1906_v1 }
  0xfd   : > { %1794 = vmatpush3.msra.mxu1 %v486_v20  ;;  %1795 = vmatprep.mubr.msk.f32.mxu1 %vm1907_vm0, %v1906_v1 }
  0xfe   : > { %1782 = vmatmul.mubr.msk.f32.vlgmr.msra.gmra.mxu0 %vm489_vm1, %v1655_v23  ;;  %1796 = vmatmul.mubr.msk.f32.vlgmr.msra.gmra.mxu1 %vm489_vm1, %v1661_v24 }
  0xff   : > { %1798 = vmatprep.subr.mxu1 %v1906_v1  ;;  %1802 = vmatprep.mubr.msk.f32.mxu1 %vm1907_vm0, %v1906_v1 }
 0x100   : > { %1799 = vmatpush3.msra.mxu1 %v487_v19  ;;  %1308 = vmatprep.subr.bf16.mxu0 %v1879_v40 }
 0x101   : > { %1800 = vmatprep.subr.mxu1 %v1906_v1  ;;  %1309 = vmatpush1.bf16.msra.mxu0 %v1877_v42  ;;  %v1246_v42 = vlaneseq }
 0x102   : > { %1801 = vmatpush3.msra.mxu1 %v486_v20  ;;  %1310 = vmatprep.subr.bf16.mxu0 %v1885_v44 }
 0x103   : > { %1803 = vmatmul.mubr.msk.f32.vlgmr.msra.gmra.mxu1 %vm489_vm1, %v1664_v25  ;;  %1805 = vmatprep.subr.mxu1 %v1906_v1 }
 0x104   : > { %1806 = vmatpush3.msra.mxu1 %v487_v19  ;;  %1809 = vmatprep.mubr.msk.f32.mxu1 %vm1907_vm0, %v1906_v1 }
 0x105   : > { %1807 = vmatprep.subr.mxu1 %v1906_v1  ;;  %1311 = vmatpush1.bf16.msra.mxu0 %v1883_v46  ;;  %v1244_v46 = vld [vmem:[%s2223_s7] sm:$0x3] }
 0x106   : > { %1808 = vmatpush3.msra.mxu1 %v486_v20  ;;  %1312 = vmatprep.subr.bf16.mxu0 %v1891_v48 }
 0x107   : > { %1810 = vmatmul.mubr.msk.f32.vlgmr.msra.gmra.mxu1 %vm489_vm1, %v1667_v26  ;;  %1812 = vmatprep.subr.mxu1 %v1906_v1 }
 0x108   : > { %1813 = vmatpush3.msra.mxu1 %v487_v19  ;;  %1816 = vmatprep.mubr.msk.f32.mxu1 %vm1907_vm0, %v1906_v1 }
 0x109   : > { %1814 = vmatprep.subr.mxu1 %v1906_v1  ;;  %1313 = vmatpush1.bf16.msra.mxu0 %v1889_v50 }
 0x10a   : > { %1815 = vmatpush3.msra.mxu1 %v486_v20  ;;  %1332 = vmatprep.mubr.bf16.mxu0 %v1908_v53 }
 0x10b   : > { %1817 = vmatmul.mubr.msk.f32.vlgmr.msra.gmra.mxu1 %vm489_vm1, %v1670_v27  ;;  %1819 = vmatprep.subr.mxu1 %v1906_v1 }
 0x10c   : > { %1820 = vmatpush3.msra.mxu1 %v487_v19  ;;  %1823 = vmatprep.mubr.msk.f32.mxu1 %vm1907_vm0, %v1906_v1 }
 0x10d   : > { %1821 = vmatprep.subr.mxu1 %v1906_v1  ;;  %1314 = vmatprep.subr.bf16.mxu0 %v1897_v52 }
 0x10e   : > { %1822 = vmatpush3.msra.mxu1 %v486_v20  ;;  %1315 = vmatpush1.bf16.msra.mxu0 %v1895_v54 }
 0x10f   : > { %1824 = vmatmul.mubr.msk.f32.vlgmr.msra.gmra.mxu1 %vm489_vm1, %v1673_v28  ;;  %1826 = vmatprep.subr.mxu1 %v1906_v1  ;;  %v1678_v28 = vld [vmem:[%s2220_s4 + $0x8] ss:$0 sm:$0xff] }
 0x110   : > { %1827 = vmatpush3.msra.mxu1 %v487_v19  ;;  %1830 = vmatprep.mubr.msk.f32.mxu1 %vm1907_vm0, %v1906_v1 }
 0x111   : > { %1828 = vmatprep.subr.mxu1 %v1906_v1 }
 0x112   : > { %1829 = vmatpush3.msra.mxu1 %v486_v20 }
 0x113   : > { %1831 = vmatmul.mubr.msk.f32.vlgmr.msra.gmra.mxu1 %vm489_vm1, %v1676_v29  ;;  %1833 = vmatprep.subr.mxu1 %v1906_v1 }
 0x114   : > { %1834 = vmatpush3.msra.mxu1 %v2014_v9  ;;  %1837 = vmatprep.mubr.msk.f32.mxu1 %vm1907_vm0, %v1906_v1 }
 0x115   : > { %1835 = vmatprep.subr.mxu1 %v1906_v1 }
 0x116   : > { %1836 = vmatpush3.msra.mxu1 %v2012_v8 }
 0x117   : > { %1838 = vmatmul.mubr.msk.f32.vlgmr.msra.gmra.mxu1 %vm489_vm1, %v1664_v25  ;;  %1520 = vmatprep.subr.bf16.mxu1 %v1864_v30 }
 0x118   : > { %1521 = vmatpush1.bf16.msra.mxu1 %v1862_v31  ;;  %1552 = vmatprep.mubr.bf16.mxu1 %v1908_v53 }
 0x119   : > { %1522 = vmatprep.subr.bf16.mxu1 %v1867_v33  ;;  %v1679_v33 = vld [vmem:[%s2221_s5] ss:$0 sm:$0xff] }
 0x11c   : > { %1523 = vmatpush1.bf16.msra.mxu1 %v1865_v32 }
 0x11d   : > { %1524 = vmatprep.subr.bf16.mxu1 %v1870_v34 }
 0x120   : > { %1525 = vmatpush1.bf16.msra.mxu1 %v1868_v35 }
 0x121   : > { %1526 = vmatprep.subr.bf16.mxu1 %v1873_v36 }
 0x124   : > { %1527 = vmatpush1.bf16.msra.mxu1 %v1871_v37 }
 0x125   : > { %1528 = vmatprep.subr.bf16.mxu1 %v1876_v38 }
 0x128   : > { %1529 = vmatpush1.bf16.msra.mxu1 %v1874_v39 }
 0x129   : > { %1530 = vmatprep.subr.bf16.mxu1 %v1882_v41 }
 0x12c   : > { %1531 = vmatpush1.bf16.msra.mxu1 %v1880_v43  ;;  %v1247_v43 = vshrl.u32 %v1246_v42, 7 }
 0x12d   : > { %1532 = vmatprep.subr.bf16.mxu1 %v1888_v45  ;;  %v1428_v45 = vld [vmem:[%s2225_s9] sm:$0x3] }
 0x12e   : > { %v1248_v44 = vsub.s32 0, %v1247_v43  ;;  %v1252_v48 = vsub.s32 1, %v1247_v43 }
 0x130   : > { %1533 = vmatpush1.bf16.msra.mxu1 %v1886_v47  ;;  %v1433_v47 = vrot.slane %v1428_v45, %v1248_v44  ;;  %v1249_v50 = vrot.slane %v1244_v46, %v1248_v44  ;;  %v1437_v53 = vrot.slane %v1428_v45, %v1252_v48  ;;  %v1253_v54 = vrot.slane %v1244_v46, %v1252_v48 }
 0x131   : > { %1534 = vmatprep.subr.bf16.mxu1 %v1894_v49 }
 0x134   : > { %1535 = vmatpush1.bf16.msra.mxu1 %v1892_v51 }
 0x1b8   : > { %v559_v55 = vpop.f32.mrf.mxu0 }
 0x1b9   : > { %v723_v56 = vpop.f32.mrf.mxu1  ;;  %v568_v61 = vmul.f32 %v1654_v57, %v559_v55  ;;  %v1909_v55 = vmov 1983009808  }
 0x1ba   : > { %v1776_v58 = vpop.f32.mrf.mxu0  ;;  %v732_v5 = vmul.f32 %v1660_v0, %v723_v56  ;;  %v1569_v56 = vunpack.c.l.s4 %v1909_v55 }
 0x1bb   : > { %v1790_v59 = vpop.f32.mrf.mxu1 }
 0x1be   : > { %v641_v62 = vpop.f32.mrf.mxu0  ;;  %v805_v63 = vpop.f32.mrf.mxu1 }
 0x1bf   : > { %v650_v1 = vmul.f32 %v1657_v60, %v641_v62  ;;  %v814_v10 = vmul.f32 %v1663_v6, %v805_v63 }
 0x1c0   : > { %v1797_v2 = vpop.f32.mrf.mxu1  ;;  %v1783_v3 = vpop.f32.mrf.mxu0 }
 0x1c1   : > { %v651_v4 = vadd.f32 %v650_v1, %v568_v61  ;;  %v1570_v1 = vunpack.c.0.s8 %v1569_v56 }
 0x1c3   : > { %v887_v7 = vpop.f32.mrf.mxu1  ;;  %v733_v8 = vadd.f32 %v732_v5, %v651_v4 }
 0x1c4   : > { %v896_v16 = vmul.f32 %v1666_v11, %v887_v7  ;;  %v1573_v7 = vsub.s32 %v1570_v1, %v1247_v43 }
 0x1c5   : > { %v1804_v9 = vpop.f32.mrf.mxu1  ;;  %v815_v13 = vadd.f32 %v814_v10, %v733_v8 }
 0x1c7   : > { %v969_v12 = vpop.f32.mrf.mxu1  ;;  %v897_v19 = vadd.f32 %v896_v16, %v815_v13 }
 0x1c8   : > { %v978_v20 = vmul.f32 %v1669_v14, %v969_v12 }
 0x1c9   : > { %v1811_v15 = vpop.f32.mrf.mxu1 }
 0x1ca   : > { %v979_v25 = vadd.f32 %v978_v20, %v897_v19 }
 0x1cb   : > { %v1051_v17 = vpop.f32.mrf.mxu1 }
 0x1cc   : > { %v1060_v23 = vmul.f32 %v1672_v18, %v1051_v17 }
 0x1cd   : > { %v1818_v21 = vpop.f32.mrf.mxu1 }
 0x1ce   : > { %v1061_v29 = vadd.f32 %v1060_v23, %v979_v25 }
 0x1cf   : > { %v1133_v24 = vpop.f32.mrf.mxu1 }
 0x1d0   : > { %v1142_v26 = vmul.f32 %v1675_v22, %v1133_v24 }
 0x1d1   : > { %v1825_v27 = vpop.f32.mrf.mxu1 }
 0x1d2   : > { %v1143_v31 = vadd.f32 %v1142_v26, %v1061_v29 }
 0x1d3   : > { %v1215_v30 = vpop.f32.mrf.mxu1 }
 0x1d4   : > { %v1224_v32 = vmul.f32 %v1678_v28, %v1215_v30 }
 0x1d5   : > { %v1832_v34 = vpop.f32.mrf.mxu1 }
 0x1d6   : > { %v1225_v35 = vadd.f32 %v1224_v32, %v1143_v31 }
 0x1d7   : > { %v1407_v36 = vpop.f32.mrf.mxu1 }
 0x1d8   : > { %v1233_v37 = vadd.f32 %v1679_v33, %v1225_v35  ;;  %v1411_v38 = vpack.c.bf16 %v1407_v36, %v1407_v36 }
 0x1d9   : > { %v1839_v39 = vpop.f32.mrf.mxu1 }
 0x1da   : > { %v1234_v40 = vmax.f32 %v1233_v37, 0.0  ;;  %1553 = vmatmul.mubr.bf16.vlgmr.msra.gmra.mxu1 %v1411_v38 }
 0x1dc   : > { %v1235_v41 = vpack.c.bf16 %v1234_v40, %v1234_v40 }
 0x1de   : > { %1688 = vmatmul.mubr.msk.bf16.vlgmr.msra.gmra.mxu0 %vm1296_vm2, %v1235_v41 }
 0x29a   : > { %v1554_v49 = vpop.f32.mrf.mxu1 }
 0x29b   : > { %v1555_v52 = vadd.f32 %v1554_v49, %v1433_v47 }
 0x29c   : > { %v1556_v51 = vpop.f32.mrf.mxu1 }
 0x29d   : > { %v1557_v62 = vadd.f32 %v1556_v51, %v1437_v53 }
 0x29e   : > { %v1334_v57 = vpop.f32.mrf.mxu0  ;;  %v1558_v58 = vpop.f32.mrf.mxu1 }
 0x29f   : > { %v1335_v59 = vadd.f32 %v1334_v57, %v1249_v50 }
 0x2a0   : > { %v1336_v60 = vpop.f32.mrf.mxu0  ;;  %v1559_v61 = vpop.f32.mrf.mxu1 }
 0x2a1   : > { %v1561_v63 = vadd.f32 %v1555_v52, %v1335_v59  ;;  %v1337_v0 = vadd.f32 %v1336_v60, %v1253_v54 }
 0x2a2   : > { %v1338_v2 = vpop.f32.mrf.mxu0 }
 0x2a3   : > { %v1562_v3 = vadd.f32 %v1557_v62, %v1337_v0  ;;  %v1563_v5 = vmax.f32 %v1561_v63, 0.0 }
 0x2a4   : > { %v1339_v4 = vpop.f32.mrf.mxu0 }
 0x2a5   : > { %v1564_v6 = vmax.f32 %v1562_v3, 0.0 }
 0x2a7   : > { %v1567_v8 = vcombine.low %v1563_v5, %v1564_v6 }
 0x2a9   : > { %v1574_v9 = vrot.slane %v1567_v8, %v1573_v7  ;;  %1706 = vst.sshfl [vmem:[%s359_s22] sm:$0x33 pattern:$0x76325410] %v1567_v8 }
 0x2ab   : > { %v1575_v10 = vcombine.high %v1574_v9, %v1574_v9 }
 0x2ad   : > { %1579 = vst [vmem:[%s359_s22 + $0x4] sm:$0xf] %v1575_v10 }
 0x2ae PF: > { %s20_s13 = sadd.s32 1, %s1904_s13  }
 0x2af   : > { %p17_p4 = scmp.ge.s32.totalorder %s20_s13, 4  }
 0x2b1   :  { %19 = sbr.rel (!%p17_p4) target bundleno = 1 (0x1), region = 98 }

</bundles_post_ra>
